<compile_context>
chip_gen: v6e
topology: v6e:2x2x1
jax: 0.10.0
libtpu: 0.0.40
codegen_flags: <defaults>
</compile_context>

<pallas_src>
import functools

import numpy as np
import jax
import jax.numpy as jnp
from jax.experimental import pallas as pl
from jax.experimental.pallas import tpu as pltpu


def _silu(x):
    return x * jax.nn.sigmoid(x)


def _egcl_kernel(x_ref, hh_ref, adj_ref, wadj_ref,
                 we1r_ref, we1s_ref, we1d_ref, be1_ref,
                 we2_ref, be2_ref,
                 wc1_ref, bc1_ref, wc2t_ref,
                 wn1h_ref, wn1e_ref, bn1_ref, wn2_ref, bn2_ref,
                 xo_ref, ho_ref,
                 *, residual, normalize, tanh, eps):
    f32 = jnp.float32
    N = x_ref.shape[0]
    TN = adj_ref.shape[0]
    H = we2_ref.shape[0]
    E = TN * N

    i0 = pl.multiple_of(pl.program_id(0) * TN, TN)

    x_all = x_ref[...]                         # (N, 3)   all node coords (sources)
    hh_all = hh_ref[...]                       # (N, F)   all node features (sources)
    x_dst = x_ref[pl.ds(i0, TN), :]            # (TN, 3)  dst tile
    hh_dst = hh_ref[pl.ds(i0, TN), :]          # (TN, F)  dst tile
    adj = adj_ref[...]                         # (TN, N)  adj[i, j] = edge j -> (i0+i)
    wadj = wadj_ref[...]                       # (TN, N)  adj / in-degree (mailbox mean)

    # --- edge-MLP layer 1 feature terms hoisted to node granularity (MXU) ---
    hs_w = jnp.dot(hh_all, we1s_ref[...], preferred_element_type=f32)    # (N, H)
    hd_w = (jnp.dot(hh_dst, we1d_ref[...], preferred_element_type=f32)
            + be1_ref[...])                                              # (TN, H), bias folded

    # --- per-edge geometry via broadcast (VPU only) ---
    coord_diff = x_all[None, :, :] - x_dst[:, None, :]                   # (TN, N, 3)
    radial = jnp.sum(coord_diff * coord_diff, axis=-1, keepdims=True)    # (TN, N, 1)

    # --- edge_mlp ---
    pre1 = (radial * we1r_ref[...][None, :, :]
            + hs_w[None, :, :] + hd_w[:, None, :])                       # (TN, N, H)
    h1 = _silu(pre1).reshape(E, H)                                       # (E, H)
    ef = _silu(jnp.dot(h1, we2_ref[...], preferred_element_type=f32)
               + be2_ref[...])                                           # (E, H)

    # --- coord_mlp: Linear(H->H) + SiLU (MXU), final H->1 as VPU mul + lane reduce ---
    c1 = _silu(jnp.dot(ef, wc1_ref[...], preferred_element_type=f32)
               + bc1_ref[...])                                           # (E, H)
    c1 = c1.reshape(TN, N, H)
    cs = jnp.sum(c1 * wc2t_ref[...][None, :, :], axis=-1, keepdims=True)  # (TN, N, 1)
    if tanh:
        cs = jnp.tanh(cs)

    cd = coord_diff
    if normalize:
        cd = cd / (jnp.sqrt(radial) + eps)

    # --- mask + segment sums over incoming edges (VPU multiply + XLU reduce) ---
    # mean(trans): fold the mask AND 1/deg into the per-edge scalar before the 3-wide mul.
    cs_w = cs * wadj[:, :, None]                                          # (TN, N, 1)
    coord_out = x_dst + jnp.sum(cd * cs_w, axis=1)                        # (TN, 3)
    # sum(edge_feature): plain masked reduce.
    ef_sum = jnp.sum(ef.reshape(TN, N, H) * adj[:, :, None], axis=1)      # (TN, H)

    # --- node_mlp: Linear(cat(hh, ef_sum)) as split matmuls ---
    n1 = _silu(jnp.dot(hh_dst, wn1h_ref[...], preferred_element_type=f32)
               + jnp.dot(ef_sum, wn1e_ref[...], preferred_element_type=f32)
               + bn1_ref[...])
    h_out = jnp.dot(n1, wn2_ref[...], preferred_element_type=f32) + bn2_ref[...]
    if residual:
        h_out = hh_dst + h_out

    xo_ref[...] = coord_out.astype(xo_ref.dtype)
    ho_ref[...] = h_out.astype(ho_ref.dtype)


def e_gcl_forward(x, hh, adj, params, *, tile_n=None,
                  residual=True, normalize=False, tanh=False, eps=1e-8,
                  vmem_limit_bytes=64 * 1024 * 1024):
    N, C = x.shape
    F = hh.shape[1]
    H = params["we2"].shape[0]
    O = params["wn2"].shape[1]

    if tile_n is None:
        # per-edge f32 working set ~ 6*H floats (+ slack); keep the tile under ~24 MiB
        bytes_per_edge = 4 * (6 * H + 16)
        cap = max(1, (24 * 1024 * 1024) // (bytes_per_edge * N))
        divisors = [d for d in range(1, N + 1) if N % d == 0 and d <= cap]
        aligned = [d for d in divisors if d == N or d % 8 == 0]
        tile_n = max(aligned) if aligned else max(divisors)
    assert N % tile_n == 0

    adj = adj.astype(jnp.float32)
    deg = jnp.maximum(jnp.sum(adj, axis=1, keepdims=True), 1.0)   # guard isolated nodes
    wadj = adj / deg                                              # (N, N), kernel-invariant

    weights = [
        params["we1r"], params["we1s"], params["we1d"], params["be1"],
        params["we2"], params["be2"],
        params["wc1"], params["bc1"], params["wc2"].reshape(1, -1),  # wc2 as a (1, H) row
        params["wn1h"], params["wn1e"], params["bn1"], params["wn2"], params["bn2"],
    ]

    kernel = functools.partial(_egcl_kernel, residual=residual,
                               normalize=normalize, tanh=tanh, eps=eps)

    def full_spec(arr):
        return pl.BlockSpec(arr.shape, lambda i: (0, 0))

    in_specs = [
        full_spec(x),                                      # all node coords (resident)
        full_spec(hh),                                     # all node features (resident)
        pl.BlockSpec((tile_n, N), lambda i: (i, 0)),       # adjacency rows of dst tile
        pl.BlockSpec((tile_n, N), lambda i: (i, 0)),       # degree-weighted adjacency rows
    ] + [full_spec(w) for w in weights]

    out_specs = (
        pl.BlockSpec((tile_n, C), lambda i: (i, 0)),
        pl.BlockSpec((tile_n, O), lambda i: (i, 0)),
    )

    x_out, h_out = pl.pallas_call(
        kernel,
        out_shape=(jax.ShapeDtypeStruct((N, C), jnp.float32),
                   jax.ShapeDtypeStruct((N, O), jnp.float32)),
        grid=(N // tile_n,),
        in_specs=in_specs,
        out_specs=out_specs,
        compiler_params=pltpu.CompilerParams(
            dimension_semantics=("parallel",),
            vmem_limit_bytes=vmem_limit_bytes),
    )(x, hh, adj, wadj, *weights)
    return x_out, h_out


def e_gcl_reference(x, hh, adj, p, *, residual=True, normalize=False, tanh=False, eps=1e-8):
    """Pure-JAX dense reference mirroring the DGL semantics."""
    N, F = hh.shape
    diff = x[None, :, :] - x[:, None, :]                 # diff[i, j] = x[j] - x[i]
    radial = jnp.sum(diff ** 2, axis=-1, keepdims=True)  # (N, N, 1)
    ef_in = jnp.concatenate(
        [radial,
         jnp.broadcast_to(hh[None, :, :], (N, N, F)),    # src features
         jnp.broadcast_to(hh[:, None, :], (N, N, F))],   # dst features
        axis=-1)
    we1 = jnp.concatenate([p["we1r"], p["we1s"], p["we1d"]], axis=0)
    h1 = _silu(ef_in @ we1 + p["be1"])
    ef = _silu(h1 @ p["we2"] + p["be2"])
    c1 = _silu(ef @ p["wc1"] + p["bc1"])
    cs = c1 @ p["wc2"]
    if tanh:
        cs = jnp.tanh(cs)
    cd = diff / (jnp.sqrt(radial) + eps) if normalize else diff
    trans = cd * cs
    mask = adj[:, :, None]
    deg = jnp.sum(adj, axis=1, keepdims=True)
    coord = x + jnp.sum(trans * mask, axis=1) / deg
    ef_sum = jnp.sum(ef * mask, axis=1)
    wn1 = jnp.concatenate([p["wn1h"], p["wn1e"]], axis=0)
    agg = jnp.concatenate([hh, ef_sum], axis=1)
    n1 = _silu(agg @ wn1 + p["bn1"])
    h = n1 @ p["wn2"] + p["bn2"]
    if residual:
        h = hh + h
    return coord, h


if __name__ == "__main__":
    # small shapes: N=16 nodes, 3-D coords, input_nf = hidden_nf = output_nf = 32
    N, F, H, O = 16, 32, 32, 32
    key = jax.random.PRNGKey(0)
    keys = jax.random.split(key, 17)

    x = jax.random.normal(keys[0], (N, 3), jnp.float32)
    hh = jax.random.normal(keys[1], (N, F), jnp.float32)
    # fully connected graph without self loops: adj[i, j] = 1 for edge j -> i
    adj = (jnp.ones((N, N), jnp.float32) - jnp.eye(N, dtype=jnp.float32))

    def lin(k, fan_in, shape, scale=None):
        s = scale if scale is not None else 1.0 / np.sqrt(fan_in)
        return jax.random.uniform(k, shape, jnp.float32, -s, s)

    # deterministic parameter init (shapes follow the PyTorch module's __init__)
    params = {
        # edge_mlp layer 1: Linear(2F+1 -> H), weight split into radial/src/dst rows
        "we1r": lin(keys[2], 2 * F + 1, (1, H)),
        "we1s": lin(keys[3], 2 * F + 1, (F, H)),
        "we1d": lin(keys[4], 2 * F + 1, (F, H)),
        "be1":  lin(keys[5], 2 * F + 1, (1, H)),
        # edge_mlp layer 2: Linear(H -> H)
        "we2":  lin(keys[6], H, (H, H)),
        "be2":  lin(keys[7], H, (1, H)),
        # coord_mlp: Linear(H -> H), SiLU, Linear(H -> 1, bias=False, xavier gain=1e-3)
        "wc1":  lin(keys[8], H, (H, H)),
        "bc1":  lin(keys[9], H, (1, H)),
        "wc2":  lin(keys[10], H, (H, 1), scale=0.001),
        # node_mlp layer 1: Linear(H + F -> H), weight split into hh/edge_feature rows
        "wn1h": lin(keys[11], F + H, (F, H)),
        "wn1e": lin(keys[12], F + H, (H, H)),
        "bn1":  lin(keys[13], F + H, (1, H)),
        # node_mlp layer 2: Linear(H -> O)
        "wn2":  lin(keys[14], H, (H, O)),
        "bn2":  lin(keys[15], H, (1, O)),
    }

    x_out, h_out = e_gcl_forward(x, hh, adj, params,
                                 residual=True, normalize=False, tanh=False)
    jax.block_until_ready((x_out, h_out))

    x_ref, h_ref = e_gcl_reference(x, hh, adj, params,
                                   residual=True, normalize=False, tanh=False)
    assert np.allclose(np.asarray(x_out), np.asarray(x_ref), rtol=1e-4, atol=1e-4)
    assert np.allclose(np.asarray(h_out), np.asarray(h_ref), rtol=1e-4, atol=1e-4)
    print("KERNEL_OK")
</pallas_src>

<mosaic_0001>
module attributes {stable_mosaic.version = 11 : i64} {
  func.func @_egcl_kernel(%arg0: i32, %arg1: memref<16x3xf32, #tpu.memory_space<vmem>>, %arg2: memref<16x32xf32, #tpu.memory_space<vmem>>, %arg3: memref<16x16xf32, #tpu.memory_space<vmem>>, %arg4: memref<16x16xf32, #tpu.memory_space<vmem>>, %arg5: memref<1x32xf32, #tpu.memory_space<vmem>>, %arg6: memref<32x32xf32, #tpu.memory_space<vmem>>, %arg7: memref<32x32xf32, #tpu.memory_space<vmem>>, %arg8: memref<1x32xf32, #tpu.memory_space<vmem>>, %arg9: memref<32x32xf32, #tpu.memory_space<vmem>>, %arg10: memref<1x32xf32, #tpu.memory_space<vmem>>, %arg11: memref<32x32xf32, #tpu.memory_space<vmem>>, %arg12: memref<1x32xf32, #tpu.memory_space<vmem>>, %arg13: memref<1x32xf32, #tpu.memory_space<vmem>>, %arg14: memref<32x32xf32, #tpu.memory_space<vmem>>, %arg15: memref<32x32xf32, #tpu.memory_space<vmem>>, %arg16: memref<1x32xf32, #tpu.memory_space<vmem>>, %arg17: memref<32x32xf32, #tpu.memory_space<vmem>>, %arg18: memref<1x32xf32, #tpu.memory_space<vmem>>, %arg19: memref<16x3xf32, #tpu.memory_space<vmem>>, %arg20: memref<16x32xf32, #tpu.memory_space<vmem>>) attributes {dimension_semantics = [#tpu.dimension_semantics<parallel>], iteration_bounds = array<i64: 1>, scalar_prefetch = 0 : i64, scratch_operands = 0 : i64, tpu.core_type = #tpu.core_type<tc>, window_params = [{pipeline_mode = #tpu.pipeline_mode<synchronous>, transform_indices = @transform_0, window_bounds = array<i64: 16, 3>}, {pipeline_mode = #tpu.pipeline_mode<synchronous>, transform_indices = @transform_1, window_bounds = array<i64: 16, 32>}, {transform_indices = @transform_2, window_bounds = array<i64: 16, 16>}, {transform_indices = @transform_3, window_bounds = array<i64: 16, 16>}, {pipeline_mode = #tpu.pipeline_mode<synchronous>, transform_indices = @transform_4, window_bounds = array<i64: 1, 32>}, {pipeline_mode = #tpu.pipeline_mode<synchronous>, transform_indices = @transform_5, window_bounds = array<i64: 32, 32>}, {pipeline_mode = #tpu.pipeline_mode<synchronous>, transform_indices = @transform_6, window_bounds = array<i64: 32, 32>}, {pipeline_mode = #tpu.pipeline_mode<synchronous>, transform_indices = @transform_7, window_bounds = array<i64: 1, 32>}, {pipeline_mode = #tpu.pipeline_mode<synchronous>, transform_indices = @transform_8, window_bounds = array<i64: 32, 32>}, {pipeline_mode = #tpu.pipeline_mode<synchronous>, transform_indices = @transform_9, window_bounds = array<i64: 1, 32>}, {pipeline_mode = #tpu.pipeline_mode<synchronous>, transform_indices = @transform_10, window_bounds = array<i64: 32, 32>}, {pipeline_mode = #tpu.pipeline_mode<synchronous>, transform_indices = @transform_11, window_bounds = array<i64: 1, 32>}, {pipeline_mode = #tpu.pipeline_mode<synchronous>, transform_indices = @transform_12, window_bounds = array<i64: 1, 32>}, {pipeline_mode = #tpu.pipeline_mode<synchronous>, transform_indices = @transform_13, window_bounds = array<i64: 32, 32>}, {pipeline_mode = #tpu.pipeline_mode<synchronous>, transform_indices = @transform_14, window_bounds = array<i64: 32, 32>}, {pipeline_mode = #tpu.pipeline_mode<synchronous>, transform_indices = @transform_15, window_bounds = array<i64: 1, 32>}, {pipeline_mode = #tpu.pipeline_mode<synchronous>, transform_indices = @transform_16, window_bounds = array<i64: 32, 32>}, {pipeline_mode = #tpu.pipeline_mode<synchronous>, transform_indices = @transform_17, window_bounds = array<i64: 1, 32>}, {transform_indices = @transform_18, window_bounds = array<i64: 16, 3>}, {transform_indices = @transform_19, window_bounds = array<i64: 16, 32>}]} {
    %c16_i32 = arith.constant 16 : i32
    %0 = arith.muli %arg0, %c16_i32 : i32
    %1 = tpu.assume_multiple %0, 16 : i32
    %c0 = arith.constant 0 : index
    %c0_0 = arith.constant 0 : index
    %2 = vector.load %arg1[%c0, %c0_0] : memref<16x3xf32, #tpu.memory_space<vmem>>, vector<16x3xf32>
    %c0_1 = arith.constant 0 : index
    %c0_2 = arith.constant 0 : index
    %3 = vector.load %arg2[%c0_1, %c0_2] : memref<16x32xf32, #tpu.memory_space<vmem>>, vector<16x32xf32>
    %4 = arith.index_cast %1 : i32 to index
    %c0_3 = arith.constant 0 : index
    %5 = vector.load %arg1[%4, %c0_3] : memref<16x3xf32, #tpu.memory_space<vmem>>, vector<16x3xf32>
    %6 = arith.index_cast %1 : i32 to index
    %c0_4 = arith.constant 0 : index
    %7 = vector.load %arg2[%6, %c0_4] : memref<16x32xf32, #tpu.memory_space<vmem>>, vector<16x32xf32>
    %c0_5 = arith.constant 0 : index
    %c0_6 = arith.constant 0 : index
    %8 = vector.load %arg3[%c0_5, %c0_6] : memref<16x16xf32, #tpu.memory_space<vmem>>, vector<16x16xf32>
    %c0_7 = arith.constant 0 : index
    %c0_8 = arith.constant 0 : index
    %9 = vector.load %arg4[%c0_7, %c0_8] : memref<16x16xf32, #tpu.memory_space<vmem>>, vector<16x16xf32>
    %c0_9 = arith.constant 0 : index
    %c0_10 = arith.constant 0 : index
    %10 = vector.load %arg6[%c0_9, %c0_10] : memref<32x32xf32, #tpu.memory_space<vmem>>, vector<32x32xf32>
    %cst = arith.constant dense<0.000000e+00> : vector<16x32xf32>
    %11 = tpu.matmul %3, %10, %cst {dimension_numbers = #tpu.dot_dimension_numbers<[1], [0], [0], [1], [0, 0, 1, 1], [], []>} : vector<16x32xf32>, vector<32x32xf32>, vector<16x32xf32> -> vector<16x32xf32>
    %c0_11 = arith.constant 0 : index
    %c0_12 = arith.constant 0 : index
    %12 = vector.load %arg7[%c0_11, %c0_12] : memref<32x32xf32, #tpu.memory_space<vmem>>, vector<32x32xf32>
    %cst_13 = arith.constant dense<0.000000e+00> : vector<16x32xf32>
    %13 = tpu.matmul %7, %12, %cst_13 {dimension_numbers = #tpu.dot_dimension_numbers<[1], [0], [0], [1], [0, 0, 1, 1], [], []>} : vector<16x32xf32>, vector<32x32xf32>, vector<16x32xf32> -> vector<16x32xf32>
    %c0_14 = arith.constant 0 : index
    %c0_15 = arith.constant 0 : index
    %14 = vector.load %arg8[%c0_14, %c0_15] : memref<1x32xf32, #tpu.memory_space<vmem>>, vector<1x32xf32>
    %15 = vector.broadcast %14 : vector<1x32xf32> to vector<16x32xf32>
    %16 = arith.addf %13, %15 : vector<16x32xf32>
    %17 = vector.shape_cast %2 : vector<16x3xf32> to vector<1x16x3xf32>
    %18 = vector.shape_cast %5 : vector<16x3xf32> to vector<16x1x3xf32>
    %19 = vector.broadcast %17 : vector<1x16x3xf32> to vector<16x16x3xf32>
    %20 = vector.broadcast %18 : vector<16x1x3xf32> to vector<16x16x3xf32>
    %21 = arith.subf %19, %20 : vector<16x16x3xf32>
    %22 = arith.mulf %21, %21 : vector<16x16x3xf32>
    %cst_16 = arith.constant dense<0.000000e+00> : vector<16x16xf32>
    %23 = vector.multi_reduction <add>, %22, %cst_16 [2] : vector<16x16x3xf32> to vector<16x16xf32>
    %24 = vector.shape_cast %23 : vector<16x16xf32> to vector<16x16x1xf32>
    %c0_17 = arith.constant 0 : index
    %c0_18 = arith.constant 0 : index
    %25 = vector.load %arg5[%c0_17, %c0_18] : memref<1x32xf32, #tpu.memory_space<vmem>>, vector<1x32xf32>
    %26 = vector.shape_cast %25 : vector<1x32xf32> to vector<1x1x32xf32>
    %27 = vector.broadcast %24 : vector<16x16x1xf32> to vector<16x16x32xf32>
    %28 = vector.broadcast %26 : vector<1x1x32xf32> to vector<16x16x32xf32>
    %29 = arith.mulf %27, %28 : vector<16x16x32xf32>
    %30 = vector.shape_cast %11 : vector<16x32xf32> to vector<1x16x32xf32>
    %31 = vector.broadcast %30 : vector<1x16x32xf32> to vector<16x16x32xf32>
    %32 = arith.addf %29, %31 : vector<16x16x32xf32>
    %33 = vector.shape_cast %16 : vector<16x32xf32> to vector<16x1x32xf32>
    %34 = vector.broadcast %33 : vector<16x1x32xf32> to vector<16x16x32xf32>
    %35 = arith.addf %32, %34 : vector<16x16x32xf32>
    %36 = arith.negf %35 : vector<16x16x32xf32>
    %37 = math.exp %36 : vector<16x16x32xf32>
    %cst_19 = arith.constant 1.000000e+00 : f32
    %38 = vector.broadcast %cst_19 : f32 to vector<16x16x32xf32>
    %39 = arith.addf %38, %37 : vector<16x16x32xf32>
    %40 = arith.divf %38, %39 : vector<16x16x32xf32>
    %41 = arith.mulf %35, %40 : vector<16x16x32xf32>
    %42 = vector.shape_cast %41 : vector<16x16x32xf32> to vector<256x32xf32>
    %c0_20 = arith.constant 0 : index
    %c0_21 = arith.constant 0 : index
    %43 = vector.load %arg9[%c0_20, %c0_21] : memref<32x32xf32, #tpu.memory_space<vmem>>, vector<32x32xf32>
    %cst_22 = arith.constant dense<0.000000e+00> : vector<256x32xf32>
    %44 = tpu.matmul %42, %43, %cst_22 {dimension_numbers = #tpu.dot_dimension_numbers<[1], [0], [0], [1], [0, 0, 1, 1], [], []>} : vector<256x32xf32>, vector<32x32xf32>, vector<256x32xf32> -> vector<256x32xf32>
    %c0_23 = arith.constant 0 : index
    %c0_24 = arith.constant 0 : index
    %45 = vector.load %arg10[%c0_23, %c0_24] : memref<1x32xf32, #tpu.memory_space<vmem>>, vector<1x32xf32>
    %46 = vector.broadcast %45 : vector<1x32xf32> to vector<256x32xf32>
    %47 = arith.addf %44, %46 : vector<256x32xf32>
    %48 = arith.negf %47 : vector<256x32xf32>
    %49 = math.exp %48 : vector<256x32xf32>
    %cst_25 = arith.constant 1.000000e+00 : f32
    %50 = vector.broadcast %cst_25 : f32 to vector<256x32xf32>
    %51 = arith.addf %50, %49 : vector<256x32xf32>
    %52 = arith.divf %50, %51 : vector<256x32xf32>
    %53 = arith.mulf %47, %52 : vector<256x32xf32>
    %c0_26 = arith.constant 0 : index
    %c0_27 = arith.constant 0 : index
    %54 = vector.load %arg11[%c0_26, %c0_27] : memref<32x32xf32, #tpu.memory_space<vmem>>, vector<32x32xf32>
    %cst_28 = arith.constant dense<0.000000e+00> : vector<256x32xf32>
    %55 = tpu.matmul %53, %54, %cst_28 {dimension_numbers = #tpu.dot_dimension_numbers<[1], [0], [0], [1], [0, 0, 1, 1], [], []>} : vector<256x32xf32>, vector<32x32xf32>, vector<256x32xf32> -> vector<256x32xf32>
    %c0_29 = arith.constant 0 : index
    %c0_30 = arith.constant 0 : index
    %56 = vector.load %arg12[%c0_29, %c0_30] : memref<1x32xf32, #tpu.memory_space<vmem>>, vector<1x32xf32>
    %57 = vector.broadcast %56 : vector<1x32xf32> to vector<256x32xf32>
    %58 = arith.addf %55, %57 : vector<256x32xf32>
    %59 = arith.negf %58 : vector<256x32xf32>
    %60 = math.exp %59 : vector<256x32xf32>
    %cst_31 = arith.constant 1.000000e+00 : f32
    %61 = vector.broadcast %cst_31 : f32 to vector<256x32xf32>
    %62 = arith.addf %61, %60 : vector<256x32xf32>
    %63 = arith.divf %61, %62 : vector<256x32xf32>
    %64 = arith.mulf %58, %63 : vector<256x32xf32>
    %65 = vector.shape_cast %64 : vector<256x32xf32> to vector<16x16x32xf32>
    %c0_32 = arith.constant 0 : index
    %c0_33 = arith.constant 0 : index
    %66 = vector.load %arg13[%c0_32, %c0_33] : memref<1x32xf32, #tpu.memory_space<vmem>>, vector<1x32xf32>
    %67 = vector.shape_cast %66 : vector<1x32xf32> to vector<1x1x32xf32>
    %68 = vector.broadcast %67 : vector<1x1x32xf32> to vector<16x16x32xf32>
    %69 = arith.mulf %65, %68 : vector<16x16x32xf32>
    %cst_34 = arith.constant dense<0.000000e+00> : vector<16x16xf32>
    %70 = vector.multi_reduction <add>, %69, %cst_34 [2] : vector<16x16x32xf32> to vector<16x16xf32>
    %71 = vector.shape_cast %70 : vector<16x16xf32> to vector<16x16x1xf32>
    %72 = vector.shape_cast %9 : vector<16x16xf32> to vector<16x16x1xf32>
    %73 = arith.mulf %71, %72 : vector<16x16x1xf32>
    %74 = vector.broadcast %73 : vector<16x16x1xf32> to vector<16x16x3xf32>
    %75 = arith.mulf %21, %74 : vector<16x16x3xf32>
    %cst_35 = arith.constant dense<0.000000e+00> : vector<16x3xf32>
    %76 = vector.multi_reduction <add>, %75, %cst_35 [1] : vector<16x16x3xf32> to vector<16x3xf32>
    %77 = arith.addf %5, %76 : vector<16x3xf32>
    %78 = vector.shape_cast %53 : vector<256x32xf32> to vector<16x16x32xf32>
    %79 = vector.shape_cast %8 : vector<16x16xf32> to vector<16x16x1xf32>
    %80 = vector.broadcast %79 : vector<16x16x1xf32> to vector<16x16x32xf32>
    %81 = arith.mulf %78, %80 : vector<16x16x32xf32>
    %cst_36 = arith.constant dense<0.000000e+00> : vector<16x32xf32>
    %82 = vector.multi_reduction <add>, %81, %cst_36 [1] : vector<16x16x32xf32> to vector<16x32xf32>
    %c0_37 = arith.constant 0 : index
    %c0_38 = arith.constant 0 : index
    %83 = vector.load %arg14[%c0_37, %c0_38] : memref<32x32xf32, #tpu.memory_space<vmem>>, vector<32x32xf32>
    %cst_39 = arith.constant dense<0.000000e+00> : vector<16x32xf32>
    %84 = tpu.matmul %7, %83, %cst_39 {dimension_numbers = #tpu.dot_dimension_numbers<[1], [0], [0], [1], [0, 0, 1, 1], [], []>} : vector<16x32xf32>, vector<32x32xf32>, vector<16x32xf32> -> vector<16x32xf32>
    %c0_40 = arith.constant 0 : index
    %c0_41 = arith.constant 0 : index
    %85 = vector.load %arg15[%c0_40, %c0_41] : memref<32x32xf32, #tpu.memory_space<vmem>>, vector<32x32xf32>
    %cst_42 = arith.constant dense<0.000000e+00> : vector<16x32xf32>
    %86 = tpu.matmul %82, %85, %cst_42 {dimension_numbers = #tpu.dot_dimension_numbers<[1], [0], [0], [1], [0, 0, 1, 1], [], []>} : vector<16x32xf32>, vector<32x32xf32>, vector<16x32xf32> -> vector<16x32xf32>
    %87 = arith.addf %84, %86 : vector<16x32xf32>
    %c0_43 = arith.constant 0 : index
    %c0_44 = arith.constant 0 : index
    %88 = vector.load %arg16[%c0_43, %c0_44] : memref<1x32xf32, #tpu.memory_space<vmem>>, vector<1x32xf32>
    %89 = vector.broadcast %88 : vector<1x32xf32> to vector<16x32xf32>
    %90 = arith.addf %87, %89 : vector<16x32xf32>
    %91 = arith.negf %90 : vector<16x32xf32>
    %92 = math.exp %91 : vector<16x32xf32>
    %cst_45 = arith.constant 1.000000e+00 : f32
    %93 = vector.broadcast %cst_45 : f32 to vector<16x32xf32>
    %94 = arith.addf %93, %92 : vector<16x32xf32>
    %95 = arith.divf %93, %94 : vector<16x32xf32>
    %96 = arith.mulf %90, %95 : vector<16x32xf32>
    %c0_46 = arith.constant 0 : index
    %c0_47 = arith.constant 0 : index
    %97 = vector.load %arg17[%c0_46, %c0_47] : memref<32x32xf32, #tpu.memory_space<vmem>>, vector<32x32xf32>
    %cst_48 = arith.constant dense<0.000000e+00> : vector<16x32xf32>
    %98 = tpu.matmul %96, %97, %cst_48 {dimension_numbers = #tpu.dot_dimension_numbers<[1], [0], [0], [1], [0, 0, 1, 1], [], []>} : vector<16x32xf32>, vector<32x32xf32>, vector<16x32xf32> -> vector<16x32xf32>
    %c0_49 = arith.constant 0 : index
    %c0_50 = arith.constant 0 : index
    %99 = vector.load %arg18[%c0_49, %c0_50] : memref<1x32xf32, #tpu.memory_space<vmem>>, vector<1x32xf32>
    %100 = vector.broadcast %99 : vector<1x32xf32> to vector<16x32xf32>
    %101 = arith.addf %98, %100 : vector<16x32xf32>
    %102 = arith.addf %7, %101 : vector<16x32xf32>
    %c0_51 = arith.constant 0 : index
    %c0_52 = arith.constant 0 : index
    %103 = vector.load %arg19[%c0_51, %c0_52] : memref<16x3xf32, #tpu.memory_space<vmem>>, vector<16x3xf32>
    tpu.vector_store %arg19[%c0_51, %c0_52], %77 {strides = array<i32>} : memref<16x3xf32, #tpu.memory_space<vmem>>, vector<16x3xf32>,
    %c0_53 = arith.constant 0 : index
    %c0_54 = arith.constant 0 : index
    %104 = vector.load %arg20[%c0_53, %c0_54] : memref<16x32xf32, #tpu.memory_space<vmem>>, vector<16x32xf32>
    tpu.vector_store %arg20[%c0_53, %c0_54], %102 {strides = array<i32>} : memref<16x32xf32, #tpu.memory_space<vmem>>, vector<16x32xf32>,
    return
  }
  func.func @transform_0(%arg0: i32) -> (i32, i32) {
    %c0_i32 = arith.constant 0 : i32
    %c0_i32_0 = arith.constant 0 : i32
    %c0_i32_1 = arith.constant 0 : i32
    return %c0_i32, %c0_i32_0 : i32, i32
  }
  func.func @transform_1(%arg0: i32) -> (i32, i32) {
    %c0_i32 = arith.constant 0 : i32
    %c0_i32_0 = arith.constant 0 : i32
    %c0_i32_1 = arith.constant 0 : i32
    return %c0_i32, %c0_i32_0 : i32, i32
  }
  func.func @transform_2(%arg0: i32) -> (i32, i32) {
    %c0_i32 = arith.constant 0 : i32
    %c0_i32_0 = arith.constant 0 : i32
    return %arg0, %c0_i32 : i32, i32
  }
  func.func @transform_3(%arg0: i32) -> (i32, i32) {
    %c0_i32 = arith.constant 0 : i32
    %c0_i32_0 = arith.constant 0 : i32
    return %arg0, %c0_i32 : i32, i32
  }
  func.func @transform_4(%arg0: i32) -> (i32, i32) {
    %c0_i32 = arith.constant 0 : i32
    %c0_i32_0 = arith.constant 0 : i32
    %c0_i32_1 = arith.constant 0 : i32
    return %c0_i32, %c0_i32_0 : i32, i32
  }
  func.func @transform_5(%arg0: i32) -> (i32, i32) {
    %c0_i32 = arith.constant 0 : i32
    %c0_i32_0 = arith.constant 0 : i32
    %c0_i32_1 = arith.constant 0 : i32
    return %c0_i32, %c0_i32_0 : i32, i32
  }
  func.func @transform_6(%arg0: i32) -> (i32, i32) {
    %c0_i32 = arith.constant 0 : i32
    %c0_i32_0 = arith.constant 0 : i32
    %c0_i32_1 = arith.constant 0 : i32
    return %c0_i32, %c0_i32_0 : i32, i32
  }
  func.func @transform_7(%arg0: i32) -> (i32, i32) {
    %c0_i32 = arith.constant 0 : i32
    %c0_i32_0 = arith.constant 0 : i32
    %c0_i32_1 = arith.constant 0 : i32
    return %c0_i32, %c0_i32_0 : i32, i32
  }
  func.func @transform_8(%arg0: i32) -> (i32, i32) {
    %c0_i32 = arith.constant 0 : i32
    %c0_i32_0 = arith.constant 0 : i32
    %c0_i32_1 = arith.constant 0 : i32
    return %c0_i32, %c0_i32_0 : i32, i32
  }
  func.func @transform_9(%arg0: i32) -> (i32, i32) {
    %c0_i32 = arith.constant 0 : i32
    %c0_i32_0 = arith.constant 0 : i32
    %c0_i32_1 = arith.constant 0 : i32
    return %c0_i32, %c0_i32_0 : i32, i32
  }
  func.func @transform_10(%arg0: i32) -> (i32, i32) {
    %c0_i32 = arith.constant 0 : i32
    %c0_i32_0 = arith.constant 0 : i32
    %c0_i32_1 = arith.constant 0 : i32
    return %c0_i32, %c0_i32_0 : i32, i32
  }
  func.func @transform_11(%arg0: i32) -> (i32, i32) {
    %c0_i32 = arith.constant 0 : i32
    %c0_i32_0 = arith.constant 0 : i32
    %c0_i32_1 = arith.constant 0 : i32
    return %c0_i32, %c0_i32_0 : i32, i32
  }
  func.func @transform_12(%arg0: i32) -> (i32, i32) {
    %c0_i32 = arith.constant 0 : i32
    %c0_i32_0 = arith.constant 0 : i32
    %c0_i32_1 = arith.constant 0 : i32
    return %c0_i32, %c0_i32_0 : i32, i32
  }
  func.func @transform_13(%arg0: i32) -> (i32, i32) {
    %c0_i32 = arith.constant 0 : i32
    %c0_i32_0 = arith.constant 0 : i32
    %c0_i32_1 = arith.constant 0 : i32
    return %c0_i32, %c0_i32_0 : i32, i32
  }
  func.func @transform_14(%arg0: i32) -> (i32, i32) {
    %c0_i32 = arith.constant 0 : i32
    %c0_i32_0 = arith.constant 0 : i32
    %c0_i32_1 = arith.constant 0 : i32
    return %c0_i32, %c0_i32_0 : i32, i32
  }
  func.func @transform_15(%arg0: i32) -> (i32, i32) {
    %c0_i32 = arith.constant 0 : i32
    %c0_i32_0 = arith.constant 0 : i32
    %c0_i32_1 = arith.constant 0 : i32
    return %c0_i32, %c0_i32_0 : i32, i32
  }
  func.func @transform_16(%arg0: i32) -> (i32, i32) {
    %c0_i32 = arith.constant 0 : i32
    %c0_i32_0 = arith.constant 0 : i32
    %c0_i32_1 = arith.constant 0 : i32
    return %c0_i32, %c0_i32_0 : i32, i32
  }
  func.func @transform_17(%arg0: i32) -> (i32, i32) {
    %c0_i32 = arith.constant 0 : i32
    %c0_i32_0 = arith.constant 0 : i32
    %c0_i32_1 = arith.constant 0 : i32
    return %c0_i32, %c0_i32_0 : i32, i32
  }
  func.func @transform_18(%arg0: i32) -> (i32, i32) {
    %c0_i32 = arith.constant 0 : i32
    %c0_i32_0 = arith.constant 0 : i32
    return %arg0, %c0_i32 : i32, i32
  }
  func.func @transform_19(%arg0: i32) -> (i32, i32) {
    %c0_i32 = arith.constant 0 : i32
    %c0_i32_0 = arith.constant 0 : i32
    return %arg0, %c0_i32 : i32, i32
  }
}

</mosaic_0001>

<bundles_post_ra>
// kernel: tpu_custom_call.1
= control target key start
LH: loop header
LB: loop body
LE: loop exit
PB: predicated region body
PF: predicated region fallthrough
CT: control target
= control target key end

     0   :  { %s6370_s0 = inlined_call_operand.vmem [shape: f32[16,3], index: 0, kind: input, shape index: {}]   ;;  %s6371_s1 = inlined_call_operand.hbm [shape: f32[16,32], index: 1, kind: input, shape index: {}]   ;;  %s6372_s2 = inlined_call_operand.hbm [shape: f32[16,16], index: 2, kind: input, shape index: {}]   ;;  %s6373_s3 = inlined_call_operand.hbm [shape: f32[16,16], index: 3, kind: input, shape index: {}]   ;;  %s6374_s4 = inlined_call_operand.vmem [shape: f32[1,32], index: 4, kind: input, shape index: {}]   ;;  %s6375_s5 = inlined_call_operand.hbm [shape: f32[32,32], index: 5, kind: input, shape index: {}]   ;;  %s6376_s6 = inlined_call_operand.hbm [shape: f32[32,32], index: 6, kind: input, shape index: {}]   ;;  %s6377_s7 = inlined_call_operand.vmem [shape: f32[1,32], index: 7, kind: input, shape index: {}]   ;;  %s6378_s8 = inlined_call_operand.vmem [shape: f32[32,32], index: 8, kind: input, shape index: {}]   ;;  %s6379_s9 = inlined_call_operand.vmem [shape: f32[1,32], index: 9, kind: input, shape index: {}]   ;;  %s6380_s10 = inlined_call_operand.hbm [shape: f32[32,32], index: 10, kind: input, shape index: {}]   ;;  %s6381_s11 = inlined_call_operand.vmem [shape: f32[1,32], index: 11, kind: input, shape index: {}]   ;;  %s6382_s12 = inlined_call_operand.vmem [shape: f32[1,32], index: 12, kind: input, shape index: {}]   ;;  %s6383_s13 = inlined_call_operand.hbm [shape: f32[32,32], index: 13, kind: input, shape index: {}]   ;;  %s6384_s14 = inlined_call_operand.hbm [shape: f32[32,32], index: 14, kind: input, shape index: {}]   ;;  %s6385_s15 = inlined_call_operand.vmem [shape: f32[1,32], index: 15, kind: input, shape index: {}]   ;;  %s6386_s16 = inlined_call_operand.hbm [shape: f32[32,32], index: 16, kind: input, shape index: {}]   ;;  %s6387_s17 = inlined_call_operand.vmem [shape: f32[1,32], index: 17, kind: input, shape index: {}]   ;;  %s6388_s18 = inlined_call_operand.vmem [shape: f32[16,3], index: 18, kind: output, shape index: {0}]   ;;  %s6389_s19 = inlined_call_operand.hbm [shape: f32[16,32], index: 19, kind: output, shape index: {1}]  }
   0x1   :  { %6431 = sst [smem:[#allocation60_spill]] %s6370_s0 }
   0x2   :  { %6432 = sst [smem:[#allocation61_spill]] %s6371_s1 }
   0x3   :  { %6433 = sst [smem:[#allocation62_spill]] %s6372_s2 }
   0x4   :  { %6434 = sst [smem:[#allocation63_spill]] %s6373_s3 }
   0x5   :  { %25 = vsyncpa [#allocation3], 0 }
   0x6   :  { %26 = vsyncpa [#allocation6], 0 }
   0x7   :  { %27 = vsyncpa [#allocation9], 0 }
   0x8   :  { %28 = vsyncpa [#allocation12], 0 }
   0x9   :  { %29 = vsyncpa [#allocation15], 0 }
   0xa   :  { %30 = vsyncpa [#allocation4], 0  ;;  %s4662_s0 = smov [#allocation5]   ;;  %s4663_s20 = smov [#allocation8]  }
   0xb   :  { %s50_s30 = sshll.u32 %s4662_s0, 4  ;;  %s76_s21 = sshll.u32 %s4663_s20, 4  ;;  %s51_s30 = int_to_ptr.vmem [resolvable:$true] %s50_s30  ;;  %s77_s21 = int_to_ptr.vmem [resolvable:$true] %s76_s21 }
   0xc   :  { %s4458_s1 = scalar_lea.vmem %s51_s30, 256  ;;  %p4463_p1 = scmp.lt.s32.totalorder %s51_s30, %s51_s30 }
   0xd   :  { %p4459_p0 = scmp.ne.s32.totalorder %s51_s30, %s4458_s1  ;;  %p4464_p2 = scmp.lt.s32.totalorder %s4458_s1, %s4458_s1 }
   0xf   :  { %p4465_p3 = por %p4464_p2, %p4463_p1 }
  0x11   :  { %p4466_p4 = pnand %p4465_p3, %p4459_p0 }
  0x13   :  { %4469 = shalt.err (!%p4466_p4)
}
  0x14   :  { %s4664_s22 = smov 128   ;;  %s4665_s2 = smov 8  }
  0x15   :  { %s6435_s25 = sld [smem:[#allocation62_spill]]  ;;  %s4478_s3 = scalar_lea.vmem %s77_s21, 512 }
  0x16   :  { %p4479_p5 = scmp.ne.s32.totalorder %s77_s21, %s4478_s3  ;;  %p4483_p6 = scmp.lt.s32.totalorder %s77_s21, %s77_s21 }
  0x17   :  { %p4484_p7 = scmp.lt.s32.totalorder %s4478_s3, %s4478_s3 }
  0x19   :  { %p4485_p8 = por %p4484_p7, %p4483_p6 }
  0x1b   :  { %56 = dma.hbm_to_vmem [thread:$0]  %s6435_s25, 256, %s51_s30, [#allocation6], %s4664_s22, %s4664_s22, %s4665_s2  }
  0x1c   :  { %p4486_p9 = pnand %p4485_p8, %p4479_p5 }
  0x1e   :  { %4489 = shalt.err (!%p4486_p9)
}
  0x1f   :  { %82 = dma.hbm_to_vmem [thread:$0]  %s6375_s5, 512, %s77_s21, [#allocation9], %s4664_s22, %s4664_s22, %s4665_s2  }
  0x20   :  { %s4666_s28 = smov [#allocation11]   ;;  %s4667_s0 = smov [#allocation14]  }
  0x21   :  { %s106_s29 = sshll.u32 %s4666_s28, 4  ;;  %s134_s20 = sshll.u32 %s4667_s0, 4  ;;  %s107_s29 = int_to_ptr.vmem [resolvable:$true] %s106_s29  ;;  %s135_s20 = int_to_ptr.vmem [resolvable:$true] %s134_s20 }
  0x22   :  { %s4498_s30 = scalar_lea.vmem %s107_s29, 512  ;;  %p4503_p11 = scmp.lt.s32.totalorder %s107_s29, %s107_s29 }
  0x23   :  { %p4499_p10 = scmp.ne.s32.totalorder %s107_s29, %s4498_s30  ;;  %p4504_p12 = scmp.lt.s32.totalorder %s4498_s30, %s4498_s30 }
  0x25   :  { %p4505_p13 = por %p4504_p12, %p4503_p11 }
  0x27   :  { %p4506_p0 = pnand %p4505_p13, %p4499_p10 }
  0x29   :  { %4509 = shalt.err (!%p4506_p0)
}
  0x2a   :  { %112 = dma.hbm_to_vmem [thread:$0]  %s6380_s10, 512, %s107_s29, [#allocation12], %s4664_s22, %s4664_s22, %s4665_s2  }
  0x2b   :  { %s4518_s5 = scalar_lea.vmem %s135_s20, 512  ;;  %p4523_p2 = scmp.lt.s32.totalorder %s135_s20, %s135_s20 }
  0x2c   :  { %p4519_p1 = scmp.ne.s32.totalorder %s135_s20, %s4518_s5  ;;  %p4524_p3 = scmp.lt.s32.totalorder %s4518_s5, %s4518_s5 }
  0x2e   :  { %p4525_p4 = por %p4524_p3, %p4523_p2 }
  0x30   :  { %p4526_p5 = pnand %p4525_p4, %p4519_p1 }
  0x32   :  { %4529 = shalt.err (!%p4526_p5)
}
  0x33   :  { %140 = dma.hbm_to_vmem [thread:$0]  %s6384_s14, 512, %s135_s20, [#allocation15], %s4664_s22, %s4664_s22, %s4665_s2  }
  0x34   :  { %s4668_s25 = smov [#allocation2]   ;;  %s4669_s26 = smov [#allocation7]  }
  0x35   :  { %s38_s3 = sshll.u32 %s4668_s25, 4  ;;  %s62_s27 = sshll.u32 %s4669_s26, 4  ;;  %s39_s3 = int_to_ptr.vmem [resolvable:$true] %s38_s3  ;;  %s63_s27 = int_to_ptr.vmem [resolvable:$true] %s62_s27 }
  0x36   :  { %s4538_s10 = scalar_lea.vmem %s39_s3, 256  ;;  %p4543_p7 = scmp.lt.s32.totalorder %s39_s3, %s39_s3 }
  0x37   :  { %p4539_p6 = scmp.ne.s32.totalorder %s39_s3, %s4538_s10  ;;  %p4544_p8 = scmp.lt.s32.totalorder %s4538_s10, %s4538_s10 }
  0x39   :  { %p4545_p9 = por %p4544_p8, %p4543_p7 }
  0x3b   :  { %p4546_p10 = pnand %p4545_p9, %p4539_p6 }
  0x3d   :  { %4549 = shalt.err (!%p4546_p10)
}
  0x3e   :  { %s6436_s0 = sld [smem:[#allocation61_spill]]  ;;  %s4558_s14 = scalar_lea.vmem %s63_s27, 256 }
  0x3f   :  { %p4559_p11 = scmp.ne.s32.totalorder %s63_s27, %s4558_s14  ;;  %p4563_p12 = scmp.lt.s32.totalorder %s63_s27, %s63_s27 }
  0x40   :  { %p4564_p13 = scmp.lt.s32.totalorder %s4558_s14, %s4558_s14 }
  0x42   :  { %p4565_p0 = por %p4564_p13, %p4563_p12 }
  0x44   :  { %44 = dma.hbm_to_vmem [thread:$0]  %s6436_s0, 256, %s39_s3, [#allocation3], %s4664_s22, %s4664_s22, %s4665_s2  }
  0x45   :  { %p4566_p1 = pnand %p4565_p0, %p4559_p11 }
  0x47   :  { %4569 = shalt.err (!%p4566_p1)
}
  0x48   :  { %s6437_s1 = sld [smem:[#allocation63_spill]]  ;;  %s4670_s23 = smov [#allocation10]  }
  0x49   :  { %s88_s5 = sshll.u32 %s4670_s23, 4  ;;  %s4671_s21 = smov [#allocation13]   ;;  %s89_s5 = int_to_ptr.vmem [resolvable:$true] %s88_s5 }
  0x4a   :  { %s122_s24 = sshll.u32 %s4671_s21, 4  ;;  %s4578_s25 = scalar_lea.vmem %s89_s5, 512  ;;  %s123_s24 = int_to_ptr.vmem [resolvable:$true] %s122_s24 }
  0x4b   :  { %p4579_p2 = scmp.ne.s32.totalorder %s89_s5, %s4578_s25  ;;  %p4583_p3 = scmp.lt.s32.totalorder %s89_s5, %s89_s5 }
  0x4c   :  { %p4584_p4 = scmp.lt.s32.totalorder %s4578_s25, %s4578_s25 }
  0x4e   :  { %68 = dma.hbm_to_vmem [thread:$0]  %s6437_s1, 256, %s63_s27, [#allocation6], %s4664_s22, %s4664_s22, %s4665_s2  }
  0x4f   :  { %p4585_p5 = por %p4584_p4, %p4583_p3 }
  0x51   :  { %p4586_p6 = pnand %p4585_p5, %p4579_p2 }
  0x53   :  { %4589 = shalt.err (!%p4586_p6)
}
  0x54   :  { %94 = dma.hbm_to_vmem [thread:$0]  %s6376_s6, 512, %s89_s5, [#allocation9], %s4664_s22, %s4664_s22, %s4665_s2  }
  0x55   :  { %s4598_s27 = scalar_lea.vmem %s123_s24, 512  ;;  %p4603_p8 = scmp.lt.s32.totalorder %s123_s24, %s123_s24 }
  0x56   :  { %p4599_p7 = scmp.ne.s32.totalorder %s123_s24, %s4598_s27  ;;  %p4604_p9 = scmp.lt.s32.totalorder %s4598_s27, %s4598_s27 }
  0x58   :  { %p4605_p10 = por %p4604_p9, %p4603_p8 }
  0x5a   :  { %p4606_p11 = pnand %p4605_p10, %p4599_p7 }
  0x5c   :  { %4609 = shalt.err (!%p4606_p11)
}
  0x5d   :  { %128 = dma.hbm_to_vmem [thread:$0]  %s6383_s13, 512, %s123_s24, [#allocation12], %s4664_s22, %s4664_s22, %s4665_s2  }
  0x5e   :  { %s4672_s29 = smov [#allocation16]  }
  0x5f   :  { %s148_s0 = sshll.u32 %s4672_s29, 4  ;;  %s149_s0 = int_to_ptr.vmem [resolvable:$true] %s148_s0 }
  0x60   :  { %s4618_s14 = scalar_lea.vmem %s149_s0, 512  ;;  %p4623_p13 = scmp.lt.s32.totalorder %s149_s0, %s149_s0 }
  0x61   :  { %p4619_p12 = scmp.ne.s32.totalorder %s149_s0, %s4618_s14  ;;  %p4624_p0 = scmp.lt.s32.totalorder %s4618_s14, %s4618_s14 }
  0x63   :  { %p4625_p1 = por %p4624_p0, %p4623_p13 }
  0x65   :  { %p4626_p2 = pnand %p4625_p1, %p4619_p12 }
  0x67   :  { %4629 = shalt.err (!%p4626_p2)
}
  0x68   :  { %154 = dma.hbm_to_vmem [thread:$0]  %s6386_s16, 512, %s149_s0, [#allocation15], %s4664_s22, %s4664_s22, %s4665_s2  }
  0x69   :  { %4650 = dma.done.wait [#allocation3], 256  }
  0x6a   :  { %4651 = vsyncadd [#allocation3], 4294967040 }
  0x6b   :  { %4652 = dma.done.wait [#allocation6], 512  }
  0x6c   :  { %4653 = vsyncadd [#allocation6], 4294966784 }
  0x6d   :  { %4654 = dma.done.wait [#allocation9], 1024  }
  0x6e   :  { %4655 = vsyncadd [#allocation9], 4294966272 }
  0x6f   :  { %4656 = dma.done.wait [#allocation12], 1024  }
  0x70   :  { %4657 = vsyncadd [#allocation12], 4294966272 }
  0x71   :  { %4658 = dma.done.wait [#allocation15], 1024  }
  0x72   :  { %4659 = vsyncadd [#allocation15], 4294966272  ;;  %v383_v0 = vlaneseq  ;;  %v4673_v1 = vmov 1966171168   ;;  %v288_v5 = vld [vmem:[#allocation10 + $0x18] sm:$0xff]  ;;  %v287_v6 = vld [vmem:[#allocation10 + $0x10] sm:$0xff] }
  0x73   :  { %v381_v2 = vunpack.c.l.s4 %v4673_v1  ;;  %v202_v7 = vld [vmem:[#allocation8 + $0x18] sm:$0xff]  ;;  %3879 = vmatprep.subr.mxu1 %v288_v5  ;;  %v201_v9 = vld [vmem:[#allocation8 + $0x10] sm:$0xff]  ;;  %v286_v10 = vld [vmem:[#allocation10 + $0x8] sm:$0xff]  ;;  %vm203_vm0 = vcmask 261120   ;;  %s6438_s30 = sld [smem:[#allocation60_spill]]  ;;  %vm621_vm1 = vcmask 23552  }
  0x74   :  { %v4829_v4 = vshrl.u32 %v383_v0, 7  ;;  %3868 = vmatprep.subr.mxu0 %v202_v7  ;;  %3880 = vmatpush3.msra.mxu1 %v288_v5  ;;  %v200_v11 = vld [vmem:[#allocation8 + $0x8] sm:$0xff]  ;;  %v193_v12 = vld [vmem:[#allocation2] sm:$0xff]  ;;  %v285_v14 = vld [vmem:[#allocation10] sm:$0xff]  ;;  %vm2872_vm2 = vcmask 1041409   ;;  %vm2874_vm3 = vcmask 1042434  }
  0x75   :  { %v382_v3 = vunpack.c.0.s8 %v381_v2  ;;  %3869 = vmatpush3.msra.mxu0 %v202_v7  ;;  %3881 = vmatprep.subr.mxu1 %v287_v6  ;;  %v199_v18 = vld [vmem:[#allocation8] sm:$0xff]  ;;  %v194_v19 = vld [vmem:[#allocation2 + $0x8] sm:$0xff]  ;;  %vm2876_vm4 = vcmask 1043459   ;;  %vm2878_vm5 = vcmask 1044484   ;;  %vm2880_vm6 = vcmask 1045509   ;;  %s4674_s26 = smov [#allocation17]  }
  0x76   :  { %3870 = vmatprep.subr.mxu0 %v201_v9  ;;  %3882 = vmatpush3.msra.mxu1 %v287_v6  ;;  %v4842_v16 = vsub.s32 0, %v4829_v4  ;;  %vm2882_vm7 = vcmask 1046534   ;;  %vm2884_vm8 = vcmask 1047559   ;;  %s3569_s27 = sshll.u32 %s4674_s26, 4  ;;  %s3570_s27 = int_to_ptr.vmem [resolvable:$true] %s3569_s27 }
  0x77   :  { %v4832_v8 = vsub.s32 %v382_v3, %v4829_v4  ;;  %3871 = vmatpush3.msra.mxu0 %v201_v9  ;;  %3883 = vmatprep.subr.mxu1 %v286_v10  ;;  %p4635_p4 = scmp.lt.s32.totalorder %s3570_s27, %s3570_s27 }
  0x78   :  { %3872 = vmatprep.subr.mxu0 %v200_v11  ;;  %3884 = vmatpush3.msra.mxu1 %v286_v10 }
  0x79   :  { %v4837_v13 = vld [vmem:[%s6438_s30] sm:$0xff]  ;;  %3887 = vmatprep.mubr.msk.f32.mxu1 %vm203_vm0, %v193_v12  ;;  %3885 = vmatprep.subr.mxu1 %v285_v14  ;;  %v4851_v22 = vld [vmem:[%s6438_s30 + $0x8] sm:$0xff] }
  0x7a   :  { %v386_v15 = vrot.slane %v4837_v13, %v4832_v8  ;;  %v379_v17 = vcombine.high %v4837_v13, %v4837_v13  ;;  %3873 = vmatpush3.msra.mxu0 %v200_v11  ;;  %3886 = vmatpush3.msra.mxu1 %v285_v14  ;;  %v435_v62 = vrot.slane %v4851_v22, %v4832_v8 }
  0x7b   :  { %3874 = vmatprep.subr.mxu0 %v199_v18  ;;  %3888 = vmatmul.mubr.msk.f32.vlgmr.msra.gmra.mxu1 %vm203_vm0, %v194_v19 }
  0x7c   :  { %v402_v20 = vrot.slane %v386_v15, %v4832_v8  ;;  %v394_v21 = vcombine.high %v386_v15, %v386_v15  ;;  %v393_v23 = vrot.slane %v379_v17, %v4832_v8  ;;  %3875 = vmatpush3.msra.mxu0 %v199_v18  ;;  %3876 = vmatprep.mubr.msk.f32.mxu0 %vm203_vm0, %v193_v12 }
  0x7d   :  { %3877 = vmatmul.mubr.msk.f32.vlgmr.msra.gmra.mxu0 %vm203_vm0, %v194_v19  ;;  %v451_v7 = vrot.slane %v435_v62, %v4832_v8  ;;  %v443_v9 = vcombine.high %v435_v62, %v435_v62 }
  0x7e   :  { %v480_v24 = vrot.slane %v402_v20, %v4842_v16  ;;  %v416_v25 = vrot.slane %v394_v21, %v4832_v8  ;;  %v424_v26 = vcombine.high %v402_v20, %v402_v20  ;;  %v409_v32 = vrot.slane %v393_v23, %v4832_v8 }
  0x7f   :  { %v395_v33 = vcombine.high %v393_v23, %v393_v23  ;;  %v512_v19 = vrot.slane %v451_v7, %v4842_v16 }
  0x80   :  { %v4859_v27 = vsub.f32 %v4837_v13, %v480_v24  ;;  %v484_v28 = vrot.slane %v416_v25, %v4842_v16  ;;  %v4863_v29 = vsub.f32 %v4851_v22, %v480_v24  ;;  %v488_v30 = vrot.slane %v424_v26, %v4842_v16 }
  0x81   :  { %v426_v31 = vcombine.high %v416_v25, %v416_v25  ;;  %v496_v44 = vrot.slane %v409_v32, %v4842_v16  ;;  %v423_v45 = vrot.slane %v395_v33, %v4832_v8  ;;  %v425_v57 = vcombine.high %v409_v32, %v409_v32 }
  0x82   :  { %6439 = vst [vmem:[#allocation24_spill] sm:$0xff] %v4859_v27  ;;  %6440 = vst [vmem:[#allocation25_spill] sm:$0xff] %v4863_v29  ;;  %v589_v34 = vmul.f32 %v4859_v27, %v4859_v27  ;;  %v4871_v35 = vsub.f32 %v4837_v13, %v484_v28  ;;  %v590_v36 = vmul.f32 %v4863_v29, %v4863_v29 }
  0x83   :  { %v4876_v37 = vsub.f32 %v4851_v22, %v484_v28  ;;  %v4879_v38 = vsub.f32 %v4837_v13, %v488_v30  ;;  %v492_v39 = vrot.slane %v426_v31, %v4842_v16  ;;  %v4888_v43 = vsub.f32 %v4851_v22, %v488_v30 }
  0x84   :  { %6441 = vst [vmem:[#allocation26_spill] sm:$0xff] %v4871_v35  ;;  %v622_v40 = vsel %vm621_vm1, %v589_v34, 0.0  ;;  %v591_v41 = vmul.f32 %v4871_v35, %v4871_v35  ;;  %v625_v47 = vsel %vm621_vm1, %v590_v36, 0.0  ;;  %v4906_v53 = vsub.f32 %v4837_v13, %v496_v44 }
  0x85   :  { %6442 = vst [vmem:[#allocation27_spill] sm:$0xff] %v4876_v37  ;;  %6443 = vst [vmem:[#allocation28_spill] sm:$0xff] %v4879_v38  ;;  %v592_v42 = vmul.f32 %v4876_v37, %v4876_v37  ;;  %623 = vadd.xlane.f32.xlu0 %v622_v40  ;;  %v593_v48 = vmul.f32 %v4879_v38, %v4879_v38  ;;  %v4897_v49 = vsub.f32 %v4837_v13, %v492_v39 }
  0x86   :  { %6444 = vst [vmem:[#allocation29_spill] sm:$0xff] %v4888_v43  ;;  %v628_v46 = vsel %vm621_vm1, %v591_v41, 0.0  ;;  %v594_v51 = vmul.f32 %v4888_v43, %v4888_v43  ;;  %v4903_v52 = vsub.f32 %v4851_v22, %v492_v39  ;;  %6447 = vst [vmem:[#allocation32_spill] sm:$0xff] %v4906_v53  ;;  %v500_v56 = vrot.slane %v423_v45, %v4842_v16 }
  0x87   :  { %6445 = vst [vmem:[#allocation30_spill] sm:$0xff] %v4897_v49  ;;  %629 = vadd.xlane.f32.xlu1 %v628_v46  ;;  %v631_v50 = vsel %vm621_vm1, %v592_v42, 0.0  ;;  %v634_v54 = vsel %vm621_vm1, %v593_v48, 0.0  ;;  %v595_v55 = vmul.f32 %v4897_v49, %v4897_v49  ;;  %v4916_v60 = vsub.f32 %v4851_v22, %v496_v44 }
  0x88   :  { %6446 = vst [vmem:[#allocation31_spill] sm:$0xff] %v4903_v52  ;;  %v637_v58 = vsel %vm621_vm1, %v594_v51, 0.0  ;;  %v596_v59 = vmul.f32 %v4903_v52, %v4903_v52  ;;  %v597_v61 = vmul.f32 %v4906_v53, %v4906_v53  ;;  %v4924_v0 = vsub.f32 %v4837_v13, %v500_v56 }
  0x89   :  { %626 = vadd.xlane.f32.xlu0 %v625_v47  ;;  %6448 = vst [vmem:[#allocation33_spill] sm:$0xff] %v4916_v60  ;;  %v640_v63 = vsel %vm621_vm1, %v595_v55, 0.0  ;;  %v504_v1 = vrot.slane %v425_v57, %v4842_v16  ;;  %v427_v2 = vcombine.high %v423_v45, %v423_v45  ;;  %v598_v5 = vmul.f32 %v4916_v60, %v4916_v60 }
  0x8a   :  { %6449 = vst [vmem:[#allocation34_spill] sm:$0xff] %v4924_v0  ;;  %v643_v3 = vsel %vm621_vm1, %v596_v59, 0.0  ;;  %v4931_v6 = vsub.f32 %v4851_v22, %v500_v56  ;;  %v646_v10 = vsel %vm621_vm1, %v597_v61, 0.0  ;;  %v599_v11 = vmul.f32 %v4924_v0, %v4924_v0 }
  0x8b   :  { %632 = vadd.xlane.f32.xlu1 %v631_v50  ;;  %v4938_v12 = vsub.f32 %v4837_v13, %v504_v1  ;;  %v508_v14 = vrot.slane %v427_v2, %v4842_v16  ;;  %v649_v15 = vsel %vm621_vm1, %v598_v5, 0.0  ;;  %v4945_v18 = vsub.f32 %v4851_v22, %v504_v1 }
  0x8c   :  { %6450 = vst [vmem:[#allocation35_spill] sm:$0xff] %v4931_v6  ;;  %v600_v17 = vmul.f32 %v4931_v6, %v4931_v6  ;;  %v652_v20 = vsel %vm621_vm1, %v599_v11, 0.0  ;;  %v465_v24 = vrot.slane %v443_v9, %v4832_v8  ;;  %v4962_v30 = vsub.f32 %v4837_v13, %v512_v19 }
  0x8d   :  { %635 = vadd.xlane.f32.xlu0 %v634_v54  ;;  %6451 = vst [vmem:[#allocation36_spill] sm:$0xff] %v4938_v12  ;;  %6452 = vst [vmem:[#allocation37_spill] sm:$0xff] %v4945_v18  ;;  %v601_v21 = vmul.f32 %v4938_v12, %v4938_v12  ;;  %v4952_v23 = vsub.f32 %v4837_v13, %v508_v14  ;;  %v602_v26 = vmul.f32 %v4945_v18, %v4945_v18 }
  0x8e   :  { %v655_v25 = vsel %vm621_vm1, %v600_v17, 0.0  ;;  %v4959_v28 = vsub.f32 %v4851_v22, %v508_v14  ;;  %6455 = vst [vmem:[#allocation40_spill] sm:$0xff] %v4962_v30  ;;  %v428_v31 = vcombine.high %v4851_v22, %v4851_v22  ;;  %v516_v34 = vrot.slane %v465_v24, %v4842_v16 }
  0x8f   :  { %638 = vadd.xlane.f32.xlu1 %v637_v58  ;;  %6453 = vst [vmem:[#allocation38_spill] sm:$0xff] %v4952_v23  ;;  %v658_v32 = vsel %vm621_vm1, %v601_v21, 0.0  ;;  %v603_v33 = vmul.f32 %v4952_v23, %v4952_v23  ;;  %v473_v36 = vcombine.high %v451_v7, %v451_v7  ;;  %v661_v39 = vsel %vm621_vm1, %v602_v26, 0.0 }
  0x90   :  { %6454 = vst [vmem:[#allocation39_spill] sm:$0xff] %v4959_v28  ;;  %v604_v40 = vmul.f32 %v4959_v28, %v4959_v28  ;;  %v4974_v41 = vsub.f32 %v4851_v22, %v512_v19  ;;  %v605_v42 = vmul.f32 %v4962_v30, %v4962_v30  ;;  %v442_v44 = vrot.slane %v428_v31, %v4832_v8 }
  0x91   :  { %641 = vadd.xlane.f32.xlu0 %v640_v63  ;;  %v664_v45 = vsel %vm621_vm1, %v603_v33, 0.0  ;;  %v4981_v46 = vsub.f32 %v4837_v13, %v516_v34  ;;  %v520_v47 = vrot.slane %v473_v36, %v4842_v16  ;;  %v475_v48 = vcombine.high %v465_v24, %v465_v24 }
  0x92   :  { %6456 = vst [vmem:[#allocation41_spill] sm:$0xff] %v4974_v41  ;;  %v667_v50 = vsel %vm621_vm1, %v604_v40, 0.0  ;;  %v606_v51 = vmul.f32 %v4974_v41, %v4974_v41  ;;  %v4988_v54 = vsub.f32 %v4851_v22, %v516_v34  ;;  %v670_v55 = vsel %vm621_vm1, %v605_v42, 0.0 }
  0x93   :  { %644 = vadd.xlane.f32.xlu1 %v643_v3  ;;  %6457 = vst [vmem:[#allocation42_spill] sm:$0xff] %v4981_v46  ;;  %v458_v56 = vrot.slane %v442_v44, %v4832_v8  ;;  %v607_v57 = vmul.f32 %v4981_v46, %v4981_v46  ;;  %v4995_v58 = vsub.f32 %v4837_v13, %v520_v47  ;;  %v5197_v12 = vsub.s32 5, %v4829_v4 }
  0x94   :  { %6458 = vst [vmem:[#allocation43_spill] sm:$0xff] %v4988_v54  ;;  %v524_v59 = vrot.slane %v475_v48, %v4842_v16  ;;  %v444_v61 = vcombine.high %v442_v44, %v442_v44  ;;  %v673_v62 = vsel %vm621_vm1, %v606_v51, 0.0  ;;  %v608_v63 = vmul.f32 %v4988_v54, %v4988_v54 }
  0x95   :  { %647 = vadd.xlane.f32.xlu0 %v646_v10  ;;  %6459 = vst [vmem:[#allocation44_spill] sm:$0xff] %v4995_v58  ;;  %v5002_v1 = vsub.f32 %v4851_v22, %v520_v47  ;;  %v528_v2 = vrot.slane %v458_v56, %v4842_v16  ;;  %v676_v3 = vsel %vm621_vm1, %v607_v57, 0.0  ;;  %v609_v5 = vmul.f32 %v4995_v58, %v4995_v58 }
  0x96   :  { %v5009_v7 = vsub.f32 %v4837_v13, %v524_v59  ;;  %v472_v9 = vrot.slane %v444_v61, %v4832_v8  ;;  %v679_v10 = vsel %vm621_vm1, %v608_v63, 0.0  ;;  %v5016_v14 = vsub.f32 %v4851_v22, %v524_v59  ;;  %6472 = vst [vmem:[#allocation57_spill] sm:$0xff] %v5197_v12 }
  0x97   :  { %650 = vadd.xlane.f32.xlu1 %v649_v15  ;;  %6460 = vst [vmem:[#allocation45_spill] sm:$0xff] %v5002_v1  ;;  %v610_v11 = vmul.f32 %v5002_v1, %v5002_v1  ;;  %v5019_v15 = vsub.f32 %v4837_v13, %v528_v2  ;;  %v682_v17 = vsel %vm621_vm1, %v609_v5, 0.0  ;;  %v474_v21 = vcombine.high %v458_v56, %v458_v56 }
  0x98   :  { %6461 = vst [vmem:[#allocation46_spill] sm:$0xff] %v5009_v7  ;;  %6462 = vst [vmem:[#allocation47_spill] sm:$0xff] %v5016_v14  ;;  %v611_v19 = vmul.f32 %v5009_v7, %v5009_v7  ;;  %v5029_v26 = vsub.f32 %v4851_v22, %v528_v2  ;;  %v476_v36 = vcombine.high %v472_v9, %v472_v9 }
  0x99   :  { %653 = vadd.xlane.f32.xlu0 %v652_v20  ;;  %6463 = vst [vmem:[#allocation48_spill] sm:$0xff] %v5019_v15  ;;  %v532_v20 = vrot.slane %v472_v9, %v4842_v16  ;;  %v685_v24 = vsel %vm621_vm1, %v610_v11, 0.0  ;;  %v613_v31 = vmul.f32 %v5019_v15, %v5019_v15  ;;  %v536_v34 = vrot.slane %v474_v21, %v4842_v16  ;;  %v1227_v11 = vld [vmem:[%s6378_s8 + $0x10] sm:$0xff] }
  0x9a   :  { %6464 = vst [vmem:[#allocation49_spill] sm:$0xff] %v5029_v26  ;;  %v614_v40 = vmul.f32 %v5029_v26, %v5029_v26  ;;  %v540_v48 = vrot.slane %v476_v36, %v4842_v16 }
  0x9b   :  { %656 = vadd.xlane.f32.xlu1 %v655_v25  ;;  %v612_v25 = vmul.f32 %v5016_v14, %v5016_v14  ;;  %v5035_v33 = vsub.f32 %v4837_v13, %v532_v20  ;;  %v5042_v42 = vsub.f32 %v4851_v22, %v532_v20  ;;  %v694_v44 = vsel %vm621_vm1, %v613_v31, 0.0 }
  0x9c   :  { %v5048_v47 = vsub.f32 %v4837_v13, %v536_v34  ;;  %v5061_v59 = vsub.f32 %v4837_v13, %v540_v48  ;;  %v5067_v63 = vsub.f32 %v4851_v22, %v540_v48 }
  0x9d   :  { %659 = vadd.xlane.f32.xlu0 %v658_v32  ;;  %v688_v32 = vsel %vm621_vm1, %v611_v19, 0.0  ;;  %6465 = vst [vmem:[#allocation50_spill] sm:$0xff] %v5035_v33  ;;  %6466 = vst [vmem:[#allocation51_spill] sm:$0xff] %v5042_v42  ;;  %v616_v51 = vmul.f32 %v5042_v42, %v5042_v42  ;;  %v1225_v19 = vld [vmem:[%s6378_s8] sm:$0xff] }
  0x9e   :  { %6467 = vst [vmem:[#allocation52_spill] sm:$0xff] %v5048_v47  ;;  %v617_v57 = vmul.f32 %v5048_v47, %v5048_v47  ;;  %6469 = vst [vmem:[#allocation54_spill] sm:$0xff] %v5061_v59  ;;  %v620_v13 = vmul.f32 %v5067_v63, %v5067_v63 }
  0x9f   :  { %662 = vadd.xlane.f32.xlu1 %v661_v39  ;;  %v691_v39 = vsel %vm621_vm1, %v612_v25, 0.0  ;;  %v703_v61 = vsel %vm621_vm1, %v616_v51, 0.0  ;;  %6470 = vst [vmem:[#allocation55_spill] sm:$0xff] %v5067_v63 }
  0xa0   :  { %v706_v2 = vsel %vm621_vm1, %v617_v57, 0.0  ;;  %v5093_v57 = vld [vmem:[#allocation5] sm:$0xff] }
  0xa1   :  { %665 = vadd.xlane.f32.xlu0 %v664_v45  ;;  %v615_v45 = vmul.f32 %v5035_v33, %v5035_v33 }
  0xa3   :  { %668 = vadd.xlane.f32.xlu1 %v667_v50  ;;  %v697_v50 = vsel %vm621_vm1, %v614_v40, 0.0  ;;  %v700_v56 = vsel %vm621_vm1, %v615_v45, 0.0 }
  0xa5   :  { %671 = vadd.xlane.f32.xlu0 %v670_v55  ;;  %v5055_v55 = vsub.f32 %v4851_v22, %v536_v34  ;;  %v1228_v22 = vld [vmem:[%s6378_s8 + $0x18] sm:$0xff] }
  0xa6   :  { %3890 = vmatprep.subr.mxu0 %v1228_v22 }
  0xa7   :  { %674 = vadd.xlane.f32.xlu1 %v673_v62  ;;  %6468 = vst [vmem:[#allocation53_spill] sm:$0xff] %v5055_v55  ;;  %v618_v62 = vmul.f32 %v5055_v55, %v5055_v55  ;;  %3891 = vmatpush3.msra.mxu0 %v1228_v22  ;;  %v5111_v22 = vld [vmem:[#allocation5 + $0x8] sm:$0xff] }
  0xa8   :  { %3892 = vmatprep.subr.mxu0 %v1227_v11  ;;  %v2988_v47 = vrot.slane %v5111_v22, %v4842_v16 }
  0xa9   :  { %677 = vadd.xlane.f32.xlu0 %v676_v3  ;;  %v619_v3 = vmul.f32 %v5061_v59, %v5061_v59  ;;  %v709_v5 = vsel %vm621_vm1, %v618_v62, 0.0  ;;  %3893 = vmatpush3.msra.mxu0 %v1227_v11  ;;  %v5120_v59 = vld [vmem:[%s6374_s4] ss:$0 sm:$0xff] }
  0xab   :  { %680 = vadd.xlane.f32.xlu1 %v679_v10  ;;  %v712_v9 = vsel %vm621_vm1, %v619_v3, 0.0  ;;  %v715_v10 = vsel %vm621_vm1, %v620_v13, 0.0  ;;  %v5103_v3 = vsub.s32 2, %v4829_v4 }
  0xad   :  { %683 = vadd.xlane.f32.xlu0 %v682_v17  ;;  %v1226_v17 = vld [vmem:[%s6378_s8 + $0x8] sm:$0xff] }
  0xae   :  { %3894 = vmatprep.subr.mxu0 %v1226_v17 }
  0xaf   :  { %686 = vadd.xlane.f32.xlu1 %v685_v24  ;;  %3895 = vmatpush3.msra.mxu0 %v1226_v17 }
  0xb0   :  { %3896 = vmatprep.subr.mxu0 %v1225_v19 }
  0xb1   :  { %689 = vadd.xlane.f32.xlu0 %v688_v32  ;;  %3897 = vmatpush3.msra.mxu0 %v1225_v19 }
  0xb3   :  { %692 = vadd.xlane.f32.xlu1 %v691_v39 }
  0xb5   :  { %695 = vadd.xlane.f32.xlu0 %v694_v44 }
  0xb7   :  { %698 = vadd.xlane.f32.xlu1 %v697_v50 }
  0xb9   :  { %701 = vadd.xlane.f32.xlu0 %v700_v56 }
  0xbb   :  { %704 = vadd.xlane.f32.xlu1 %v703_v61  ;;  %v5096_v61 = vsub.s32 1, %v4829_v4 }
  0xbd   :  { %707 = vadd.xlane.f32.xlu0 %v706_v2  ;;  %v2900_v2 = vrot.slane %v5093_v57, %v4842_v16  ;;  %v2911_v13 = vrot.slane %v5093_v57, %v5096_v61  ;;  %v2999_v30 = vrot.slane %v5111_v22, %v5096_v61 }
  0xbf   :  { %710 = vadd.xlane.f32.xlu1 %v709_v5 }
  0xc1   :  { %713 = vadd.xlane.f32.xlu0 %v712_v9 }
  0xc3   :  { %716 = vadd.xlane.f32.xlu1 %v715_v10  ;;  %v2922_v10 = vrot.slane %v5093_v57, %v5103_v3 }
  0xd4   :  { %2906 = vbcast.lane.b32.xlu1 %v2900_v2, 264 }
  0xd7   :  { %2902 = vbcast.lane.b32.xlu0 %v2900_v2, 256  ;;  %v5125_v2 = vld [vmem:[%s6377_s7] ss:$0 sm:$0xff] }
  0xd8   :  { %2913 = vbcast.lane.b32.xlu1 %v2911_v13, 256 }
  0xdb   :  { %2924 = vbcast.lane.b32.xlu0 %v2922_v10, 256 }
  0xdc   :  { %2917 = vbcast.lane.b32.xlu1 %v2911_v13, 264 }
  0xdf   :  { %2990 = vbcast.lane.b32.xlu0 %v2988_v47, 256 }
  0xe0   :  { %2928 = vbcast.lane.b32.xlu1 %v2922_v10, 264  ;;  %v5167_v10 = vsub.s32 4, %v4829_v4 }
  0xe2   :  { %6471 = vst [vmem:[#allocation56_spill] sm:$0xff] %v5167_v10 }
  0xe3   :  { %3001 = vbcast.lane.b32.xlu0 %v2999_v30, 256 }
  0xe4   :  { %2994 = vbcast.lane.b32.xlu1 %v2988_v47, 264 }
  0xe8   :  { %3005 = vbcast.lane.b32.xlu1 %v2999_v30, 264 }
 0x10e   :  { %v624_v24 = vpop.xlane.xlu0 %623 }
 0x10f   :  { %v725_v42 = vmul.f32 %v5120_v59, %v624_v24 }
 0x110   :  { %v630_v20 = vpop.xlane.xlu1 %629 }
 0x111   :  { %v727_v26 = vmul.f32 %v5120_v59, %v630_v20 }
 0x112   :  { %v627_v31 = vpop.xlane.xlu0 %626 }
 0x113   :  { %v726_v33 = vmul.f32 %v5120_v59, %v627_v31 }
 0x114   :  { %v633_v21 = vpop.xlane.xlu1 %632 }
 0x115   :  { %v728_v1 = vmul.f32 %v5120_v59, %v633_v21 }
 0x116   :  { %v636_v36 = vpop.xlane.xlu0 %635 }
 0x117   :  { %v729_v13 = vmul.f32 %v5120_v59, %v636_v36 }
 0x118   :  { %v639_v25 = vpop.xlane.xlu1 %638 }
 0x119   :  { %v730_v24 = vmul.f32 %v5120_v59, %v639_v25 }
 0x11a   :  { %v642_v40 = vpop.xlane.xlu0 %641 }
 0x11b   :  { %v5145_v20 = vmul.f32 %v5120_v59, %v642_v40 }
 0x11c   :  { %v645_v32 = vpop.xlane.xlu1 %644 }
 0x11d   :  { %v5148_v31 = vmul.f32 %v5120_v59, %v645_v32 }
 0x11e   :  { %v648_v48 = vpop.xlane.xlu0 %647 }
 0x120   :  { %v651_v34 = vpop.xlane.xlu1 %650 }
 0x121   :  { %v5156_v54 = vmul.f32 %v5120_v59, %v651_v34 }
 0x122   :  { %v654_v51 = vpop.xlane.xlu0 %653 }
 0x123   :  { %v5160_v25 = vmul.f32 %v5120_v59, %v654_v51 }
 0x124   :  { %v657_v39 = vpop.xlane.xlu1 %656 }
 0x125   :  { %v5163_v32 = vmul.f32 %v5120_v59, %v657_v39 }
 0x126   :  { %v660_v5 = vpop.xlane.xlu0 %659 }
 0x128   :  { %v663_v44 = vpop.xlane.xlu1 %662 }
 0x129   :  { %v5173_v34 = vmul.f32 %v5120_v59, %v663_v44 }
 0x12a   :  { %v666_v17 = vpop.xlane.xlu0 %665 }
 0x12c   :  { %v669_v45 = vpop.xlane.xlu1 %668 }
 0x12d   :  { %v5181_v39 = vmul.f32 %v5120_v59, %v669_v45  ;;  %v3010_v45 = vrot.slane %v5111_v22, %v5103_v3 }
 0x12e   :  { %v672_v58 = vpop.xlane.xlu0 %671 }
 0x130   :  { %v5089_v50 = vpop.xlane.xlu1 %674 }
 0x131   :  { %v5191_v44 = vmul.f32 %v5120_v59, %v5089_v50  ;;  %v5204_v50 = vrot.slane %v5093_v57, %v5167_v10 }
 0x134   :  { %v5091_v56 = vpop.xlane.xlu1 %680 }
 0x138   :  { %v5098_v62 = vpop.xlane.xlu1 %686 }
 0x13b   :  { %v5113_v11 = vpop.f32.mrf.mxu1 }
 0x13c   :  { %v5107_v9 = vpop.xlane.xlu1 %692 }
 0x13d   :  { %v368_v63 = vpop.f32.mrf.mxu1  ;;  %v5150_v21 = vpop.f32.mrf.mxu0 }
 0x13e   :  { %v369_v55 = vadd.f32 %v5125_v2, %v368_v63  ;;  %v5140_v63 = vsub.s32 3, %v4829_v4  ;;  %v758_v6 = vadd.f32 %v5150_v21, %v726_v33  ;;  %v760_v52 = vadd.f32 %v5150_v21, %v728_v1 }
 0x140   :  { %v5115_v19 = vpop.xlane.xlu1 %698  ;;  %v791_v14 = vcombine.high %v369_v55, %v369_v55  ;;  %v798_v7 = vrot.slane %v369_v55, %v4832_v8  ;;  %v5153_v55 = vmul.f32 %v5120_v59, %v648_v48  ;;  %v5170_v48 = vmul.f32 %v5120_v59, %v660_v5  ;;  %v5187_v5 = vpop.f32.mrf.mxu0 }
 0x141   :  { %v2933_v51 = vrot.slane %v5093_v57, %v5140_v63  ;;  %v759_v60 = vadd.f32 %v727_v26, %v5187_v5 }
 0x142   :  { %v806_v41 = vcombine.high %v798_v7, %v798_v7  ;;  %v814_v36 = vrot.slane %v798_v7, %v4832_v8  ;;  %v805_v40 = vrot.slane %v791_v14, %v4832_v8  ;;  %v5176_v7 = vmul.f32 %v5120_v59, %v666_v17 }
 0x143   :  { %v5184_v14 = vmul.f32 %v5120_v59, %v672_v58  ;;  %2935 = vbcast.lane.b32.xlu0 %v2933_v51, 256  ;;  %v5199_v58 = vpop.xlane.xlu0 %677  ;;  %2939 = vbcast.lane.b32.xlu1 %v2933_v51, 264 }
 0x144   :  { %v5133_v15 = vpop.xlane.xlu1 %704  ;;  %v828_v23 = vrot.slane %v806_v41, %v4832_v8  ;;  %v836_v28 = vcombine.high %v814_v36, %v814_v36  ;;  %v892_v17 = vrot.slane %v814_v36, %v4842_v16  ;;  %v807_v41 = vcombine.high %v805_v40, %v805_v40 }
 0x145   :  { %v757_v36 = vadd.f32 %v725_v42, %v5187_v5  ;;  %v821_v29 = vrot.slane %v805_v40, %v4832_v8 }
 0x146   :  { %v838_v18 = vcombine.high %v828_v23, %v828_v23  ;;  %v896_v0 = vrot.slane %v828_v23, %v4842_v16  ;;  %v900_v53 = vrot.slane %v836_v28, %v4842_v16  ;;  %v762_v23 = vadd.f32 %v5150_v21, %v730_v24 }
 0x147   :  { %v5215_v37 = vadd.f32 %v892_v17, %v757_v36  ;;  %v5217_v42 = vadd.f32 %v892_v17, %v758_v6  ;;  %3012 = vbcast.lane.b32.xlu0 %v3010_v45, 256  ;;  %v5222_v1 = vrot.slane %v807_v41, %v4832_v8  ;;  %v684_v40 = vpop.xlane.xlu0 %683  ;;  %v761_v17 = vadd.f32 %v729_v13, %v5187_v5 }
 0x148   :  { %v711_v46 = vpop.xlane.xlu1 %710  ;;  %v5219_v33 = vadd.f32 %v896_v0, %v759_v60  ;;  %v904_v26 = vrot.slane %v838_v18, %v4842_v16  ;;  %v3021_v18 = vrot.slane %v5111_v22, %v5140_v63  ;;  %v763_v41 = vadd.f32 %v5145_v20, %v5187_v5  ;;  %3016 = vbcast.lane.b32.xlu1 %v3010_v45, 264 }
 0x149   :  { %v754_v43 = vmul.f32 %v5120_v59, %v711_v46  ;;  %v5228_v46 = vadd.f32 %v896_v0, %v760_v52  ;;  %v3593_v24 = vmul.f32 -1.442695, %v5215_v37  ;;  %v3594_v6 = vmul.f32 -1.442695, %v5217_v42 }
 0x14a   :  { %v3595_v60 = vmul.f32 -1.442695, %v5219_v33  ;;  %v837_v52 = vcombine.high %v821_v29, %v821_v29  ;;  %v5246_v0 = vadd.f32 %v900_v53, %v762_v23  ;;  %v908_v13 = vrot.slane %v821_v29, %v4842_v16 }
 0x14b   :  { %v5226_v28 = vadd.f32 %v5150_v21, %v754_v43  ;;  %v5241_v43 = vrot.slane %v5093_v57, %v5197_v12  ;;  %4050 = vpow2.f32 %v3593_v24  ;;  %2946 = vbcast.lane.b32.xlu0 %v5204_v50, 256  ;;  %v5252_v51 = vadd.f32 %v900_v53, %v761_v17 }
 0x14c   :  { %v717_v47 = vpop.xlane.xlu1 %716  ;;  %4052 = vpow2.f32 %v3594_v6  ;;  %v912_v36 = vrot.slane %v5222_v1, %v4842_v16  ;;  %v3596_v23 = vmul.f32 -1.442695, %v5228_v46  ;;  %v5259_v24 = vadd.f32 %v904_v26, %v763_v41  ;;  %2950 = vbcast.lane.b32.xlu1 %v5204_v50, 264 }
 0x14d   :  { %v756_v49 = vmul.f32 %v5120_v59, %v717_v47  ;;  %v764_v47 = vadd.f32 %v5150_v21, %v5148_v31  ;;  %4054 = vpow2.f32 %v3595_v60  ;;  %v374_v20 = vadd.f32 %v5113_v11, %v5125_v2  ;;  %v690_v11 = vpop.xlane.xlu0 %689 }
 0x14e   :  { %v3597_v27 = vmul.f32 -1.442695, %v5252_v51  ;;  %v765_v53 = vadd.f32 %v5153_v55, %v5187_v5  ;;  %v5269_v31 = vrot.slane %v837_v52, %v4842_v16  ;;  %v3598_v6 = vmul.f32 -1.442695, %v5246_v0 }
 0x14f   :  { %v5231_v30 = vadd.f32 %v5150_v21, %v756_v49  ;;  %v5244_v49 = vsub.s32 6, %v4829_v4  ;;  %v5264_v29 = vadd.f32 %v904_v26, %v764_v47  ;;  %v766_v60 = vadd.f32 %v5150_v21, %v5156_v54  ;;  %3023 = vbcast.lane.b32.xlu0 %v3021_v18, 256 }
 0x150   :  { %v767_v17 = vadd.f32 %v5160_v25, %v5187_v5  ;;  %v3599_v2 = vmul.f32 -1.442695, %v5259_v24  ;;  %v5278_v41 = vadd.f32 %v908_v13, %v765_v53  ;;  %v768_v55 = vadd.f32 %v5150_v21, %v5163_v32  ;;  %3027 = vbcast.lane.b32.xlu1 %v3021_v18, 264 }
 0x151   :  { %6473 = vst [vmem:[#allocation58_spill] sm:$0xff] %v5244_v49  ;;  %v3600_v26 = vmul.f32 -1.442695, %v5264_v29  ;;  %4056 = vpow2.f32 %v3596_v23  ;;  %v5282_v45 = vadd.f32 %v908_v13, %v766_v60  ;;  %v769_v54 = vadd.f32 %v5170_v48, %v5187_v5 }
 0x152   :  { %v5284_v52 = vadd.f32 %v912_v36, %v767_v17  ;;  %v840_v25 = vcombine.high %v374_v20, %v374_v20  ;;  %4058 = vpow2.f32 %v3597_v27  ;;  %v3601_v47 = vmul.f32 -1.442695, %v5278_v41 }
 0x153   :  { %v5289_v38 = vadd.f32 %v912_v36, %v768_v55  ;;  %v847_v53 = vrot.slane %v374_v20, %v4832_v8  ;;  %4060 = vpow2.f32 %v3598_v6  ;;  %v3602_v32 = vmul.f32 -1.442695, %v5282_v45  ;;  %2957 = vbcast.lane.b32.xlu0 %v5241_v43, 256  ;;  %v696_v6 = vpop.xlane.xlu0 %695 }
 0x154   :  { %v5295_v13 = vadd.f32 %v5269_v31, %v769_v54  ;;  %v5300_v48 = vmul.f32 %v5120_v59, %v5199_v58  ;;  %v5304_v27 = vmul.f32 %v5120_v59, %v5091_v56  ;;  %4062 = vpow2.f32 %v3599_v2  ;;  %2961 = vbcast.lane.b32.xlu1 %v5241_v43, 264 }
 0x155   :  { %v3603_v50 = vmul.f32 -1.442695, %v5284_v52  ;;  %v5308_v36 = vmul.f32 %v5120_v59, %v684_v40  ;;  %4064 = vpow2.f32 %v3600_v26  ;;  %v3604_v23 = vmul.f32 -1.442695, %v5289_v38 }
 0x156   :  { %v3032_v20 = vrot.slane %v5111_v22, %v5167_v10  ;;  %v5315_v58 = vmul.f32 %v5120_v59, %v5098_v62  ;;  %v854_v56 = vrot.slane %v840_v25, %v4832_v8  ;;  %4066 = vpow2.f32 %v3601_v47 }
 0x157   :  { %v3605_v60 = vmul.f32 -1.442695, %v5295_v13  ;;  %v5320_v40 = vmul.f32 %v5120_v59, %v690_v11  ;;  %v855_v17 = vcombine.high %v847_v53, %v847_v53  ;;  %4068 = vpow2.f32 %v3602_v32 }
 0x158   :  { %3034 = vbcast.lane.b32.xlu0 %v3032_v20, 256  ;;  %v2966_v2 = vrot.slane %v5093_v57, %v5244_v49  ;;  %v4051_v26 = vpop.eup %4050  ;;  %v863_v62 = vrot.slane %v847_v53, %v4832_v8  ;;  %4070 = vpow2.f32 %v3603_v50  ;;  %v5327_v55 = vrot.slane %v5111_v22, %v5197_v12  ;;  %3038 = vbcast.lane.b32.xlu1 %v3032_v20, 264 }
 0x159   :  { %v5330_v54 = vsub.s32 7, %v4829_v4  ;;  %v4053_v18 = vpop.eup %4052  ;;  %v5334_v11 = vmul.f32 %v5120_v59, %v5107_v9  ;;  %v1097_v25 = vadd.f32 1.0, %v4051_v26  ;;  %4072 = vpow2.f32 %v3604_v23 }
 0x15a   :  { %v5338_v47 = vrot.slane %v5111_v22, %v5244_v49  ;;  %v4055_v53 = vpop.eup %4054  ;;  %v856_v32 = vcombine.high %v854_v56, %v854_v56  ;;  %v5341_v50 = vrot.slane %v854_v56, %v4832_v8  ;;  %v1098_v35 = vadd.f32 1.0, %v4053_v18  ;;  %v702_v49 = vpop.xlane.xlu0 %701 }
 0x15b   :  { %6474 = vst [vmem:[#allocation59_spill] sm:$0xff] %v5330_v54  ;;  %4074 = vpow2.f32 %v3605_v60  ;;  %v877_v4 = vrot.slane %v855_v17, %v4832_v8  ;;  %v839_v9 = vcombine.high %v5222_v1, %v5222_v1  ;;  %v1099_v23 = vadd.f32 1.0, %v4055_v53 }
 0x15c   :  { %4076 = vrcp.f32 %v1097_v25  ;;  %2968 = vbcast.lane.b32.xlu0 %v2966_v2, 256  ;;  %v885_v26 = vcombine.high %v863_v62, %v863_v62  ;;  %v5349_v12 = vrot.slane %v5093_v57, %v5330_v54  ;;  %v5353_v56 = vrot.slane %v5111_v22, %v5330_v54  ;;  %2972 = vbcast.lane.b32.xlu1 %v2966_v2, 264 }
 0x15d   :  { %4078 = vrcp.f32 %v1098_v35  ;;  %v5356_v43 = vmul.f32 %v5120_v59, %v696_v6  ;;  %v5360_v1 = vmul.f32 %v5120_v59, %v5115_v19  ;;  %v5363_v60 = vmul.f32 %v5120_v59, %v702_v49 }
 0x15e   :  { %4080 = vrcp.f32 %v1099_v23  ;;  %v4057_v35 = vpop.eup %4056  ;;  %v5366_v17 = vrot.slane %v856_v32, %v4832_v8  ;;  %v924_v57 = vrot.slane %v863_v62, %v4842_v16  ;;  %v5371_v22 = vmul.f32 %v5120_v59, %v5133_v15 }
 0x15f   :  { %v770_v6 = vadd.f32 %v5150_v21, %v5173_v34  ;;  %v4059_v19 = vpop.eup %4058  ;;  %v887_v18 = vcombine.high %v877_v4, %v877_v4  ;;  %v1100_v25 = vadd.f32 1.0, %v4057_v35  ;;  %v920_v53 = vrot.slane %v839_v9, %v4842_v16 }
 0x160   :  { %3045 = vbcast.lane.b32.xlu0 %v5327_v55, 256  ;;  %v4061_v8 = vpop.eup %4060  ;;  %v928_v62 = vrot.slane %v877_v4, %v4842_v16  ;;  %v5381_v15 = vrot.slane %v885_v26, %v4842_v16  ;;  %v1101_v32 = vadd.f32 1.0, %v4059_v19  ;;  %v5388_v23 = vrot.slane %v5341_v50, %v4842_v16  ;;  %3049 = vbcast.lane.b32.xlu1 %v5327_v55, 264 }
 0x161   :  { %v5384_v34 = vadd.f32 %v5269_v31, %v770_v6  ;;  %v4063_v20 = vpop.eup %4062  ;;  %4082 = vrcp.f32 %v1100_v25  ;;  %v1102_v35 = vadd.f32 1.0, %v4061_v8  ;;  %v771_v9 = vadd.f32 %v5176_v7, %v5187_v5 }
 0x162   :  { %v4065_v49 = vpop.eup %4064  ;;  %4084 = vrcp.f32 %v1101_v32  ;;  %v1103_v4 = vadd.f32 1.0, %v4063_v20  ;;  %v773_v26 = vadd.f32 %v5184_v14, %v5187_v5  ;;  %v774_v31 = vadd.f32 %v5150_v21, %v5191_v44 }
 0x163   :  { %v4067_v6 = vpop.eup %4066  ;;  %4086 = vrcp.f32 %v1102_v35  ;;  %v1104_v19 = vadd.f32 1.0, %v4065_v49  ;;  %v5396_v54 = vadd.f32 %v920_v53, %v771_v9  ;;  %v772_v25 = vadd.f32 %v5150_v21, %v5181_v39 }
 0x164   :  { %2979 = vbcast.lane.b32.xlu0 %v5349_v12, 256  ;;  %v4069_v7 = vpop.eup %4068  ;;  %v5402_v8 = vrot.slane %v887_v18, %v4842_v16  ;;  %4088 = vrcp.f32 %v1103_v4  ;;  %v1105_v14 = vadd.f32 1.0, %v4067_v6  ;;  %v3606_v32 = vmul.f32 -1.442695, %v5384_v34  ;;  %2983 = vbcast.lane.b32.xlu1 %v5349_v12, 264 }
 0x165   :  { %v4071_v44 = vpop.eup %4070  ;;  %4090 = vrcp.f32 %v1104_v19  ;;  %v1106_v2 = vadd.f32 1.0, %v4069_v7  ;;  %v5405_v20 = vadd.f32 %v920_v53, %v772_v25  ;;  %v775_v49 = vadd.f32 %v5300_v48, %v5187_v5 }
 0x166   :  { %v4073_v35 = vpop.eup %4072  ;;  %4092 = vrcp.f32 %v1105_v14  ;;  %v1107_v39 = vadd.f32 1.0, %v4071_v44  ;;  %v5409_v9 = vadd.f32 %v924_v57, %v773_v26  ;;  %v5411_v10 = vadd.f32 %v924_v57, %v774_v31 }
 0x167   :  { %4094 = vrcp.f32 %v1106_v2  ;;  %v1108_v4 = vadd.f32 1.0, %v4073_v35  ;;  %v3607_v6 = vmul.f32 -1.442695, %v5396_v54  ;;  %v776_v53 = vadd.f32 %v5150_v21, %v5304_v27 }
 0x168   :  { %v4075_v18 = vpop.eup %4074  ;;  %3056 = vbcast.lane.b32.xlu0 %v5338_v47, 256  ;;  %4096 = vrcp.f32 %v1107_v39  ;;  %v5418_v25 = vadd.f32 %v928_v62, %v775_v49  ;;  %v777_v57 = vadd.f32 %v5308_v36, %v5187_v5  ;;  %v3608_v31 = vmul.f32 -1.442695, %v5405_v20  ;;  %v708_v36 = vpop.xlane.xlu0 %707  ;;  %3060 = vbcast.lane.b32.xlu1 %v5338_v47, 264 }
 0x169   :  { %v4077_v48 = vpop.eup %4076  ;;  %v1109_v19 = vadd.f32 1.0, %v4075_v18  ;;  %4098 = vrcp.f32 %v1108_v4  ;;  %v5424_v7 = vadd.f32 %v928_v62, %v776_v53  ;;  %v3609_v44 = vmul.f32 -1.442695, %v5409_v9 }
 0x16a   :  { %v4079_v26 = vpop.eup %4078  ;;  %v1193_v55 = vmul.f32 %v4077_v48, %v5215_v37  ;;  %v5429_v2 = vadd.f32 %v5381_v15, %v777_v57  ;;  %v3610_v62 = vmul.f32 -1.442695, %v5411_v10  ;;  %v778_v49 = vadd.f32 %v5150_v21, %v5315_v58 }
 0x16b   :  { %v4081_v14 = vpop.eup %4080  ;;  %v1194_v27 = vmul.f32 %v4079_v26, %v5217_v42  ;;  %4100 = vrcp.f32 %v1109_v19  ;;  %v944_v42 = vrot.slane %v5366_v17, %v4842_v16  ;;  %v3611_v12 = vmul.f32 -1.442695, %v5418_v25 }
 0x16c   :  { %3898 = vmatprep.mubr.msk.f32.mxu0 %vm203_vm0, %v1193_v55  ;;  %v1195_v37 = vmul.f32 %v4081_v14, %v5219_v33  ;;  %4102 = vpow2.f32 %v3606_v32  ;;  %3067 = vbcast.lane.b32.xlu0 %v5353_v56, 256  ;;  %v779_v35 = vadd.f32 %v5320_v40, %v5187_v5  ;;  %v3612_v33 = vmul.f32 -1.442695, %v5424_v7  ;;  %v714_v26 = vpop.xlane.xlu0 %713 }
 0x16d   :  { %3899 = vmatmul.mubr.msk.f32.vlgmr.msra.gmra.mxu0 %vm203_vm0, %v1194_v27  ;;  %4104 = vpow2.f32 %v3607_v6  ;;  %v5447_v58 = vadd.f32 %v5381_v15, %v778_v49  ;;  %v780_v32 = vadd.f32 %v5150_v21, %v5334_v11  ;;  %v3613_v18 = vmul.f32 -1.442695, %v5429_v2  ;;  %3071 = vbcast.lane.b32.xlu1 %v5353_v56, 264 }
 0x16e   :  { %3901 = vmatprep.mubr.msk.f32.mxu0 %vm203_vm0, %v1195_v37  ;;  %4106 = vpow2.f32 %v3608_v31  ;;  %v4083_v39 = vpop.eup %4082  ;;  %v5453_v4 = vadd.f32 %v5402_v8, %v779_v35  ;;  %v781_v40 = vadd.f32 %v5356_v43, %v5187_v5  ;;  %v782_v11 = vadd.f32 %v5150_v21, %v5360_v1 }
 0x16f   :  { %4108 = vpow2.f32 %v3609_v44  ;;  %v4085_v6 = vpop.eup %4084  ;;  %v1196_v53 = vmul.f32 %v4083_v39, %v5228_v46  ;;  %v5460_v15 = vadd.f32 %v5402_v8, %v780_v32  ;;  %v783_v47 = vadd.f32 %v5363_v60, %v5187_v5 }
 0x170   :  { %4110 = vpow2.f32 %v3610_v62  ;;  %v4087_v48 = vpop.eup %4086  ;;  %v1197_v19 = vmul.f32 %v4085_v6, %v5252_v51  ;;  %v5466_v57 = vadd.f32 %v5388_v23, %v781_v40  ;;  %v753_v46 = vmul.f32 %v5120_v59, %v708_v36 }
 0x171   :  { %4112 = vpow2.f32 %v3611_v12  ;;  %v4089_v43 = vpop.eup %4088  ;;  %3902 = vmatmul.mubr.msk.f32.gmra.mxu0 %vm203_vm0, %v1196_v53  ;;  %v3614_v8 = vmul.f32 -1.442695, %v5447_v58  ;;  %v5474_v1 = vadd.f32 %v5388_v23, %v782_v11  ;;  %v888_v55 = vcombine.high %v5366_v17, %v5366_v17 }
 0x172   :  { %4114 = vpow2.f32 %v3612_v33  ;;  %v4091_v51 = vpop.eup %4090  ;;  %3904 = vmatprep.mubr.msk.f32.mxu0 %vm203_vm0, %v1197_v19  ;;  %v3615_v60 = vmul.f32 -1.442695, %v5453_v4  ;;  %v5480_v31 = vadd.f32 %v944_v42, %v783_v47  ;;  %v1198_v27 = vmul.f32 %v4087_v48, %v5246_v0 }
 0x173   :  { %4116 = vpow2.f32 %v3613_v18  ;;  %v4093_v14 = vpop.eup %4092  ;;  %v3616_v44 = vmul.f32 -1.442695, %v5460_v15  ;;  %v6475_v36 = vcombine.high %v5341_v50, %v5341_v50  ;;  %v755_v37 = vmul.f32 %v5120_v59, %v714_v26 }
 0x174   :  { %v4095_v23 = vpop.eup %4094  ;;  %v1199_v62 = vmul.f32 %v4089_v43, %v5259_v24  ;;  %v3617_v49 = vmul.f32 -1.442695, %v5466_v57  ;;  %4118 = vpow2.f32 %v3614_v8  ;;  %v3618_v0 = vmul.f32 -1.442695, %v5474_v1 }
 0x175   :  { %v948_v17 = vrot.slane %v6475_v36, %v4842_v16  ;;  %v4097_v12 = vpop.eup %4096  ;;  %3905 = vmatmul.mubr.msk.f32.gmra.mxu0 %vm203_vm0, %v1198_v27  ;;  %v784_v56 = vadd.f32 %v5150_v21, %v5371_v22  ;;  %v952_v33 = vrot.slane %v888_v55, %v4842_v16  ;;  %4120 = vpow2.f32 %v3615_v60 }
 0x176   :  { %v4099_v35 = vpop.eup %4098  ;;  %3907 = vmatprep.mubr.msk.f32.mxu0 %vm203_vm0, %v1199_v62  ;;  %v3619_v59 = vmul.f32 -1.442695, %v5480_v31  ;;  %v785_v24 = vadd.f32 %v753_v46, %v5187_v5  ;;  %v1200_v32 = vmul.f32 %v4091_v51, %v5264_v29  ;;  %4122 = vpow2.f32 %v3616_v44 }
 0x177   :  { %v5501_v39 = vadd.f32 %v944_v42, %v784_v56  ;;  %v787_v40 = vadd.f32 %v755_v37, %v5187_v5  ;;  %v1201_v21 = vmul.f32 %v4093_v14, %v5278_v41  ;;  %4124 = vpow2.f32 %v3617_v49 }
 0x178   :  { %v4101_v50 = vpop.eup %4100  ;;  %v5505_v22 = vadd.f32 %v948_v17, %v785_v24  ;;  %4126 = vpow2.f32 %v3618_v0  ;;  %v5509_v48 = vadd.f32 %v948_v17, %v5226_v28  ;;  %v1202_v41 = vmul.f32 %v4095_v23, %v5282_v45 }
 0x179   :  { %v4103_v18 = vpop.eup %4102  ;;  %3908 = vmatmul.mubr.msk.f32.gmra.mxu0 %vm203_vm0, %v1200_v32  ;;  %v5511_v29 = vadd.f32 %v952_v33, %v787_v40  ;;  %4128 = vpow2.f32 %v3619_v59  ;;  %v3620_v47 = vmul.f32 -1.442695, %v5501_v39  ;;  %v1203_v46 = vmul.f32 %v4097_v12, %v5284_v52 }
 0x17a   :  { %v4105_v6 = vpop.eup %4104  ;;  %v1110_v53 = vadd.f32 1.0, %v4103_v18  ;;  %3910 = vmatprep.mubr.msk.f32.mxu0 %vm203_vm0, %v1201_v21  ;;  %v3621_v28 = vmul.f32 -1.442695, %v5505_v22  ;;  %v3622_v14 = vmul.f32 -1.442695, %v5509_v48  ;;  %v1204_v27 = vmul.f32 %v4099_v35, %v5289_v38 }
 0x17b   :  { %v4107_v11 = vpop.eup %4106  ;;  %v1111_v42 = vadd.f32 1.0, %v4105_v6  ;;  %v3623_v52 = vmul.f32 -1.442695, %v5511_v29  ;;  %v5524_v44 = vadd.f32 %v952_v33, %v5231_v30  ;;  %v1205_v23 = vmul.f32 %v4101_v50, %v5295_v13 }
 0x17c   :  { %v4109_v5 = vpop.eup %4108  ;;  %4130 = vrcp.f32 %v1110_v53  ;;  %v1112_v19 = vadd.f32 1.0, %v4107_v11 }
 0x17d   :  { %v4111_v43 = vpop.eup %4110  ;;  %4132 = vrcp.f32 %v1111_v42  ;;  %v1113_v26 = vadd.f32 1.0, %v4109_v5  ;;  %3911 = vmatmul.mubr.msk.f32.gmra.mxu0 %vm203_vm0, %v1202_v41  ;;  %v3624_v49 = vmul.f32 -1.442695, %v5524_v44 }
 0x17e   :  { %v4113_v8 = vpop.eup %4112  ;;  %4134 = vrcp.f32 %v1112_v19  ;;  %v1114_v51 = vadd.f32 1.0, %v4111_v43  ;;  %3913 = vmatprep.mubr.msk.f32.mxu0 %vm203_vm0, %v1203_v46 }
 0x17f   :  { %v4115_v55 = vpop.eup %4114  ;;  %4136 = vrcp.f32 %v1113_v26  ;;  %v1115_v45 = vadd.f32 1.0, %v4113_v8 }
 0x180   :  { %v4117_v60 = vpop.eup %4116  ;;  %4138 = vpow2.f32 %v3620_v47  ;;  %v1116_v36 = vadd.f32 1.0, %v4115_v55 }
 0x181   :  { %4140 = vpow2.f32 %v3621_v28  ;;  %3914 = vmatmul.mubr.msk.f32.gmra.mxu0 %vm203_vm0, %v1204_v27  ;;  %v4119_v17 = vpop.eup %4118  ;;  %v1117_v37 = vadd.f32 1.0, %v4117_v60 }
 0x182   :  { %4142 = vrcp.f32 %v1114_v51  ;;  %3916 = vmatprep.mubr.msk.f32.mxu0 %vm203_vm0, %v1205_v23  ;;  %v4121_v62 = vpop.eup %4120  ;;  %v1118_v12 = vadd.f32 1.0, %v4119_v17 }
 0x183   :  { %4144 = vrcp.f32 %v1115_v45  ;;  %v4123_v38 = vpop.eup %4122  ;;  %v1119_v0 = vadd.f32 1.0, %v4121_v62 }
 0x184   :  { %4146 = vpow2.f32 %v3622_v14  ;;  %v4125_v30 = vpop.eup %4124  ;;  %v1120_v24 = vadd.f32 1.0, %v4123_v38 }
 0x185   :  { %4148 = vpow2.f32 %v3623_v52  ;;  %v4127_v13 = vpop.eup %4126  ;;  %v1121_v18 = vadd.f32 1.0, %v4125_v30 }
 0x186   :  { %4150 = vrcp.f32 %v1116_v36  ;;  %v4129_v56 = vpop.eup %4128  ;;  %v1122_v11 = vadd.f32 1.0, %v4127_v13  ;;  %v1782_v13 = vld [vmem:[#allocation11 + $0x8] sm:$0xff] }
 0x187   :  { %4152 = vrcp.f32 %v1117_v37  ;;  %v1123_v5 = vadd.f32 1.0, %v4129_v56  ;;  %v3254_v56 = vld [vmem:[#allocation14 + $0x8] sm:$0xff] }
 0x188   :  { %4154 = vpow2.f32 %v3624_v49 }
 0x189   :  { %v4131_v35 = vpop.eup %4130  ;;  %4156 = vrcp.f32 %v1118_v12 }
 0x18a   :  { %v4133_v33 = vpop.eup %4132  ;;  %v1206_v59 = vmul.f32 %v4131_v35, %v5384_v34  ;;  %4158 = vrcp.f32 %v1119_v0  ;;  %v5568_v0 = vld [vmem:[#allocation13 + $0x18] sm:$0xff]  ;;  %v5574_v35 = vld [vmem:[%s6379_s9] ss:$0 sm:$0xff] }
 0x18b   :  { %v4135_v50 = vpop.eup %4134  ;;  %v1207_v32 = vmul.f32 %v4133_v33, %v5396_v54  ;;  %4160 = vrcp.f32 %v1120_v24  ;;  %v5576_v33 = vpop.permute.xlu1 %2906 }
 0x18c   :  { %v4137_v40 = vpop.eup %4136  ;;  %3917 = vmatmul.mubr.msk.f32.gmra.mxu0 %vm203_vm0, %v1206_v59  ;;  %v1208_v53 = vmul.f32 %v4135_v50, %v5405_v20  ;;  %4162 = vrcp.f32 %v1121_v18 }
 0x18d   :  { %v4139_v21 = vpop.eup %4138  ;;  %3919 = vmatprep.mubr.msk.f32.mxu0 %vm203_vm0, %v1207_v32  ;;  %v1209_v34 = vmul.f32 %v4137_v40, %v5409_v9  ;;  %4164 = vrcp.f32 %v1122_v11 }
 0x18e   :  { %v4141_v6 = vpop.eup %4140  ;;  %v1124_v43 = vadd.f32 1.0, %v4139_v21  ;;  %4166 = vrcp.f32 %v1123_v5 }
 0x18f   :  { %v4143_v42 = vpop.eup %4142  ;;  %v1125_v26 = vadd.f32 1.0, %v4141_v6  ;;  %v5585_v40 = vpop.permute.xlu1 %2913 }
 0x190   :  { %v4145_v41 = vpop.eup %4144  ;;  %3920 = vmatmul.mubr.msk.f32.gmra.mxu0 %vm203_vm0, %v1208_v53  ;;  %v1210_v47 = vmul.f32 %v4143_v42, %v5411_v10  ;;  %4168 = vrcp.f32 %v1124_v43 }
 0x191   :  { %v4147_v54 = vpop.eup %4146  ;;  %3922 = vmatprep.mubr.msk.f32.mxu0 %vm203_vm0, %v1209_v34  ;;  %v1211_v20 = vmul.f32 %v4145_v41, %v5418_v25  ;;  %4170 = vrcp.f32 %v1125_v26  ;;  %v3253_v26 = vld [vmem:[#allocation14] sm:$0xff] }
 0x192   :  { %v4149_v19 = vpop.eup %4148  ;;  %v1126_v8 = vadd.f32 1.0, %v4147_v54 }
 0x193   :  { %v4151_v46 = vpop.eup %4150  ;;  %v1127_v45 = vadd.f32 1.0, %v4149_v19  ;;  %v5599_v19 = vpop.permute.xlu1 %2917 }
 0x194   :  { %v4153_v28 = vpop.eup %4152  ;;  %3923 = vmatmul.mubr.msk.f32.gmra.mxu0 %vm203_vm0, %v1210_v47  ;;  %v1212_v51 = vmul.f32 %v4151_v46, %v5424_v7  ;;  %4172 = vrcp.f32 %v1126_v8 }
 0x195   :  { %3925 = vmatprep.mubr.msk.f32.mxu0 %vm203_vm0, %v1211_v20  ;;  %v4155_v9 = vpop.eup %4154  ;;  %v1213_v10 = vmul.f32 %v4153_v28, %v5429_v2  ;;  %4174 = vrcp.f32 %v1127_v45  ;;  %v5605_v20 = vpop.permute.xlu0 %2902 }
 0x196   :  { %v4157_v55 = vpop.eup %4156  ;;  %v1128_v25 = vadd.f32 1.0, %v4155_v9 }
 0x197   :  { %v4159_v60 = vpop.eup %4158  ;;  %v1214_v14 = vmul.f32 %v4157_v55, %v5447_v58  ;;  %v5611_v55 = vld [vmem:[#allocation7] sm:$0xff] }
 0x198   :  { %3926 = vmatmul.mubr.msk.f32.gmra.mxu0 %vm203_vm0, %v1212_v51  ;;  %v4161_v27 = vpop.eup %4160  ;;  %v1215_v52 = vmul.f32 %v4159_v60, %v5453_v4  ;;  %4176 = vrcp.f32 %v1128_v25  ;;  %v5617_v60 = vpop.permute.xlu1 %2928  ;;  %v2475_v25 = vrot.slane %v5611_v55, %v4842_v16 }
 0x199   :  { %3928 = vmatprep.mubr.msk.f32.mxu0 %vm203_vm0, %v1213_v10  ;;  %v4163_v7 = vpop.eup %4162  ;;  %v1216_v2 = vmul.f32 %v4161_v27, %v5460_v15  ;;  %v5621_v27 = vld [vmem:[#allocation7 + $0x8] sm:$0xff] }
 0x19a   :  { %v4165_v23 = vpop.eup %4164  ;;  %v1217_v36 = vmul.f32 %v4163_v7, %v5466_v57  ;;  %2481 = vbcast.lane.b32.xlu1 %v2475_v25, 264  ;;  %2477 = vbcast.lane.b32.xlu0 %v2475_v25, 256 }
 0x19b   :  { %v4167_v17 = vpop.eup %4166  ;;  %v1218_v58 = vmul.f32 %v4165_v23, %v5474_v1  ;;  %v5627_v23 = vpop.permute.xlu0 %2924 }
 0x19c   :  { %3929 = vmatmul.mubr.msk.f32.gmra.mxu0 %vm203_vm0, %v1214_v14  ;;  %v1219_v4 = vmul.f32 %v4167_v17, %v5480_v31 }
 0x19d   :  { %3931 = vmatprep.mubr.msk.f32.mxu0 %vm203_vm0, %v1215_v52  ;;  %v4169_v37 = vpop.eup %4168 }
 0x19e   :  { %v4171_v62 = vpop.eup %4170  ;;  %v1220_v15 = vmul.f32 %v4169_v37, %v5501_v39  ;;  %v1784_v39 = vld [vmem:[#allocation11 + $0x18] sm:$0xff] }
 0x19f   :  { %v1221_v57 = vmul.f32 %v4171_v62, %v5505_v22  ;;  %3946 = vmatprep.subr.mxu1 %v1784_v39  ;;  %v1783_v22 = vld [vmem:[#allocation11 + $0x10] sm:$0xff] }
 0x1a0   :  { %3932 = vmatmul.mubr.msk.f32.gmra.mxu0 %vm203_vm0, %v1216_v2  ;;  %3947 = vmatpush3.msra.mxu1 %v1784_v39  ;;  %v2574_v39 = vrot.slane %v5621_v27, %v5096_v61 }
 0x1a1   :  { %3934 = vmatprep.mubr.msk.f32.mxu0 %vm203_vm0, %v1217_v36  ;;  %v4173_v38 = vpop.eup %4172  ;;  %3948 = vmatprep.subr.mxu1 %v1783_v22  ;;  %v2486_v36 = vrot.slane %v5611_v55, %v5096_v61 }
 0x1a2   :  { %v4175_v49 = vpop.eup %4174  ;;  %v1222_v1 = vmul.f32 %v4173_v38, %v5509_v48  ;;  %3949 = vmatpush3.msra.mxu1 %v1783_v22  ;;  %v1781_v48 = vld [vmem:[#allocation11] sm:$0xff] }
 0x1a3   :  { %v1223_v31 = vmul.f32 %v4175_v49, %v5511_v29  ;;  %3950 = vmatprep.subr.mxu1 %v1782_v13  ;;  %v3256_v29 = vld [vmem:[#allocation14 + $0x18] sm:$0xff]  ;;  %2488 = vbcast.lane.b32.xlu1 %v2486_v36, 256 }
 0x1a4   :  { %3935 = vmatmul.mubr.msk.f32.gmra.mxu0 %vm203_vm0, %v1218_v58  ;;  %3951 = vmatpush3.msra.mxu1 %v1782_v13 }
 0x1a5   :  { %3937 = vmatprep.mubr.msk.f32.mxu0 %vm203_vm0, %v1219_v4  ;;  %v4177_v30 = vpop.eup %4176  ;;  %3952 = vmatprep.subr.mxu1 %v1781_v48 }
 0x1a6   :  { %v1224_v12 = vmul.f32 %v4177_v30, %v5524_v44  ;;  %3953 = vmatpush3.msra.mxu1 %v1781_v48  ;;  %4002 = vmatprep.subr.mxu0 %v3256_v29  ;;  %v3255_v44 = vld [vmem:[#allocation14 + $0x10] sm:$0xff]  ;;  %v5641_v30 = vpop.permute.xlu1 %2994  ;;  %v5649_v48 = vpop.permute.xlu0 %2990 }
 0x1a7   :  { %4013 = vmatprep.subr.mxu1 %v5568_v0  ;;  %4003 = vmatpush3.msra.mxu0 %v3256_v29 }
 0x1a8   :  { %3938 = vmatmul.mubr.msk.f32.gmra.mxu0 %vm203_vm0, %v1220_v15  ;;  %4004 = vmatprep.subr.mxu0 %v3255_v44  ;;  %v2563_v15 = vrot.slane %v5621_v27, %v4842_v16 }
 0x1a9   :  { %3940 = vmatprep.mubr.msk.f32.mxu0 %vm203_vm0, %v1221_v57  ;;  %4005 = vmatpush3.msra.mxu0 %v3255_v44 }
 0x1aa   :  { %4006 = vmatprep.subr.mxu0 %v3254_v56  ;;  %2565 = vbcast.lane.b32.xlu0 %v2563_v15, 256 }
 0x1ab   :  { %4007 = vmatpush3.msra.mxu0 %v3254_v56  ;;  %2492 = vbcast.lane.b32.xlu1 %v2486_v36, 264 }
 0x1ac   :  { %3941 = vmatmul.mubr.msk.f32.gmra.mxu0 %vm203_vm0, %v1222_v1  ;;  %4008 = vmatprep.subr.mxu0 %v3253_v26 }
 0x1ad   :  { %3943 = vmatprep.mubr.msk.f32.mxu0 %vm203_vm0, %v1223_v31  ;;  %4009 = vmatpush3.msra.mxu0 %v3253_v26 }
 0x1ae   :  { %2576 = vbcast.lane.b32.xlu0 %v2574_v39, 256 }
 0x1af   :  { %2569 = vbcast.lane.b32.xlu1 %v2563_v15, 264 }
 0x1b0   :  { %3944 = vmatmul.mubr.msk.f32.gmra.mxu0 %vm203_vm0, %v1224_v12 }
 0x1b3   :  { %2580 = vbcast.lane.b32.xlu1 %v2574_v39, 264 }
 0x22d   :  { %v3900_v59 = vpop.f32.mrf.mxu0 }
 0x22e   :  { %v5579_v24 = vadd.f32 %v3900_v59, %v5574_v35 }
 0x22f   :  { %v1398_v50 = vpop.f32.mrf.mxu0 }
 0x230   :  { %v3659_v32 = vmul.f32 -1.442695, %v5579_v24  ;;  %v5583_v18 = vadd.f32 %v5574_v35, %v1398_v50  ;;  %v5652_v50 = vpop.permute.xlu1 %3005 }
 0x231   :  { %v3903_v6 = vpop.f32.mrf.mxu0 }
 0x232   :  { %4178 = vpow2.f32 %v3659_v32  ;;  %v3658_v21 = vmul.f32 -1.442695, %v5583_v18  ;;  %v5589_v53 = vadd.f32 %v3903_v6, %v5574_v35  ;;  %v2497_v32 = vrot.slane %v5611_v55, %v5103_v3 }
 0x233   :  { %v1408_v11 = vpop.f32.mrf.mxu0 }
 0x234   :  { %4180 = vpow2.f32 %v3658_v21  ;;  %v3661_v42 = vmul.f32 -1.442695, %v5589_v53  ;;  %v5593_v34 = vadd.f32 %v5574_v35, %v1408_v11  ;;  %v5656_v11 = vpop.permute.xlu0 %3001  ;;  %2499 = vbcast.lane.b32.xlu0 %v2497_v32, 256  ;;  %2503 = vbcast.lane.b32.xlu1 %v2497_v32, 264  ;;  %v3250_v32 = vld [vmem:[#allocation13 + $0x8] sm:$0xff] }
 0x235   :  { %v3906_v5 = vpop.f32.mrf.mxu0 }
 0x236   :  { %4182 = vpow2.f32 %v3661_v42  ;;  %v3660_v41 = vmul.f32 -1.442695, %v5593_v34  ;;  %v5597_v54 = vadd.f32 %v3906_v5, %v5574_v35 }
 0x237   :  { %v1418_v47 = vpop.f32.mrf.mxu0 }
 0x238   :  { %4184 = vpow2.f32 %v3660_v41  ;;  %v3663_v43 = vmul.f32 -1.442695, %v5597_v54  ;;  %v5603_v46 = vadd.f32 %v5574_v35, %v1418_v47 }
 0x239   :  { %v3909_v28 = vpop.f32.mrf.mxu0 }
 0x23a   :  { %4186 = vpow2.f32 %v3663_v43  ;;  %v3662_v9 = vmul.f32 -1.442695, %v5603_v46  ;;  %v5609_v8 = vadd.f32 %v3909_v28, %v5574_v35  ;;  %v2585_v43 = vrot.slane %v5621_v27, %v5103_v3 }
 0x23b   :  { %v1428_v51 = vpop.f32.mrf.mxu0 }
 0x23c   :  { %4188 = vpow2.f32 %v3662_v9  ;;  %v3665_v45 = vmul.f32 -1.442695, %v5609_v8  ;;  %v5615_v10 = vadd.f32 %v5574_v35, %v1428_v51  ;;  %2587 = vbcast.lane.b32.xlu0 %v2585_v43, 256  ;;  %2591 = vbcast.lane.b32.xlu1 %v2585_v43, 264  ;;  %v3249_v43 = vld [vmem:[#allocation13] sm:$0xff] }
 0x23d   :  { %v3912_v14 = vpop.f32.mrf.mxu0 }
 0x23e   :  { %4190 = vpow2.f32 %v3665_v45  ;;  %v3664_v7 = vmul.f32 -1.442695, %v5615_v10  ;;  %v5625_v2 = vadd.f32 %v3912_v14, %v5574_v35  ;;  %v5667_v14 = vpop.permute.xlu1 %2939 }
 0x23f   :  { %v4179_v52 = vpop.eup %4178  ;;  %v1438_v58 = vpop.f32.mrf.mxu0 }
 0x240   :  { %v1654_v17 = vadd.f32 1.0, %v4179_v52  ;;  %4192 = vpow2.f32 %v3664_v7  ;;  %v3667_v4 = vmul.f32 -1.442695, %v5625_v2  ;;  %v5633_v62 = vadd.f32 %v5574_v35, %v1438_v58  ;;  %v5673_v58 = vpop.permute.xlu0 %2935 }
 0x241   :  { %v4181_v37 = vpop.eup %4180  ;;  %v3915_v57 = vpop.f32.mrf.mxu0 }
 0x242   :  { %4194 = vrcp.f32 %v1654_v17  ;;  %v1653_v38 = vadd.f32 1.0, %v4181_v37  ;;  %v3666_v49 = vmul.f32 -1.442695, %v5633_v62  ;;  %v5639_v1 = vadd.f32 %v3915_v57, %v5574_v35 }
 0x243   :  { %4196 = vpow2.f32 %v3667_v4  ;;  %v4183_v31 = vpop.eup %4182  ;;  %v1448_v12 = vpop.f32.mrf.mxu0  ;;  %v2508_v37 = vrot.slane %v5611_v55, %v5140_v63 }
 0x244   :  { %4198 = vrcp.f32 %v1653_v38  ;;  %v1656_v16 = vadd.f32 1.0, %v4183_v31  ;;  %v3669_v22 = vmul.f32 -1.442695, %v5639_v1  ;;  %v5647_v13 = vadd.f32 %v5574_v35, %v1448_v12 }
 0x245   :  { %4200 = vpow2.f32 %v3666_v49  ;;  %v4185_v29 = vpop.eup %4184  ;;  %2510 = vbcast.lane.b32.xlu0 %v2508_v37, 256  ;;  %2514 = vbcast.lane.b32.xlu1 %v2508_v37, 264 }
 0x246   :  { %4202 = vrcp.f32 %v1656_v16  ;;  %v1655_v44 = vadd.f32 1.0, %v4185_v29  ;;  %v3668_v56 = vmul.f32 -1.442695, %v5647_v13  ;;  %v3251_v29 = vld [vmem:[#allocation13 + $0x10] sm:$0xff] }
 0x247   :  { %v4187_v59 = vpop.eup %4186  ;;  %4204 = vpow2.f32 %v3669_v22 }
 0x248   :  { %4206 = vrcp.f32 %v1655_v44  ;;  %v1658_v61 = vadd.f32 1.0, %v4187_v59 }
 0x249   :  { %v4189_v21 = vpop.eup %4188  ;;  %4208 = vpow2.f32 %v3668_v56  ;;  %v5688_v56 = vpop.permute.xlu1 %3016 }
 0x24a   :  { %v1657_v6 = vadd.f32 1.0, %v4189_v21  ;;  %4210 = vrcp.f32 %v1658_v61  ;;  %v2596_v21 = vrot.slane %v5621_v27, %v5140_v63 }
 0x24b   :  { %v4191_v42 = vpop.eup %4190 }
 0x24c   :  { %v3918_v5 = vpop.f32.mrf.mxu0  ;;  %4212 = vrcp.f32 %v1657_v6  ;;  %v1660_v41 = vadd.f32 1.0, %v4191_v42  ;;  %v5695_v42 = vpop.permute.xlu0 %3012  ;;  %2598 = vbcast.lane.b32.xlu0 %v2596_v21, 256  ;;  %2602 = vbcast.lane.b32.xlu1 %v2596_v21, 264  ;;  %v6477_v21 = vld [vmem:[#allocation57_spill] sm:$0xff] }
 0x24d   :  { %v5659_v47 = vadd.f32 %v3918_v5, %v5574_v35  ;;  %v4193_v26 = vpop.eup %4192 }
 0x24e   :  { %v1458_v28 = vpop.f32.mrf.mxu0  ;;  %v1659_v51 = vadd.f32 1.0, %v4193_v26  ;;  %4214 = vrcp.f32 %v1660_v41 }
 0x24f   :  { %v4195_v9 = vpop.eup %4194  ;;  %v3671_v45 = vmul.f32 -1.442695, %v5659_v47  ;;  %v5665_v25 = vadd.f32 %v5574_v35, %v1458_v28 }
 0x250   :  { %v4197_v52 = vpop.eup %4196  ;;  %v3921_v7 = vpop.f32.mrf.mxu0  ;;  %4216 = vrcp.f32 %v1659_v51  ;;  %v1750_v57 = vmul.f32 %v4195_v9, %v5579_v24 }
 0x251   :  { %v4199_v36 = vpop.eup %4198  ;;  %v3670_v3 = vmul.f32 -1.442695, %v5665_v25  ;;  %v5671_v17 = vadd.f32 %v3921_v7, %v5574_v35  ;;  %4218 = vpow2.f32 %v3671_v45  ;;  %v1662_v16 = vadd.f32 1.0, %v4197_v52 }
 0x252   :  { %v4201_v4 = vpop.eup %4200  ;;  %v1749_v15 = vmul.f32 %v4199_v36, %v5583_v18  ;;  %v1468_v38 = vpop.f32.mrf.mxu0  ;;  %v6476_v36 = vld [vmem:[#allocation56_spill] sm:$0xff] }
 0x253   :  { %v1661_v49 = vadd.f32 1.0, %v4201_v4  ;;  %v3673_v31 = vmul.f32 -1.442695, %v5671_v17  ;;  %v5681_v12 = vadd.f32 %v5574_v35, %v1468_v38  ;;  %v4203_v39 = vpop.eup %4202  ;;  %4220 = vpow2.f32 %v3670_v3 }
 0x254   :  { %v3924_v22 = vpop.f32.mrf.mxu0  ;;  %3954 = vmatprep.mubr.msk.f32.mxu1 %vm203_vm0, %v1749_v15  ;;  %v4205_v18 = vpop.eup %4204  ;;  %v1752_v41 = vmul.f32 %v4203_v39, %v5589_v53  ;;  %v3074_v53 = vmul.f32 %v5576_v33, %v1750_v57  ;;  %v2519_v3 = vrot.slane %v5611_v55, %v6476_v36 }
 0x255   :  { %4222 = vrcp.f32 %v1661_v49  ;;  %v3672_v44 = vmul.f32 -1.442695, %v5681_v12  ;;  %v5686_v24 = vadd.f32 %v3924_v22, %v5574_v35  ;;  %3955 = vmatmul.mubr.msk.f32.vlgmr.msra.gmra.mxu1 %vm203_vm0, %v1750_v57  ;;  %v4207_v59 = vpop.eup %4206  ;;  %v1664_v9 = vadd.f32 1.0, %v4205_v18 }
 0x256   :  { %4224 = vpow2.f32 %v3673_v31  ;;  %v1478_v61 = vpop.f32.mrf.mxu0  ;;  %4014 = vmatpush3.msra.mxu1 %v5568_v0  ;;  %v1751_v6 = vmul.f32 %v4207_v59, %v5593_v34  ;;  %v4209_v5 = vpop.eup %4208  ;;  %v3073_v34 = vmul.f32 %v5605_v20, %v1749_v15  ;;  %2521 = vbcast.lane.b32.xlu0 %v2519_v3, 256  ;;  %v3076_v59 = vmul.f32 %v5599_v19, %v1752_v41 }
 0x257   :  { %4226 = vpow2.f32 %v3672_v44  ;;  %4015 = vmatprep.subr.mxu1 %v3251_v29  ;;  %v3675_v26 = vmul.f32 -1.442695, %v5686_v24  ;;  %v5700_v28 = vadd.f32 %v5574_v35, %v1478_v61  ;;  %v4211_v63 = vpop.eup %4210  ;;  %v1663_v20 = vadd.f32 1.0, %v4209_v5  ;;  %v5713_v15 = vpop.permute.xlu1 %2950  ;;  %2525 = vbcast.lane.b32.xlu1 %v2519_v3, 264  ;;  %v6478_v3 = vld [vmem:[#allocation58_spill] sm:$0xff] }
 0x258   :  { %4228 = vrcp.f32 %v1662_v16  ;;  %v3927_v0 = vpop.f32.mrf.mxu0  ;;  %4016 = vmatpush3.msra.mxu1 %v3251_v29  ;;  %3957 = vmatprep.mubr.msk.f32.mxu1 %vm203_vm0, %v1751_v6  ;;  %v1754_v33 = vmul.f32 %v4211_v63, %v5597_v54  ;;  %v3105_v39 = vsel %vm203_vm0, %v3073_v34, 0.0  ;;  %v2607_v54 = vrot.slane %v5621_v27, %v6476_v36 }
 0x259   :  { %4017 = vmatprep.subr.mxu1 %v3250_v32  ;;  %v4213_v51 = vpop.eup %4212  ;;  %v3674_v45 = vmul.f32 -1.442695, %v5700_v28  ;;  %v5707_v52 = vadd.f32 %v3927_v0, %v5574_v35  ;;  %3958 = vmatmul.mubr.msk.f32.gmra.mxu1 %vm203_vm0, %v1752_v41  ;;  %4230 = vpow2.f32 %v3675_v26  ;;  %v3106_v16 = vsel %vm203_vm0, %v3074_v53, 0.0 }
 0x25a   :  { %v1488_v7 = vpop.f32.mrf.mxu0  ;;  %v1753_v4 = vmul.f32 %v4213_v51, %v5603_v46  ;;  %4018 = vmatpush3.msra.mxu1 %v3250_v32  ;;  %4232 = vrcp.f32 %v1664_v9  ;;  %v5721_v46 = vpop.permute.xlu0 %2946  ;;  %v3075_v22 = vmul.f32 %v5585_v40, %v1751_v6  ;;  %v3107_v5 = vadd.f32 %v3106_v16, %v3105_v39  ;;  %2609 = vbcast.lane.b32.xlu0 %v2607_v54, 256 }
 0x25b   :  { %v3677_v38 = vmul.f32 -1.442695, %v5707_v52  ;;  %v5718_v57 = vadd.f32 %v5574_v35, %v1488_v7  ;;  %4019 = vmatprep.subr.mxu1 %v3249_v43  ;;  %v4215_v31 = vpop.eup %4214  ;;  %4234 = vpow2.f32 %v3674_v45  ;;  %v5738_v63 = vpop.permute.xlu1 %3027  ;;  %v2530_v34 = vrot.slane %v5611_v55, %v6477_v21  ;;  %2613 = vbcast.lane.b32.xlu1 %v2607_v54, 264 }
 0x25c   :  { %v3930_v49 = vpop.f32.mrf.mxu0  ;;  %3960 = vmatprep.mubr.msk.f32.mxu1 %vm203_vm0, %v1753_v4  ;;  %4020 = vmatpush3.msra.mxu1 %v3249_v43  ;;  %4236 = vrcp.f32 %v1663_v20  ;;  %v1756_v40 = vmul.f32 %v4215_v31, %v5609_v8  ;;  %v3077_v9 = vmul.f32 %v5627_v23, %v1753_v4  ;;  %v3115_v7 = vsel %vm203_vm0, %v3076_v59, 0.0 }
 0x25d   :  { %v4217_v37 = vpop.eup %4216  ;;  %v3676_v29 = vmul.f32 -1.442695, %v5718_v57  ;;  %3961 = vmatmul.mubr.msk.f32.gmra.mxu1 %vm203_vm0, %v1754_v33  ;;  %v5735_v32 = vadd.f32 %v3930_v49, %v5574_v35  ;;  %4238 = vpow2.f32 %v3677_v38  ;;  %v3108_v36 = vrot.slane %v3107_v5, 4 }
 0x25e   :  { %v1498_v18 = vpop.f32.mrf.mxu0  ;;  %v4219_v44 = vpop.eup %4218  ;;  %v5732_v61 = vmul.f32 %v4217_v37, %v5615_v10  ;;  %v3114_v10 = vsel %vm203_vm0, %v3075_v22, 0.0  ;;  %2532 = vbcast.lane.b32.xlu0 %v2530_v34, 256  ;;  %v3078_v31 = vmul.f32 %v5617_v60, %v1754_v33  ;;  %v2618_v37 = vrot.slane %v5621_v27, %v6477_v21 }
 0x25f   :  { %v1666_v26 = vadd.f32 1.0, %v4219_v44  ;;  %4240 = vpow2.f32 %v3676_v29  ;;  %v3679_v51 = vmul.f32 -1.442695, %v5735_v32  ;;  %v5748_v53 = vpop.permute.xlu0 %3023  ;;  %v3116_v49 = vadd.f32 %v3115_v7, %v3114_v10  ;;  %v5763_v60 = vpop.permute.xlu1 %2961  ;;  %2536 = vbcast.lane.b32.xlu1 %v2530_v34, 264 }
 0x260   :  { %v3933_v6 = vpop.f32.mrf.mxu0  ;;  %v4221_v0 = vpop.eup %4220  ;;  %3963 = vmatprep.mubr.msk.f32.mxu1 %vm203_vm0, %v5732_v61  ;;  %v5753_v23 = vadd.f32 %v5574_v35, %v1498_v18  ;;  %v5759_v16 = vrot.slane %v5611_v55, %v6478_v3  ;;  %v3123_v22 = vsel %vm203_vm0, %v3077_v9, 0.0  ;;  %v5765_v33 = vadd.f32 %v3108_v36, %v3107_v5 }
 0x261   :  { %3964 = vmatmul.mubr.msk.f32.gmra.mxu1 %vm203_vm0, %v1756_v40  ;;  %4242 = vrcp.f32 %v1666_v26  ;;  %v1665_v43 = vadd.f32 1.0, %v4221_v0  ;;  %v5770_v26 = vadd.f32 %v3933_v6, %v5574_v35  ;;  %v3117_v10 = vrot.slane %v3116_v49, 4 }
 0x262   :  { %v4223_v19 = vpop.eup %4222  ;;  %v1508_v41 = vpop.f32.mrf.mxu0  ;;  %4244 = vpow2.f32 %v3679_v51  ;;  %v3678_v59 = vmul.f32 -1.442695, %v5753_v23  ;;  %2620 = vbcast.lane.b32.xlu0 %v2618_v37, 256  ;;  %v3124_v21 = vsel %vm203_vm0, %v3078_v31, 0.0 }
 0x263   :  { %v4225_v8 = vpop.eup %4224  ;;  %4246 = vrcp.f32 %v1665_v43  ;;  %v1757_v44 = vmul.f32 %v4223_v19, %v5633_v62  ;;  %v5774_v62 = vadd.f32 %v5574_v35, %v1508_v41  ;;  %v2958_v54 = vpop.permute.xlu0 %2957  ;;  %v3080_v19 = vmul.f32 %v5667_v14, %v1756_v40  ;;  %2624 = vbcast.lane.b32.xlu1 %v2618_v37, 264 }
 0x264   :  { %v4227_v45 = vpop.eup %4226  ;;  %v3936_v20 = vpop.f32.mrf.mxu0  ;;  %v1668_v39 = vadd.f32 1.0, %v4225_v8  ;;  %v3079_v43 = vmul.f32 %v5673_v58, %v5732_v61  ;;  %v3681_v41 = vmul.f32 -1.442695, %v5770_v26  ;;  %v3110_v40 = vrot.slane %v5765_v33, 2 }
 0x265   :  { %v4229_v38 = vpop.eup %4228  ;;  %v1667_v29 = vadd.f32 1.0, %v4227_v45  ;;  %3966 = vmatprep.mubr.msk.f32.mxu1 %vm203_vm0, %v1757_v44  ;;  %v3680_v51 = vmul.f32 -1.442695, %v5774_v62  ;;  %v5788_v36 = vadd.f32 %v3936_v20, %v5574_v35  ;;  %v2629_v58 = vrot.slane %v5621_v27, %v6478_v3 }
 0x266   :  { %v1518_v4 = vpop.f32.mrf.mxu0  ;;  %v1758_v18 = vmul.f32 %v4229_v38, %v5625_v2  ;;  %v4231_v0 = vpop.eup %4230  ;;  %4248 = vrcp.f32 %v1668_v39  ;;  %v5777_v2 = vadd.f32 %v3124_v21, %v3123_v22  ;;  %2543 = vbcast.lane.b32.xlu0 %v5759_v16, 256  ;;  %v5794_v31 = vadd.f32 %v3117_v10, %v3116_v49 }
 0x267   :  { %v4233_v5 = vpop.eup %4232  ;;  %v1670_v6 = vadd.f32 1.0, %v4231_v0  ;;  %4250 = vpow2.f32 %v3678_v59  ;;  %v5790_v38 = vpop.permute.xlu1 %3038  ;;  %v3133_v39 = vsel %vm203_vm0, %v3080_v19, 0.0  ;;  %v3132_v59 = vsel %vm203_vm0, %v3079_v43, 0.0  ;;  %2547 = vbcast.lane.b32.xlu1 %v5759_v16, 264 }
 0x268   :  { %v3939_v55 = vpop.f32.mrf.mxu0  ;;  %3967 = vmatmul.mubr.msk.f32.gmra.mxu1 %vm203_vm0, %v1758_v18  ;;  %v4235_v9 = vpop.eup %4234  ;;  %4252 = vrcp.f32 %v1667_v29  ;;  %v3126_v29 = vrot.slane %v5777_v2, 4  ;;  %v3081_v27 = vmul.f32 %v5721_v46, %v1757_v44  ;;  %v3683_v49 = vmul.f32 -1.442695, %v5788_v36 }
 0x269   :  { %v4237_v45 = vpop.eup %4236  ;;  %4254 = vrcp.f32 %v1670_v6  ;;  %v1669_v7 = vadd.f32 1.0, %v4235_v9  ;;  %v5799_v20 = vpop.permute.xlu0 %3034  ;;  %v5804_v3 = vadd.f32 %v5574_v35, %v1518_v4  ;;  %v1760_v10 = vmul.f32 %v4233_v5, %v5639_v1 }
 0x26a   :  { %v1528_v8 = vpop.f32.mrf.mxu0  ;;  %v4239_v14 = vpop.eup %4238  ;;  %4256 = vpow2.f32 %v3681_v41  ;;  %2631 = vbcast.lane.b32.xlu0 %v2629_v58, 256  ;;  %v1759_v19 = vmul.f32 %v4237_v45, %v5647_v13  ;;  %v5809_v6 = vadd.f32 %v3939_v55, %v5574_v35  ;;  %v3082_v43 = vmul.f32 %v5713_v15, %v1758_v18 }
 0x26b   :  { %4258 = vrcp.f32 %v1669_v7  ;;  %v1672_v34 = vadd.f32 1.0, %v4239_v14  ;;  %v3682_v46 = vmul.f32 -1.442695, %v5804_v3  ;;  %v5814_v44 = vadd.f32 %v5574_v35, %v1528_v8  ;;  %v2973_v1 = vpop.permute.xlu1 %2972  ;;  %2635 = vbcast.lane.b32.xlu1 %v2629_v58, 264 }
 0x26c   :  { %v4241_v61 = vpop.eup %4240  ;;  %v3942_v22 = vpop.f32.mrf.mxu0  ;;  %4260 = vpow2.f32 %v3680_v51  ;;  %v3083_v41 = vmul.f32 %v2958_v54, %v1759_v19  ;;  %v3685_v51 = vmul.f32 -1.442695, %v5809_v6  ;;  %3969 = vmatprep.mubr.msk.f32.mxu1 %vm203_vm0, %v1759_v19  ;;  %v3134_v5 = vadd.f32 %v3133_v39, %v3132_v59 }
 0x26d   :  { %v1671_v0 = vadd.f32 1.0, %v4241_v61  ;;  %4262 = vrcp.f32 %v1672_v34  ;;  %v3684_v15 = vmul.f32 -1.442695, %v5814_v44  ;;  %v5821_v18 = vadd.f32 %v3942_v22, %v5574_v35  ;;  %3970 = vmatmul.mubr.msk.f32.gmra.mxu1 %vm203_vm0, %v1760_v10  ;;  %v2969_v45 = vpop.permute.xlu0 %2968 }
 0x26e   :  { %v4243_v21 = vpop.eup %4242  ;;  %v1538_v4 = vpop.f32.mrf.mxu0  ;;  %v3141_v54 = vsel %vm203_vm0, %v3081_v27, 0.0  ;;  %v3084_v8 = vmul.f32 %v5763_v60, %v1760_v10  ;;  %v3142_v14 = vsel %vm203_vm0, %v3082_v43, 0.0  ;;  %v3150_v61 = vsel %vm203_vm0, %v3083_v41, 0.0 }
 0x26f   :  { %4264 = vrcp.f32 %v1671_v0  ;;  %v4245_v9 = vpop.eup %4244  ;;  %v1762_v13 = vmul.f32 %v4243_v21, %v5659_v47  ;;  %v5828_v47 = vadd.f32 %v5574_v35, %v1538_v4  ;;  %v3687_v39 = vmul.f32 -1.442695, %v5821_v18  ;;  %v5836_v43 = vpop.permute.xlu1 %3049 }
 0x270   :  { %4266 = vpow2.f32 %v3683_v49  ;;  %v1674_v37 = vadd.f32 1.0, %v4245_v9  ;;  %v4247_v55 = vpop.eup %4246  ;;  %v3945_v34 = vpop.f32.mrf.mxu0  ;;  %v3135_v21 = vrot.slane %v3134_v5, 4  ;;  %v3143_v49 = vadd.f32 %v3142_v14, %v3141_v54 }
 0x271   :  { %4268 = vpow2.f32 %v3682_v46  ;;  %v3086_v16 = vmul.f32 %v2973_v1, %v1762_v13  ;;  %v3686_v59 = vmul.f32 -1.442695, %v5828_v47  ;;  %v1761_v60 = vmul.f32 %v4247_v55, %v5665_v25 }
 0x272   :  { %4270 = vrcp.f32 %v1674_v37  ;;  %v3151_v19 = vsel %vm203_vm0, %v3084_v8, 0.0  ;;  %v5839_v46 = vadd.f32 %v3945_v34, %v5574_v35  ;;  %v5845_v25 = vadd.f32 %v3110_v40, %v5765_v33 }
 0x273   :  { %v4249_v7 = vpop.eup %4248  ;;  %4272 = vpow2.f32 %v3685_v51  ;;  %v3085_v9 = vmul.f32 %v2969_v45, %v1761_v60  ;;  %3972 = vmatprep.mubr.msk.f32.mxu1 %vm203_vm0, %v1761_v60  ;;  %v3152_v58 = vadd.f32 %v3151_v19, %v3150_v61  ;;  %v3119_v41 = vrot.slane %v5794_v31, 2  ;;  %v1548_v60 = vpop.f32.mrf.mxu0 }
 0x274   :  { %v4251_v22 = vpop.eup %4250  ;;  %4274 = vpow2.f32 %v3684_v15  ;;  %3973 = vmatmul.mubr.msk.f32.gmra.mxu1 %vm203_vm0, %v1762_v13  ;;  %v3160_v1 = vsel %vm203_vm0, %v3086_v16, 0.0  ;;  %v5851_v15 = vpop.permute.xlu0 %3045  ;;  %v3127_v33 = vadd.f32 %v3126_v29, %v5777_v2  ;;  %v3136_v40 = vadd.f32 %v3135_v21, %v3134_v5 }
 0x275   :  { %v4253_v0 = vpop.eup %4252  ;;  %v1673_v27 = vadd.f32 1.0, %v4251_v22  ;;  %4276 = vpow2.f32 %v3687_v39  ;;  %v3159_v55 = vsel %vm203_vm0, %v3085_v9, 0.0  ;;  %v3144_v8 = vrot.slane %v3143_v49, 4 }
 0x276   :  { %v4255_v10 = vpop.eup %4254  ;;  %4278 = vpow2.f32 %v3686_v59  ;;  %v3161_v45 = vadd.f32 %v3160_v1, %v3159_v55  ;;  %v3689_v39 = vmul.f32 -1.442695, %v5839_v46  ;;  %v1763_v34 = vmul.f32 %v4253_v0, %v5681_v12 }
 0x277   :  { %v4257_v4 = vpop.eup %4256  ;;  %4280 = vrcp.f32 %v1673_v27  ;;  %v3153_v59 = vrot.slane %v3152_v58, 4  ;;  %v1764_v2 = vmul.f32 %v4249_v7, %v5671_v17  ;;  %v5864_v5 = vadd.f32 %v3119_v41, %v5794_v31  ;;  %v2984_v27 = vpop.permute.xlu1 %2983 }
 0x278   :  { %v4259_v37 = vpop.eup %4258  ;;  %v1676_v51 = vadd.f32 1.0, %v4257_v4  ;;  %v3162_v21 = vrot.slane %v3161_v45, 4  ;;  %3975 = vmatprep.mubr.msk.f32.mxu1 %vm203_vm0, %v1763_v34  ;;  %v3128_v12 = vrot.slane %v3127_v33, 2  ;;  %v3137_v0 = vrot.slane %v3136_v40, 2 }
 0x279   :  { %v4261_v54 = vpop.eup %4260  ;;  %v5857_v13 = vmul.f32 %v4259_v37, %v5700_v28  ;;  %3976 = vmatmul.mubr.msk.f32.gmra.mxu1 %vm203_vm0, %v1764_v2  ;;  %v3145_v7 = vadd.f32 %v3144_v8, %v3143_v49  ;;  %v5872_v31 = vadd.f32 %v5574_v35, %v1548_v60  ;;  %v1766_v37 = vmul.f32 %v4255_v10, %v5686_v24 }
 0x27a   :  { %v4263_v14 = vpop.eup %4262  ;;  %v1675_v61 = vadd.f32 1.0, %v4261_v54  ;;  %4282 = vrcp.f32 %v1676_v51  ;;  %v3088_v51 = vmul.f32 %v2984_v27, %v1764_v2  ;;  %v3163_v49 = vadd.f32 %v3162_v21, %v3161_v45 }
 0x27b   :  { %v1768_v16 = vmul.f32 %v4263_v14, %v5707_v52  ;;  %3978 = vmatprep.mubr.msk.f32.mxu1 %vm203_vm0, %v5857_v13  ;;  %v3129_v24 = vadd.f32 %v3128_v12, %v3127_v33  ;;  %v3146_v10 = vrot.slane %v3145_v7, 2 }
 0x27c   :  { %v4265_v22 = vpop.eup %4264  ;;  %4284 = vrcp.f32 %v1675_v61  ;;  %v3164_v27 = vrot.slane %v3163_v49, 2  ;;  %v3169_v12 = vsel %vm203_vm0, %v3088_v51, 0.0 }
 0x27d   :  { %v4267_v29 = vpop.eup %4266  ;;  %v1767_v28 = vmul.f32 %v4265_v22, %v5718_v57  ;;  %v3092_v52 = vmul.f32 %v5652_v50, %v1768_v16  ;;  %4286 = vpow2.f32 %v3689_v39  ;;  %v2980_v57 = vpop.permute.xlu0 %2979  ;;  %v3154_v50 = vadd.f32 %v3153_v59, %v3152_v58  ;;  %3979 = vmatmul.mubr.msk.f32.gmra.mxu1 %vm203_vm0, %v1766_v37 }
 0x27e   :  { %v1678_v19 = vadd.f32 1.0, %v4267_v29  ;;  %v4269_v9 = vpop.eup %4268  ;;  %v3087_v14 = vmul.f32 %v2980_v57, %v1763_v34  ;;  %v3688_v39 = vmul.f32 -1.442695, %v5872_v31  ;;  %v3121_v29 = vrot.slane %v5864_v5, 1 }
 0x27f   :  { %v3091_v17 = vmul.f32 %v5656_v11, %v1767_v28  ;;  %v4271_v4 = vpop.eup %4270  ;;  %v1677_v41 = vadd.f32 1.0, %v4269_v9  ;;  %v3187_v55 = vsel %vm203_vm0, %v3092_v52, 0.0  ;;  %3981 = vmatprep.mubr.msk.f32.mxu1 %vm203_vm0, %v1767_v28  ;;  %v3155_v59 = vrot.slane %v3154_v50, 2 }
 0x280   :  { %v4273_v1 = vpop.eup %4272  ;;  %4288 = vrcp.f32 %v1678_v19  ;;  %v3168_v60 = vsel %vm203_vm0, %v3087_v14, 0.0  ;;  %v3138_v34 = vadd.f32 %v3137_v0, %v3136_v40  ;;  %v3130_v28 = vrot.slane %v3129_v24, 1 }
 0x281   :  { %v3186_v11 = vsel %vm203_vm0, %v3091_v17, 0.0  ;;  %v4275_v54 = vpop.eup %4274  ;;  %4290 = vrcp.f32 %v1677_v41  ;;  %v1680_v8 = vadd.f32 1.0, %v4273_v1  ;;  %3982 = vmatmul.mubr.msk.f32.gmra.mxu1 %vm203_vm0, %v1768_v16  ;;  %v3147_v52 = vadd.f32 %v3146_v10, %v3145_v7 }
 0x282   :  { %v5879_v35 = vadd.f32 %v3187_v55, %v3186_v11  ;;  %v4277_v61 = vpop.eup %4276  ;;  %v1679_v58 = vadd.f32 1.0, %v4275_v54  ;;  %v3170_v19 = vadd.f32 %v3169_v12, %v3168_v60  ;;  %v3112_v9 = vrot.slane %v5845_v25, 1 }
 0x283   :  { %v4279_v22 = vpop.eup %4278  ;;  %4292 = vrcp.f32 %v1680_v8  ;;  %v1682_v45 = vadd.f32 1.0, %v4277_v61  ;;  %v1770_v17 = vmul.f32 %v4271_v4, %v5735_v32  ;;  %v3156_v57 = vadd.f32 %v3155_v59, %v3154_v50 }
 0x284   :  { %v4281_v2 = vpop.eup %4280  ;;  %4294 = vrcp.f32 %v1679_v58  ;;  %v1681_v21 = vadd.f32 1.0, %v4279_v22  ;;  %v3171_v0 = vrot.slane %v3170_v19, 4  ;;  %v3122_v51 = vadd.f32 %v3121_v29, %v5864_v5 }
 0x285   :  { %v1769_v33 = vmul.f32 %v4281_v2, %v5753_v23  ;;  %4296 = vrcp.f32 %v1682_v45  ;;  %v3139_v23 = vrot.slane %v3138_v34, 1  ;;  %v3165_v16 = vadd.f32 %v3164_v27, %v3163_v49 }
 0x286   :  { %4298 = vpow2.f32 %v3688_v39  ;;  %v3131_v7 = vadd.f32 %v3130_v28, %v3129_v24  ;;  %v3090_v32 = vmul.f32 %v5641_v30, %v1766_v37  ;;  %v3148_v4 = vrot.slane %v3147_v52, 1 }
 0x287   :  { %3984 = vmatprep.mubr.msk.f32.mxu1 %vm203_vm0, %v1769_v33  ;;  %v4283_v40 = vpop.eup %4282  ;;  %4300 = vrcp.f32 %v1681_v21  ;;  %v3113_v55 = vadd.f32 %v3112_v9, %v5845_v25  ;;  %v3157_v54 = vrot.slane %v3156_v57, 1  ;;  %v3172_v8 = vadd.f32 %v3171_v0, %v3170_v19 }
 0x288   :  { %3985 = vmatmul.mubr.msk.f32.gmra.mxu1 %vm203_vm0, %v1770_v17  ;;  %v1772_v11 = vmul.f32 %v4283_v40, %v5770_v26  ;;  %v3140_v14 = vadd.f32 %v3139_v23, %v3138_v34  ;;  %v3166_v30 = vrot.slane %v3165_v16, 1  ;;  %v3178_v26 = vsel %vm203_vm0, %v3090_v32, 0.0  ;;  %v3061_v23 = vpop.permute.xlu1 %3060 }
 0x289   :  { %v4285_v41 = vpop.eup %4284  ;;  %v3273_v49 = vsel %vm2872_vm2, %v3122_v51, %v3113_v55  ;;  %v3173_v61 = vrot.slane %v3172_v8, 2  ;;  %v3149_v24 = vadd.f32 %v3148_v4, %v3147_v52  ;;  %v3089_v10 = vmul.f32 %v5649_v48, %v5857_v13 }
 0x28a   :  { %v1771_v50 = vmul.f32 %v4285_v41, %v5774_v62  ;;  %v4287_v1 = vpop.eup %4286  ;;  %v3274_v25 = vsel %vm2874_vm3, %v3131_v7, %v3273_v49  ;;  %v3093_v58 = vmul.f32 %v5695_v42, %v1769_v33  ;;  %v3158_v39 = vadd.f32 %v3157_v54, %v3156_v57 }
 0x28b   :  { %v1684_v37 = vadd.f32 1.0, %v4287_v1  ;;  %v3094_v45 = vmul.f32 %v5688_v56, %v1770_v17  ;;  %v3174_v2 = vadd.f32 %v3173_v61, %v3172_v8  ;;  %v3275_v29 = vsel %vm2876_vm4, %v3140_v14, %v3274_v25 }
 0x28c   :  { %3987 = vmatprep.mubr.msk.f32.mxu1 %vm203_vm0, %v1771_v50  ;;  %v3095_v21 = vmul.f32 %v5748_v53, %v1771_v50  ;;  %v3167_v27 = vadd.f32 %v3166_v30, %v3165_v16  ;;  %v3177_v13 = vsel %vm203_vm0, %v3089_v10, 0.0  ;;  %v3195_v53 = vsel %vm203_vm0, %v3093_v58, 0.0 }
 0x28d   :  { %v4289_v5 = vpop.eup %4288  ;;  %3988 = vmatmul.mubr.msk.f32.gmra.mxu1 %vm203_vm0, %v1772_v11  ;;  %4302 = vrcp.f32 %v1684_v37  ;;  %v3175_v56 = vrot.slane %v3174_v2, 1  ;;  %v3096_v33 = vmul.f32 %v5738_v63, %v1772_v11  ;;  %v3179_v0 = vadd.f32 %v3178_v26, %v3177_v13 }
 0x28e   :  { %v4291_v62 = vpop.eup %4290  ;;  %v1774_v60 = vmul.f32 %v4289_v5, %v5788_v36  ;;  %v3276_v36 = vsel %vm2878_vm5, %v3149_v24, %v3275_v29  ;;  %v3204_v17 = vsel %vm203_vm0, %v3095_v21, 0.0  ;;  %v3196_v41 = vsel %vm203_vm0, %v3094_v45, 0.0 }
 0x28f   :  { %v1773_v22 = vmul.f32 %v4291_v62, %v5804_v3  ;;  %v3176_v19 = vadd.f32 %v3175_v56, %v3174_v2  ;;  %v3197_v51 = vadd.f32 %v3196_v41, %v3195_v53  ;;  %v3189_v11 = vrot.slane %v5879_v35, 4  ;;  %v3072_v2 = vpop.permute.xlu1 %3071 }
 0x290   :  { %v4293_v59 = vpop.eup %4292  ;;  %v3098_v52 = vmul.f32 %v5790_v38, %v1774_v60  ;;  %v3180_v5 = vrot.slane %v3179_v0, 4 }
 0x291   :  { %v4295_v34 = vpop.eup %4294  ;;  %v1776_v12 = vmul.f32 %v4293_v59, %v5809_v6  ;;  %3990 = vmatprep.mubr.msk.f32.mxu1 %vm203_vm0, %v1773_v22  ;;  %v3097_v42 = vmul.f32 %v5799_v20, %v1773_v22  ;;  %v3277_v6 = vsel %vm2880_vm6, %v3158_v39, %v3276_v36  ;;  %v3198_v14 = vrot.slane %v3197_v51, 4 }
 0x292   :  { %v4297_v48 = vpop.eup %4296  ;;  %v1775_v3 = vmul.f32 %v4295_v34, %v5814_v44  ;;  %3991 = vmatmul.mubr.msk.f32.gmra.mxu1 %vm203_vm0, %v1774_v60  ;;  %v3278_v63 = vsel %vm2882_vm7, %v3167_v27, %v3277_v6  ;;  %v3214_v32 = vsel %vm203_vm0, %v3098_v52, 0.0  ;;  %v3190_v25 = vadd.f32 %v3189_v11, %v5879_v35 }
 0x293   :  { %v4299_v28 = vpop.eup %4298  ;;  %v1778_v44 = vmul.f32 %v4297_v48, %v5821_v18  ;;  %v3100_v57 = vmul.f32 %v5836_v43, %v1776_v12  ;;  %v3213_v38 = vsel %vm203_vm0, %v3097_v42, 0.0  ;;  %v3205_v18 = vsel %vm203_vm0, %v3096_v33, 0.0  ;;  %v3057_v43 = vpop.permute.xlu0 %3056 }
 0x294   :  { %v3099_v20 = vmul.f32 %v5851_v15, %v1775_v3  ;;  %3993 = vmatprep.mubr.msk.f32.mxu1 %vm203_vm0, %v1775_v3  ;;  %v4301_v9 = vpop.eup %4300  ;;  %v1683_v40 = vadd.f32 1.0, %v4299_v28  ;;  %v3279_v15 = vsel %vm2884_vm8, %v3176_v19, %v3278_v63  ;;  %v3206_v7 = vadd.f32 %v3205_v18, %v3204_v17  ;;  %v4442_v19 = vld [vmem:[#allocation2] sm:$0xff] }
 0x295   :  { %4010 = vmatprep.mubr.msk.f32.mxu0 %vm203_vm0, %v3279_v15  ;;  %v3102_v4 = vmul.f32 %v3061_v23, %v1778_v44  ;;  %v1777_v50 = vmul.f32 %v4301_v9, %v5828_v47  ;;  %v3215_v1 = vadd.f32 %v3214_v32, %v3213_v38  ;;  %v3223_v55 = vsel %vm203_vm0, %v3100_v57, 0.0 }
 0x296   :  { %3994 = vmatmul.mubr.msk.f32.gmra.mxu1 %vm203_vm0, %v1776_v12  ;;  %4304 = vrcp.f32 %v1683_v40  ;;  %v3222_v16 = vsel %vm203_vm0, %v3099_v20, 0.0  ;;  %v3207_v49 = vrot.slane %v3206_v7, 4  ;;  %v3199_v24 = vadd.f32 %v3198_v14, %v3197_v51 }
 0x297   :  { %v3224_v54 = vadd.f32 %v3223_v55, %v3222_v16  ;;  %v3101_v8 = vmul.f32 %v3057_v43, %v1777_v50  ;;  %3996 = vmatprep.mubr.msk.f32.mxu1 %vm203_vm0, %v1777_v50  ;;  %v3232_v30 = vsel %vm203_vm0, %v3102_v4, 0.0  ;;  %v3216_v61 = vrot.slane %v3215_v1, 4  ;;  %v3068_v48 = vpop.permute.xlu0 %3067 }
 0x298   :  { %v3181_v58 = vadd.f32 %v3180_v5, %v3179_v0  ;;  %v3208_v39 = vadd.f32 %v3207_v49, %v3206_v7  ;;  %v3191_v45 = vrot.slane %v3190_v25, 2  ;;  %v3200_v29 = vrot.slane %v3199_v24, 2  ;;  %v4443_v0 = vld [vmem:[#allocation2 + $0x8] sm:$0xff] }
 0x299   :  { %v3231_v37 = vsel %vm203_vm0, %v3101_v8, 0.0  ;;  %v3225_v26 = vrot.slane %v3224_v54, 4  ;;  %v3217_v22 = vadd.f32 %v3216_v61, %v3215_v1  ;;  %v4444_v61 = vld [vmem:[#allocation7] sm:$0xff] }
 0x29a   :  { %3997 = vmatmul.mubr.msk.f32.gmra.mxu1 %vm203_vm0, %v1778_v44  ;;  %v3233_v47 = vadd.f32 %v3232_v30, %v3231_v37  ;;  %v4303_v62 = vpop.eup %4302  ;;  %v3182_v27 = vrot.slane %v3181_v58, 2  ;;  %v3209_v12 = vrot.slane %v3208_v39, 2  ;;  %v3192_v56 = vadd.f32 %v3191_v45, %v3190_v25 }
 0x29b   :  { %v1780_v59 = vmul.f32 %v4303_v62, %v5839_v46  ;;  %v3226_v60 = vadd.f32 %v3225_v26, %v3224_v54  ;;  %v3218_v42 = vrot.slane %v3217_v22, 2  ;;  %v3201_v13 = vadd.f32 %v3200_v29, %v3199_v24  ;;  %v5964_v26 = vld [vmem:[%s6381_s11] ss:$0 sm:$0xff] }
 0x29c   :  { %v3234_v10 = vrot.slane %v3233_v47, 4  ;;  %v3183_v46 = vadd.f32 %v3182_v27, %v3181_v58  ;;  %v3210_v6 = vadd.f32 %v3209_v12, %v3208_v39 }
 0x29d   :  { %v3104_v3 = vmul.f32 %v3072_v2, %v1780_v59  ;;  %v3227_v36 = vrot.slane %v3226_v60, 2  ;;  %v3219_v28 = vadd.f32 %v3218_v42, %v3217_v22  ;;  %v3202_v17 = vrot.slane %v3201_v13, 1 }
 0x29e   :  { %v3235_v34 = vadd.f32 %v3234_v10, %v3233_v47  ;;  %v3184_v40 = vrot.slane %v3183_v46, 1  ;;  %v3211_v63 = vrot.slane %v3210_v6, 1  ;;  %v6479_v47 = vld [vmem:[#allocation59_spill] sm:$0xff] }
 0x29f   :  { %v3241_v52 = vsel %vm203_vm0, %v3104_v3, 0.0  ;;  %v3228_v44 = vadd.f32 %v3227_v36, %v3226_v60  ;;  %v3220_v41 = vrot.slane %v3219_v28, 1  ;;  %v3203_v18 = vadd.f32 %v3202_v17, %v3201_v13  ;;  %v3467_v13 = vld [vmem:[#allocation16 + $0x18] sm:$0xff] }
 0x2a0   :  { %v3236_v53 = vrot.slane %v3235_v34, 2  ;;  %v3185_v43 = vadd.f32 %v3184_v40, %v3183_v46  ;;  %v3212_v7 = vadd.f32 %v3211_v63, %v3210_v6  ;;  %v2552_v62 = vrot.slane %v4444_v61, %v6479_v47  ;;  %4024 = vmatprep.subr.mxu0 %v3467_v13 }
 0x2a1   :  { %v3229_v15 = vrot.slane %v3228_v44, 1  ;;  %v3221_v4 = vadd.f32 %v3220_v41, %v3219_v28  ;;  %v3465_v28 = vld [vmem:[#allocation16 + $0x8] sm:$0xff] }
 0x2a2   :  { %v3237_v57 = vadd.f32 %v3236_v53, %v3235_v34  ;;  %2558 = vbcast.lane.b32.xlu1 %v2552_v62, 264  ;;  %2554 = vbcast.lane.b32.xlu0 %v2552_v62, 256  ;;  %v3466_v53 = vld [vmem:[#allocation16 + $0x10] sm:$0xff] }
 0x2a3   :  { %v4305_v21 = vpop.eup %4304  ;;  %v3230_v1 = vadd.f32 %v3229_v15, %v3228_v44 }
 0x2a4   :  { %v1779_v35 = vmul.f32 %v4305_v21, %v5872_v31  ;;  %v3193_v31 = vrot.slane %v3192_v56, 1  ;;  %v3238_v16 = vrot.slane %v3237_v57, 1 }
 0x2a6   :  { %v3103_v33 = vmul.f32 %v3068_v48, %v1779_v35  ;;  %3999 = vmatprep.mubr.msk.f32.mxu1 %vm203_vm0, %v1779_v35  ;;  %v3194_v38 = vadd.f32 %v3193_v31, %v3192_v56  ;;  %v3239_v54 = vadd.f32 %v3238_v16, %v3237_v57 }
 0x2a7   :  { %4000 = vmatmul.mubr.msk.f32.gmra.mxu1 %vm203_vm0, %v1780_v59 }
 0x2a8   :  { %v3240_v20 = vsel %vm203_vm0, %v3103_v33, 0.0  ;;  %4021 = vmatprep.mubr.msk.f32.mxu1 %vm203_vm0, %v4442_v19  ;;  %v3280_v50 = vsel %vm2872_vm2, %v3194_v38, %v3185_v43  ;;  %v3464_v19 = vld [vmem:[#allocation16] sm:$0xff] }
 0x2a9   :  { %v3242_v9 = vadd.f32 %v3241_v52, %v3240_v20  ;;  %v3281_v11 = vsel %vm2874_vm3, %v3203_v18, %v3280_v50 }
 0x2aa   :  { %v3282_v8 = vsel %vm2876_vm4, %v3212_v7, %v3281_v11 }
 0x2ab   :  { %v3243_v23 = vrot.slane %v3242_v9, 4  ;;  %4022 = vmatmul.mubr.msk.f32.vlgmr.msra.gmra.mxu1 %vm203_vm0, %v4443_v0  ;;  %v3283_v5 = vsel %vm2878_vm5, %v3221_v4, %v3282_v8 }
 0x2ac   :  { %v3284_v30 = vsel %vm2880_vm6, %v3230_v1, %v3283_v5 }
 0x2ad   :  { %v3244_v51 = vadd.f32 %v3243_v23, %v3242_v9  ;;  %v3285_v37 = vsel %vm2882_vm7, %v3239_v54, %v3284_v30 }
 0x2af   :  { %v3245_v32 = vrot.slane %v3244_v51, 2 }
 0x2b1   :  { %v3246_v55 = vadd.f32 %v3245_v32, %v3244_v51 }
 0x2b3   :  { %v3247_v14 = vrot.slane %v3246_v55, 1 }
 0x2b5   :  { %v3248_v49 = vadd.f32 %v3247_v14, %v3246_v55 }
 0x2b7   :  { %v3286_v25 = vsel %vm2884_vm8, %v3248_v49, %v3285_v37  ;;  %v6016_v49 = vld [vmem:[%s6382_s12] ss:$0 sm:$0xff] }
 0x2b8   :  { %4011 = vmatmul.mubr.msk.f32.vlgmr.msra.gmra.mxu0 %vm203_vm0, %v3286_v25 }
 0x2b9   :  { %4025 = vmatpush3.msra.mxu0 %v3467_v13 }
 0x2ba   :  { %4026 = vmatprep.subr.mxu0 %v3466_v53 }
 0x2bb   :  { %4027 = vmatpush3.msra.mxu0 %v3466_v53 }
 0x2bc   :  { %4028 = vmatprep.subr.mxu0 %v3465_v28 }
 0x2bd   :  { %4029 = vmatpush3.msra.mxu0 %v3465_v28 }
 0x2be   :  { %4030 = vmatprep.subr.mxu0 %v3464_v19 }
 0x2bf   :  { %4031 = vmatpush3.msra.mxu0 %v3464_v19 }
 0x315   :  { %v3956_v24 = vpop.f32.mrf.mxu1 }
 0x316   :  { %v5967_v10 = vadd.f32 %v3956_v24, %v5964_v26 }
 0x317   :  { %v1954_v58 = vpop.f32.mrf.mxu1 }
 0x318   :  { %v3724_v39 = vmul.f32 -1.442695, %v5967_v10  ;;  %v5971_v22 = vadd.f32 %v5964_v26, %v1954_v58 }
 0x319   :  { %v3959_v45 = vpop.f32.mrf.mxu1 }
 0x31a   :  { %4306 = vpow2.f32 %v3724_v39  ;;  %v3723_v59 = vmul.f32 -1.442695, %v5971_v22  ;;  %v5975_v60 = vadd.f32 %v3959_v45, %v5964_v26 }
 0x31b   :  { %v1964_v2 = vpop.f32.mrf.mxu1 }
 0x31c   :  { %4308 = vpow2.f32 %v3723_v59  ;;  %v3726_v29 = vmul.f32 -1.442695, %v5975_v60  ;;  %v5979_v34 = vadd.f32 %v5964_v26, %v1964_v2 }
 0x31d   :  { %v3962_v21 = vpop.f32.mrf.mxu1 }
 0x31e   :  { %4310 = vpow2.f32 %v3726_v29  ;;  %v3725_v27 = vmul.f32 -1.442695, %v5979_v34  ;;  %v5983_v12 = vadd.f32 %v3962_v21, %v5964_v26 }
 0x31f   :  { %v1974_v48 = vpop.f32.mrf.mxu1 }
 0x320   :  { %4312 = vpow2.f32 %v3725_v27  ;;  %v3728_v42 = vmul.f32 -1.442695, %v5983_v12  ;;  %v5987_v3 = vadd.f32 %v5964_v26, %v1974_v48 }
 0x321   :  { %v3965_v35 = vpop.f32.mrf.mxu1 }
 0x322   :  { %4314 = vpow2.f32 %v3728_v42  ;;  %v3727_v56 = vmul.f32 -1.442695, %v5987_v3  ;;  %v5991_v36 = vadd.f32 %v3965_v35, %v5964_v26 }
 0x323   :  { %v1984_v33 = vpop.f32.mrf.mxu1 }
 0x324   :  { %4316 = vpow2.f32 %v3727_v56  ;;  %v3730_v46 = vmul.f32 -1.442695, %v5991_v36  ;;  %v5995_v6 = vadd.f32 %v5964_v26, %v1984_v33 }
 0x326   :  { %4318 = vpow2.f32 %v3730_v46  ;;  %v3729_v20 = vmul.f32 -1.442695, %v5995_v6 }
 0x327   :  { %v4307_v52 = vpop.eup %4306 }
 0x328   :  { %v2210_v31 = vadd.f32 1.0, %v4307_v52  ;;  %4320 = vpow2.f32 %v3729_v20  ;;  %v3968_v17 = vpop.f32.mrf.mxu1 }
 0x329   :  { %v4309_v44 = vpop.eup %4308  ;;  %v5999_v57 = vadd.f32 %v3968_v17, %v5964_v26 }
 0x32a   :  { %4322 = vrcp.f32 %v2210_v31  ;;  %v2209_v9 = vadd.f32 1.0, %v4309_v44  ;;  %v1994_v63 = vpop.f32.mrf.mxu1 }
 0x32b   :  { %v4311_v40 = vpop.eup %4310  ;;  %v3732_v0 = vmul.f32 -1.442695, %v5999_v57  ;;  %v6003_v41 = vadd.f32 %v5964_v26, %v1994_v63 }
 0x32c   :  { %4324 = vrcp.f32 %v2209_v9  ;;  %v2212_v23 = vadd.f32 1.0, %v4311_v40 }
 0x32d   :  { %v4313_v38 = vpop.eup %4312  ;;  %v3731_v51 = vmul.f32 -1.442695, %v6003_v41  ;;  %v3971_v4 = vpop.f32.mrf.mxu1 }
 0x32e   :  { %4326 = vrcp.f32 %v2212_v23  ;;  %v2211_v15 = vadd.f32 1.0, %v4313_v38  ;;  %v6007_v1 = vadd.f32 %v3971_v4, %v5964_v26 }
 0x32f   :  { %v4315_v18 = vpop.eup %4314  ;;  %4328 = vpow2.f32 %v3732_v0  ;;  %v2004_v11 = vpop.f32.mrf.mxu1 }
 0x330   :  { %4330 = vrcp.f32 %v2211_v15  ;;  %v2214_v16 = vadd.f32 1.0, %v4315_v18  ;;  %v3734_v14 = vmul.f32 -1.442695, %v6007_v1  ;;  %v6011_v5 = vadd.f32 %v5964_v26, %v2004_v11 }
 0x331   :  { %v4317_v43 = vpop.eup %4316  ;;  %4332 = vpow2.f32 %v3731_v51 }
 0x332   :  { %4334 = vrcp.f32 %v2214_v16  ;;  %v2213_v7 = vadd.f32 1.0, %v4317_v43  ;;  %v3733_v61 = vmul.f32 -1.442695, %v6011_v5 }
 0x333   :  { %v4319_v32 = vpop.eup %4318 }
 0x334   :  { %4336 = vrcp.f32 %v2213_v7  ;;  %v2216_v50 = vadd.f32 1.0, %v4319_v32  ;;  %v3974_v25 = vpop.f32.mrf.mxu1 }
 0x335   :  { %v4321_v55 = vpop.eup %4320  ;;  %v6023_v58 = vadd.f32 %v3974_v25, %v5964_v26 }
 0x336   :  { %4338 = vrcp.f32 %v2216_v50  ;;  %v2215_v8 = vadd.f32 1.0, %v4321_v55  ;;  %v2014_v59 = vpop.f32.mrf.mxu1 }
 0x337   :  { %v4323_v54 = vpop.eup %4322  ;;  %v3736_v21 = vmul.f32 -1.442695, %v6023_v58 }
 0x338   :  { %v2306_v30 = vmul.f32 %v4323_v54, %v5967_v10  ;;  %4340 = vrcp.f32 %v2215_v8 }
 0x339   :  { %v4325_v37 = vpop.eup %4324  ;;  %4342 = vpow2.f32 %v3734_v14  ;;  %v3977_v46 = vpop.f32.mrf.mxu1 }
 0x33a   :  { %v2305_v62 = vmul.f32 %v4325_v37, %v5971_v22  ;;  %v2345_v24 = vmul.f32 %v6016_v49, %v2306_v30  ;;  %4344 = vpow2.f32 %v3733_v61  ;;  %v6030_v22 = vadd.f32 %v5964_v26, %v2014_v59 }
 0x33b   :  { %v4327_v39 = vpop.eup %4326  ;;  %4346 = vpow2.f32 %v3736_v21  ;;  %v6038_v52 = vadd.f32 %v3977_v46, %v5964_v26  ;;  %v2024_v19 = vpop.f32.mrf.mxu1 }
 0x33c   :  { %v2379_v45 = vsel %vm203_vm0, %v2345_v24, 0.0  ;;  %v2344_v10 = vmul.f32 %v6016_v49, %v2305_v62  ;;  %v4329_v2 = vpop.eup %4328  ;;  %v2308_v29 = vmul.f32 %v4327_v39, %v5975_v60  ;;  %v3735_v13 = vmul.f32 -1.442695, %v6030_v22 }
 0x33d   :  { %2380 = vadd.xlane.f32.xlu1 %v2379_v45  ;;  %v4331_v27 = vpop.eup %4330  ;;  %v2218_v48 = vadd.f32 1.0, %v4329_v2  ;;  %v3738_v9 = vmul.f32 -1.442695, %v6038_v52  ;;  %v6045_v17 = vadd.f32 %v5964_v26, %v2024_v19  ;;  %v3980_v63 = vpop.f32.mrf.mxu1 }
 0x33e   :  { %v2376_v42 = vsel %vm203_vm0, %v2344_v10, 0.0  ;;  %v4333_v35 = vpop.eup %4332  ;;  %v2307_v56 = vmul.f32 %v4331_v27, %v5979_v34  ;;  %v2347_v53 = vmul.f32 %v6016_v49, %v2308_v29  ;;  %v6051_v38 = vadd.f32 %v3980_v63, %v5964_v26 }
 0x33f   :  { %2377 = vadd.xlane.f32.xlu0 %v2376_v42  ;;  %v4335_v60 = vpop.eup %4334  ;;  %4348 = vrcp.f32 %v2218_v48  ;;  %v2217_v33 = vadd.f32 1.0, %v4333_v35  ;;  %v3737_v0 = vmul.f32 -1.442695, %v6045_v17 }
 0x340   :  { %v2310_v28 = vmul.f32 %v4335_v60, %v5983_v12  ;;  %4350 = vpow2.f32 %v3735_v13  ;;  %v2385_v34 = vsel %vm203_vm0, %v2347_v53, 0.0  ;;  %v2346_v31 = vmul.f32 %v6016_v49, %v2307_v56 }
 0x341   :  { %v4337_v20 = vpop.eup %4336  ;;  %4352 = vrcp.f32 %v2217_v33 }
 0x342   :  { %v2309_v44 = vmul.f32 %v4337_v20, %v5987_v3  ;;  %v2349_v12 = vmul.f32 %v6016_v49, %v2310_v28  ;;  %4354 = vpow2.f32 %v3738_v9  ;;  %v2034_v3 = vpop.f32.mrf.mxu1  ;;  %v2382_v18 = vsel %vm203_vm0, %v2346_v31, 0.0 }
 0x343   :  { %2386 = vadd.xlane.f32.xlu0 %v2385_v34  ;;  %v4339_v40 = vpop.eup %4338  ;;  %4356 = vpow2.f32 %v3737_v0  ;;  %v6059_v32 = vadd.f32 %v5964_v26, %v2034_v3 }
 0x344   :  { %v2312_v23 = vmul.f32 %v4339_v40, %v5991_v36  ;;  %v2391_v51 = vsel %vm203_vm0, %v2349_v12, 0.0  ;;  %v2348_v16 = vmul.f32 %v6016_v49, %v2309_v44  ;;  %v3740_v36 = vmul.f32 -1.442695, %v6051_v38  ;;  %v3983_v55 = vpop.f32.mrf.mxu1 }
 0x345   :  { %v4341_v15 = vpop.eup %4340  ;;  %2392 = vadd.xlane.f32.xlu1 %v2391_v51  ;;  %v3739_v8 = vmul.f32 -1.442695, %v6059_v32  ;;  %v6064_v14 = vadd.f32 %v3983_v55, %v5964_v26 }
 0x346   :  { %v4343_v43 = vpop.eup %4342  ;;  %v2311_v7 = vmul.f32 %v4341_v15, %v5995_v6  ;;  %v2351_v11 = vmul.f32 %v6016_v49, %v2312_v23  ;;  %4358 = vpow2.f32 %v3740_v36  ;;  %v2044_v6 = vpop.f32.mrf.mxu1  ;;  %v2388_v37 = vsel %vm203_vm0, %v2348_v16, 0.0 }
 0x347   :  { %2383 = vadd.xlane.f32.xlu0 %v2382_v18  ;;  %v4345_v4 = vpop.eup %4344  ;;  %v2220_v50 = vadd.f32 1.0, %v4343_v43  ;;  %v3742_v62 = vmul.f32 -1.442695, %v6064_v14  ;;  %v6071_v25 = vadd.f32 %v5964_v26, %v2044_v6 }
 0x348   :  { %v2219_v54 = vadd.f32 1.0, %v4345_v4  ;;  %v2397_v30 = vsel %vm203_vm0, %v2351_v11, 0.0  ;;  %v2350_v61 = vmul.f32 %v6016_v49, %v2311_v7  ;;  %v4347_v24 = vpop.eup %4346  ;;  %v3986_v39 = vpop.f32.mrf.mxu1 }
 0x349   :  { %4360 = vrcp.f32 %v2220_v50  ;;  %2398 = vadd.xlane.f32.xlu1 %v2397_v30  ;;  %v2222_v45 = vadd.f32 1.0, %v4347_v24  ;;  %v3741_v10 = vmul.f32 -1.442695, %v6071_v25  ;;  %v6075_v2 = vadd.f32 %v3986_v39, %v5964_v26 }
 0x34a   :  { %4362 = vrcp.f32 %v2219_v54  ;;  %v2054_v27 = vpop.f32.mrf.mxu1  ;;  %v2394_v48 = vsel %vm203_vm0, %v2350_v61, 0.0 }
 0x34b   :  { %2389 = vadd.xlane.f32.xlu0 %v2388_v37  ;;  %4364 = vpow2.f32 %v3739_v8  ;;  %v3744_v56 = vmul.f32 -1.442695, %v6075_v2  ;;  %v6081_v13 = vadd.f32 %v5964_v26, %v2054_v27 }
 0x34c   :  { %v4349_v59 = vpop.eup %4348  ;;  %4366 = vpow2.f32 %v3742_v62 }
 0x34d   :  { %v4351_v29 = vpop.eup %4350  ;;  %v2314_v21 = vmul.f32 %v4349_v59, %v5999_v57  ;;  %4368 = vrcp.f32 %v2222_v45  ;;  %v3989_v60 = vpop.f32.mrf.mxu1  ;;  %v3743_v57 = vmul.f32 -1.442695, %v6081_v13 }
 0x34e   :  { %v4353_v42 = vpop.eup %4352  ;;  %v2221_v35 = vadd.f32 1.0, %v4351_v29  ;;  %4370 = vpow2.f32 %v3741_v10  ;;  %v6087_v46 = vadd.f32 %v3989_v60, %v5964_v26 }
 0x34f   :  { %2395 = vadd.xlane.f32.xlu0 %v2394_v48  ;;  %v2313_v53 = vmul.f32 %v4353_v42, %v6003_v41  ;;  %v2353_v33 = vmul.f32 %v6016_v49, %v2314_v21  ;;  %v4355_v28 = vpop.eup %4354  ;;  %v2064_v20 = vpop.f32.mrf.mxu1 }
 0x350   :  { %4372 = vrcp.f32 %v2221_v35  ;;  %v2224_v31 = vadd.f32 1.0, %v4355_v28  ;;  %v3746_v41 = vmul.f32 -1.442695, %v6087_v46  ;;  %v6093_v44 = vadd.f32 %v5964_v26, %v2064_v20  ;;  %v4357_v9 = vpop.eup %4356 }
 0x351   :  { %4374 = vpow2.f32 %v3744_v56  ;;  %v2403_v19 = vsel %vm203_vm0, %v2353_v33, 0.0  ;;  %v2352_v34 = vmul.f32 %v6016_v49, %v2313_v53  ;;  %v2223_v40 = vadd.f32 1.0, %v4357_v9 }
 0x352   :  { %4376 = vpow2.f32 %v3743_v57  ;;  %2404 = vadd.xlane.f32.xlu1 %v2403_v19  ;;  %v3745_v63 = vmul.f32 -1.442695, %v6093_v44  ;;  %v3992_v23 = vpop.f32.mrf.mxu1 }
 0x353   :  { %v2400_v12 = vsel %vm203_vm0, %v2352_v34, 0.0  ;;  %4378 = vrcp.f32 %v2224_v31  ;;  %v4359_v0 = vpop.eup %4358  ;;  %v6098_v15 = vadd.f32 %v3992_v23, %v5964_v26 }
 0x354   :  { %2401 = vadd.xlane.f32.xlu0 %v2400_v12  ;;  %4380 = vpow2.f32 %v3746_v41  ;;  %v2226_v51 = vadd.f32 1.0, %v4359_v0  ;;  %v2074_v18 = vpop.f32.mrf.mxu1 }
 0x355   :  { %4382 = vrcp.f32 %v2223_v40  ;;  %v3748_v7 = vmul.f32 -1.442695, %v6098_v15  ;;  %v6103_v36 = vadd.f32 %v5964_v26, %v2074_v18 }
 0x356   :  { %v4361_v3 = vpop.eup %4360  ;;  %4384 = vpow2.f32 %v3745_v63  ;;  %v3995_v55 = vpop.f32.mrf.mxu1 }
 0x357   :  { %v4363_v16 = vpop.eup %4362  ;;  %v2316_v43 = vmul.f32 %v4361_v3, %v6007_v1  ;;  %4386 = vrcp.f32 %v2226_v51  ;;  %v3747_v8 = vmul.f32 -1.442695, %v6103_v36  ;;  %v6108_v6 = vadd.f32 %v3995_v55, %v5964_v26 }
 0x358   :  { %v4365_v4 = vpop.eup %4364  ;;  %v2315_v50 = vmul.f32 %v4363_v16, %v6011_v5  ;;  %4388 = vpow2.f32 %v3748_v7  ;;  %v2084_v30 = vpop.f32.mrf.mxu1 }
 0x359   :  { %v4367_v11 = vpop.eup %4366  ;;  %v2225_v54 = vadd.f32 1.0, %v4365_v4  ;;  %v2355_v37 = vmul.f32 %v6016_v49, %v2316_v43  ;;  %v3750_v5 = vmul.f32 -1.442695, %v6108_v6  ;;  %v6114_v24 = vadd.f32 %v5964_v26, %v2084_v30 }
 0x35a   :  { %v2228_v1 = vadd.f32 1.0, %v4367_v11  ;;  %v2354_v61 = vmul.f32 %v6016_v49, %v2315_v50  ;;  %v4369_v62 = vpop.eup %4368  ;;  %v3998_v48 = vpop.f32.mrf.mxu1 }
 0x35b   :  { %4390 = vrcp.f32 %v2225_v54  ;;  %v4371_v39 = vpop.eup %4370  ;;  %v2318_v59 = vmul.f32 %v4369_v62, %v6023_v58  ;;  %v2409_v45 = vsel %vm203_vm0, %v2355_v37, 0.0  ;;  %v3749_v27 = vmul.f32 -1.442695, %v6114_v24 }
 0x35c   :  { %4392 = vrcp.f32 %v2228_v1  ;;  %v2406_v10 = vsel %vm203_vm0, %v2354_v61, 0.0  ;;  %v2227_v21 = vadd.f32 1.0, %v4371_v39  ;;  %2410 = vadd.xlane.f32.xlu1 %v2409_v45  ;;  %v6122_v56 = vadd.f32 %v3998_v48, %v5964_v26  ;;  %v2094_v33 = vpop.f32.mrf.mxu1 }
 0x35d   :  { %v4373_v29 = vpop.eup %4372  ;;  %4394 = vpow2.f32 %v3747_v8  ;;  %2407 = vadd.xlane.f32.xlu0 %v2406_v10  ;;  %v2357_v58 = vmul.f32 %v6016_v49, %v2318_v59  ;;  %v6127_v20 = vadd.f32 %v5964_v26, %v2094_v33  ;;  %v6149_v10 = vpop.permute.xlu1 %2481 }
 0x35e   :  { %v4375_v42 = vpop.eup %4374  ;;  %v2317_v35 = vmul.f32 %v4373_v29, %v6030_v22  ;;  %4396 = vpow2.f32 %v3750_v5  ;;  %v3752_v28 = vmul.f32 -1.442695, %v6122_v56 }
 0x35f   :  { %v4377_v53 = vpop.eup %4376  ;;  %4398 = vrcp.f32 %v2227_v21  ;;  %v2230_v60 = vadd.f32 1.0, %v4375_v42  ;;  %v2415_v22 = vsel %vm203_vm0, %v2357_v58, 0.0  ;;  %v3751_v9 = vmul.f32 -1.442695, %v6127_v20 }
 0x360   :  { %v2229_v57 = vadd.f32 1.0, %v4377_v53  ;;  %4400 = vpow2.f32 %v3749_v27  ;;  %v4379_v19 = vpop.eup %4378  ;;  %v2356_v34 = vmul.f32 %v6016_v49, %v2317_v35  ;;  %2416 = vadd.xlane.f32.xlu1 %v2415_v22 }
 0x361   :  { %4402 = vrcp.f32 %v2230_v60  ;;  %v4381_v31 = vpop.eup %4380  ;;  %v2320_v41 = vmul.f32 %v4379_v19, %v6038_v52 }
 0x362   :  { %4404 = vrcp.f32 %v2229_v57  ;;  %v4383_v12 = vpop.eup %4382  ;;  %v2232_v40 = vadd.f32 1.0, %v4381_v31  ;;  %v2412_v63 = vsel %vm203_vm0, %v2356_v34, 0.0 }
 0x363   :  { %4406 = vpow2.f32 %v3752_v28  ;;  %v4385_v23 = vpop.eup %4384  ;;  %v2319_v0 = vmul.f32 %v4383_v12, %v6045_v17  ;;  %v2359_v3 = vmul.f32 %v6016_v49, %v2320_v41  ;;  %2413 = vadd.xlane.f32.xlu0 %v2412_v63 }
 0x364   :  { %4408 = vpow2.f32 %v3751_v9  ;;  %v4387_v51 = vpop.eup %4386  ;;  %v2231_v18 = vadd.f32 1.0, %v4385_v23  ;;  %v6165_v9 = vpop.permute.xlu1 %2488 }
 0x365   :  { %4410 = vrcp.f32 %v2232_v40  ;;  %v4389_v52 = vpop.eup %4388  ;;  %v2322_v16 = vmul.f32 %v4387_v51, %v6051_v38  ;;  %v2421_v43 = vsel %vm203_vm0, %v2359_v3, 0.0  ;;  %v2358_v7 = vmul.f32 %v6016_v49, %v2319_v0 }
 0x366   :  { %4412 = vrcp.f32 %v2231_v18  ;;  %v2234_v4 = vadd.f32 1.0, %v4389_v52  ;;  %2422 = vadd.xlane.f32.xlu1 %v2421_v43 }
 0x367   :  { %v2361_v17 = vmul.f32 %v6016_v49, %v2322_v16  ;;  %v2418_v55 = vsel %vm203_vm0, %v2358_v7, 0.0  ;;  %v4001_v1 = vpop.f32.mrf.mxu1 }
 0x368   :  { %v4391_v50 = vpop.eup %4390  ;;  %4414 = vrcp.f32 %v2234_v4  ;;  %2419 = vadd.xlane.f32.xlu0 %v2418_v55  ;;  %v6145_v62 = vadd.f32 %v4001_v1, %v5964_v26  ;;  %v6177_v16 = vpop.permute.xlu1 %2492 }
 0x369   :  { %v4393_v11 = vpop.eup %4392  ;;  %v2321_v54 = vmul.f32 %v4391_v50, %v6059_v32  ;;  %v2427_v30 = vsel %vm203_vm0, %v2361_v17, 0.0  ;;  %v2104_v45 = vpop.f32.mrf.mxu1 }
 0x36a   :  { %v4395_v8 = vpop.eup %4394  ;;  %v2324_v38 = vmul.f32 %v4393_v11, %v6064_v14  ;;  %2428 = vadd.xlane.f32.xlu1 %v2427_v30  ;;  %v3754_v21 = vmul.f32 -1.442695, %v6145_v62  ;;  %v6154_v27 = vadd.f32 %v5964_v26, %v2104_v45  ;;  %v3760_v11 = vld [vmem:[%s6385_s15] ss:$0 sm:$0xff] }
 0x36b   :  { %v4397_v37 = vpop.eup %4396  ;;  %v2233_v61 = vadd.f32 1.0, %v4395_v8  ;;  %v2360_v5 = vmul.f32 %v6016_v49, %v2321_v54  ;;  %v4023_v43 = vpop.f32.mrf.mxu1 }
 0x36c   :  { %v4399_v39 = vpop.eup %4398  ;;  %v2236_v59 = vadd.f32 1.0, %v4397_v37  ;;  %v2363_v32 = vmul.f32 %v6016_v49, %v2324_v38  ;;  %v3753_v33 = vmul.f32 -1.442695, %v6154_v27 }
 0x36d   :  { %v4401_v29 = vpop.eup %4400  ;;  %v2323_v14 = vmul.f32 %v4399_v39, %v6071_v25  ;;  %4416 = vrcp.f32 %v2233_v61  ;;  %v2424_v58 = vsel %vm203_vm0, %v2360_v5, 0.0  ;;  %v3432_v61 = vpop.f32.mrf.mxu1 }
 0x36e   :  { %v4403_v48 = vpop.eup %4402  ;;  %4418 = vrcp.f32 %v2236_v59  ;;  %v2235_v42 = vadd.f32 1.0, %v4401_v29  ;;  %v2433_v35 = vsel %vm203_vm0, %v2363_v32, 0.0  ;;  %2425 = vadd.xlane.f32.xlu0 %v2424_v58 }
 0x36f   :  { %v4405_v53 = vpop.eup %4404  ;;  %v2326_v60 = vmul.f32 %v4403_v48, %v6075_v2  ;;  %4420 = vpow2.f32 %v3754_v21  ;;  %2434 = vadd.xlane.f32.xlu1 %v2433_v35  ;;  %v2362_v25 = vmul.f32 %v6016_v49, %v2323_v14  ;;  %v6192_v14 = vpop.permute.xlu1 %2569 }
 0x370   :  { %v4407_v57 = vpop.eup %4406  ;;  %v2325_v26 = vmul.f32 %v4405_v53, %v6081_v13  ;;  %4422 = vrcp.f32 %v2235_v42  ;;  %v6169_v13 = vpop.permute.xlu0 %2477 }
 0x371   :  { %v4409_v28 = vpop.eup %4408  ;;  %v2238_v19 = vadd.f32 1.0, %v4407_v57  ;;  %4424 = vpow2.f32 %v3753_v33  ;;  %v2365_v22 = vmul.f32 %v6016_v49, %v2326_v60  ;;  %v2430_v2 = vsel %vm203_vm0, %v2362_v25, 0.0 }
 0x372   :  { %v4411_v34 = vpop.eup %4410  ;;  %v2237_v31 = vadd.f32 1.0, %v4409_v28  ;;  %v2364_v41 = vmul.f32 %v6016_v49, %v2325_v26  ;;  %2431 = vadd.xlane.f32.xlu0 %v2430_v2 }
 0x373   :  { %v2328_v12 = vmul.f32 %v4411_v34, %v6087_v46  ;;  %4426 = vrcp.f32 %v2238_v19  ;;  %v2439_v40 = vsel %vm203_vm0, %v2365_v22, 0.0  ;;  %v4413_v63 = vpop.eup %4412  ;;  %v6204_v22 = vpop.permute.xlu1 %2580 }
 0x374   :  { %4428 = vrcp.f32 %v2237_v31  ;;  %2440 = vadd.xlane.f32.xlu1 %v2439_v40  ;;  %v2327_v23 = vmul.f32 %v4413_v63, %v6093_v44  ;;  %v2436_v51 = vsel %vm203_vm0, %v2364_v41, 0.0  ;;  %v6180_v4 = vpop.permute.xlu0 %2565 }
 0x375   :  { %v2367_v0 = vmul.f32 %v6016_v49, %v2328_v12  ;;  %v4415_v3 = vpop.eup %4414 }
 0x376   :  { %v2330_v18 = vmul.f32 %v4415_v3, %v6098_v15  ;;  %2437 = vadd.xlane.f32.xlu0 %v2436_v51  ;;  %v2366_v52 = vmul.f32 %v6016_v49, %v2327_v23 }
 0x377   :  { %v2445_v46 = vsel %vm203_vm0, %v2367_v0, 0.0 }
 0x378   :  { %2446 = vadd.xlane.f32.xlu1 %v2445_v46  ;;  %v2369_v7 = vmul.f32 %v6016_v49, %v2330_v18  ;;  %v2442_v50 = vsel %vm203_vm0, %v2366_v52, 0.0  ;;  %v4012_v15 = vpop.f32.mrf.mxu0  ;;  %v6195_v48 = vpop.permute.xlu0 %2576 }
 0x379   :  { %v3438_v1 = vadd.f32 %v4023_v43, %v4012_v15 }
 0x37a   :  { %v4417_v44 = vpop.eup %4416  ;;  %v2451_v54 = vsel %vm203_vm0, %v2369_v7, 0.0  ;;  %2443 = vadd.xlane.f32.xlu0 %v2442_v50  ;;  %v3357_v5 = vpop.f32.mrf.mxu0 }
 0x37b   :  { %v4419_v17 = vpop.eup %4418  ;;  %v2329_v55 = vmul.f32 %v4417_v44, %v6103_v36  ;;  %v3449_v45 = vadd.f32 %v3760_v11, %v3438_v1  ;;  %v3433_v32 = vadd.f32 %v3432_v61, %v3357_v5 }
 0x37c   :  { %v4421_v8 = vpop.eup %4420  ;;  %v2332_v38 = vmul.f32 %v4419_v17, %v6108_v6  ;;  %2452 = vadd.xlane.f32.xlu1 %v2451_v54  ;;  %v2500_v31 = vpop.permute.xlu0 %2499 }
 0x37d   :  { %v4423_v30 = vpop.eup %4422  ;;  %v2240_v37 = vadd.f32 1.0, %v4421_v8  ;;  %v2368_v39 = vmul.f32 %v6016_v49, %v2329_v55  ;;  %v3762_v35 = vmul.f32 -1.442695, %v3449_v45  ;;  %v3448_v58 = vadd.f32 %v3760_v11, %v3433_v32  ;;  %v4445_v55 = vld [vmem:[#allocation7 + $0x8] sm:$0xff] }
 0x37e   :  { %v4425_v36 = vpop.eup %4424  ;;  %v2331_v59 = vmul.f32 %v4423_v30, %v6114_v24  ;;  %v2371_v29 = vmul.f32 %v6016_v49, %v2332_v38  ;;  %v2640_v15 = vrot.slane %v4445_v55, %v6479_v47  ;;  %v6487_v55 = vld [vmem:[#allocation25_spill] sm:$0xff] }
 0x37f   :  { %4430 = vrcp.f32 %v2240_v37  ;;  %v2239_v21 = vadd.f32 1.0, %v4425_v36  ;;  %v2448_v6 = vsel %vm203_vm0, %v2368_v39, 0.0  ;;  %v3761_v57 = vmul.f32 -1.442695, %v3448_v58 }
 0x380   :  { %v4427_v42 = vpop.eup %4426  ;;  %v2457_v53 = vsel %vm203_vm0, %v2371_v29, 0.0  ;;  %2449 = vadd.xlane.f32.xlu0 %v2448_v6  ;;  %v2370_v24 = vmul.f32 %v6016_v49, %v2331_v59  ;;  %v6208_v2 = vpop.permute.xlu0 %2587 }
 0x381   :  { %v4429_v60 = vpop.eup %4428  ;;  %v2334_v33 = vmul.f32 %v4427_v42, %v6122_v56  ;;  %4432 = vrcp.f32 %v2239_v21  ;;  %2458 = vadd.xlane.f32.xlu1 %v2457_v53 }
 0x382   :  { %v2333_v25 = vmul.f32 %v4429_v60, %v6127_v20  ;;  %4434 = vpow2.f32 %v3762_v35  ;;  %v2454_v28 = vsel %vm203_vm0, %v2370_v24, 0.0  ;;  %v2504_v20 = vpop.permute.xlu1 %2503 }
 0x383   :  { %v2373_v26 = vmul.f32 %v6016_v49, %v2334_v33  ;;  %4436 = vpow2.f32 %v3761_v57 }
 0x384   :  { %2455 = vadd.xlane.f32.xlu0 %v2454_v28  ;;  %v2372_v19 = vmul.f32 %v6016_v49, %v2333_v25  ;;  %v2511_v43 = vpop.permute.xlu0 %2510 }
 0x385   :  { %v2463_v34 = vsel %vm203_vm0, %v2373_v26, 0.0 }
 0x386   :  { %2464 = vadd.xlane.f32.xlu1 %v2463_v34  ;;  %v2460_v56 = vsel %vm203_vm0, %v2372_v19, 0.0  ;;  %v6213_v51 = vpop.permute.xlu1 %2591 }
 0x388   :  { %2461 = vadd.xlane.f32.xlu0 %v2460_v56 }
 0x38a   :  { %v2515_v44 = vpop.permute.xlu1 %2514 }
 0x38c   :  { %v4431_v41 = vpop.eup %4430 }
 0x38d   :  { %v2336_v12 = vmul.f32 %v4431_v41, %v6145_v62 }
 0x38e   :  { %v4433_v40 = vpop.eup %4432  ;;  %v6220_v50 = vpop.permute.xlu1 %2602 }
 0x38f   :  { %v4435_v63 = vpop.eup %4434  ;;  %v2335_v23 = vmul.f32 %v4433_v40, %v6154_v27  ;;  %v2375_v0 = vmul.f32 %v6016_v49, %v2336_v12  ;;  %v6218_v27 = vpop.permute.xlu0 %2598  ;;  %v6480_v12 = vld [vmem:[#allocation26_spill] sm:$0xff] }
 0x390   :  { %v3457_v3 = vadd.f32 1.0, %v4435_v63  ;;  %v4437_v18 = vpop.eup %4436 }
 0x391   :  { %v2469_v46 = vsel %vm203_vm0, %v2375_v0, 0.0  ;;  %v2374_v52 = vmul.f32 %v6016_v49, %v2335_v23  ;;  %v3456_v7 = vadd.f32 1.0, %v4437_v18  ;;  %v6481_v0 = vld [vmem:[#allocation28_spill] sm:$0xff] }
 0x392   :  { %2470 = vadd.xlane.f32.xlu1 %v2469_v46  ;;  %4438 = vrcp.f32 %v3457_v3  ;;  %v2526_v8 = vpop.permute.xlu1 %2525  ;;  %v6482_v46 = vld [vmem:[#allocation24_spill] sm:$0xff] }
 0x393   :  { %v2466_v62 = vsel %vm203_vm0, %v2374_v52, 0.0  ;;  %4440 = vrcp.f32 %v3456_v7  ;;  %v2522_v17 = vpop.permute.xlu0 %2521 }
 0x394   :  { %2467 = vadd.xlane.f32.xlu0 %v2466_v62 }
 0x396   :  { %v6227_v30 = vpop.permute.xlu1 %2613 }
 0x397   :  { %v6223_v1 = vpop.permute.xlu0 %2609 }
 0x39a   :  { %v2537_v61 = vpop.permute.xlu1 %2536 }
 0x39b   :  { %v2533_v37 = vpop.permute.xlu0 %2532 }
 0x39e   :  { %v6231_v47 = vpop.permute.xlu1 %2624 }
 0x39f   :  { %v4439_v11 = vpop.eup %4438  ;;  %v6229_v5 = vpop.permute.xlu0 %2620 }
 0x3a0   :  { %v4441_v54 = vpop.eup %4440  ;;  %v3463_v38 = vmul.f32 %v4439_v11, %v3449_v45  ;;  %v6488_v11 = vld [vmem:[#allocation31_spill] sm:$0xff] }
 0x3a1   :  { %v3462_v49 = vmul.f32 %v4441_v54, %v3448_v58  ;;  %v6489_v54 = vld [vmem:[#allocation33_spill] sm:$0xff] }
 0x3a2   :  { %v6235_v36 = vpop.permute.xlu1 %2547 }
 0x3a3   :  { %2646 = vbcast.lane.b32.xlu1 %v2640_v15, 264  ;;  %4032 = vmatprep.mubr.msk.f32.mxu0 %vm203_vm0, %v3462_v49  ;;  %v6233_v39 = vpop.permute.xlu0 %2543 }
 0x3a4   :  { %4033 = vmatmul.mubr.msk.f32.vlgmr.msra.gmra.mxu0 %vm203_vm0, %v3463_v38 }
 0x3a6   :  { %v6239_v45 = vpop.permute.xlu1 %2635 }
 0x3a7   :  { %v6237_v59 = vpop.permute.xlu0 %2631 }
 0x3aa   :  { %2642 = vbcast.lane.b32.xlu0 %v2640_v15, 256  ;;  %v6243_v29 = vpop.permute.xlu1 %2558 }
 0x3ab   :  { %v6241_v32 = vpop.permute.xlu0 %2554 }
 0x3c6   :  { %v2381_v42 = vpop.xlane.xlu1 %2380 }
 0x3c7   :  { %v2649_v41 = vmul.f32 %v6149_v10, %v2381_v42 }
 0x3c8   :  { %v2378_v21 = vpop.xlane.xlu0 %2377 }
 0x3c9   :  { %v2648_v57 = vmul.f32 %v6169_v13, %v2378_v21  ;;  %v6484_v13 = vld [vmem:[#allocation30_spill] sm:$0xff]  ;;  %v2681_v15 = vmul.f32 %v2649_v41, %v6487_v55  ;;  %v6490_v41 = vld [vmem:[#allocation35_spill] sm:$0xff] }
 0x3cc   :  { %v2387_v6 = vpop.xlane.xlu0 %2386 }
 0x3cd   :  { %v2651_v26 = vmul.f32 %v6177_v16, %v2387_v6  ;;  %v6485_v16 = vld [vmem:[#allocation29_spill] sm:$0xff] }
 0x3ce   :  { %v2393_v58 = vpop.xlane.xlu1 %2392 }
 0x3cf   :  { %v2653_v34 = vmul.f32 %v2504_v20, %v2393_v58  ;;  %v2713_v58 = vsel %vm621_vm1, %v2681_v15, 0.0 }
 0x3d0   :  { %v2384_v35 = vpop.xlane.xlu0 %2383 }
 0x3d1   :  { %v2650_v33 = vmul.f32 %v6165_v9, %v2384_v35  ;;  %v2680_v9 = vmul.f32 %v2648_v57, %v6482_v46  ;;  %v2685_v62 = vmul.f32 %v2653_v34, %v6485_v16  ;;  %v6492_v16 = vld [vmem:[#allocation37_spill] sm:$0xff] }
 0x3d2   :  { %v2399_v24 = vpop.xlane.xlu1 %2398 }
 0x3d3   :  { %v2682_v40 = vmul.f32 %v2650_v33, %v6480_v12  ;;  %v2655_v63 = vmul.f32 %v2515_v44, %v2399_v24  ;;  %v2731_v6 = vsel %vm621_vm1, %v2685_v62, 0.0 }
 0x3d4   :  { %v2390_v53 = vpop.xlane.xlu0 %2389 }
 0x3d5   :  { %v2652_v25 = vmul.f32 %v2500_v31, %v2390_v53  ;;  %v6483_v31 = vld [vmem:[#allocation27_spill] sm:$0xff]  ;;  %v2721_v10 = vsel %vm621_vm1, %v2682_v40, 0.0  ;;  %v2687_v44 = vmul.f32 %v2655_v63, %v6488_v11  ;;  %v6491_v63 = vld [vmem:[#allocation34_spill] sm:$0xff] }
 0x3d6   :  { %v2683_v52 = vmul.f32 %v2651_v26, %v6483_v31 }
 0x3d7   :  { %v2684_v3 = vmul.f32 %v2652_v25, %v6481_v0  ;;  %v2740_v53 = vsel %vm621_vm1, %v2687_v44, 0.0  ;;  %v6493_v44 = vld [vmem:[#allocation36_spill] sm:$0xff] }
 0x3d8   :  { %v2396_v60 = vpop.xlane.xlu0 %2395  ;;  %v2722_v38 = vsel %vm621_vm1, %v2683_v52, 0.0 }
 0x3d9   :  { %v2654_v19 = vmul.f32 %v2511_v43, %v2396_v60  ;;  %v6486_v43 = vld [vmem:[#allocation32_spill] sm:$0xff]  ;;  %v2723_v42 = vadd.f32 %v2722_v38, %v2721_v10 }
 0x3db   :  { %v2405_v28 = vpop.xlane.xlu1 %2404  ;;  %v2686_v7 = vmul.f32 %v2654_v19, %v6484_v13 }
 0x3dc   :  { %v2657_v18 = vmul.f32 %v2526_v8, %v2405_v28  ;;  %v2712_v8 = vsel %vm621_vm1, %v2680_v9, 0.0 }
 0x3dd   :  { %v2402_v56 = vpop.xlane.xlu0 %2401  ;;  %v2739_v21 = vsel %vm621_vm1, %v2686_v7, 0.0  ;;  %v2714_v25 = vadd.f32 %v2713_v58, %v2712_v8 }
 0x3de   :  { %v2656_v23 = vmul.f32 %v2522_v17, %v2402_v56  ;;  %v2730_v17 = vsel %vm621_vm1, %v2684_v3, 0.0  ;;  %v2689_v49 = vmul.f32 %v2657_v18, %v6489_v54  ;;  %v2741_v26 = vadd.f32 %v2740_v53, %v2739_v21 }
 0x3df   :  { %v2732_v24 = vadd.f32 %v2731_v6, %v2730_v17  ;;  %v2724_v56 = vrot.slane %v2723_v42, 4  ;;  %v2715_v0 = vrot.slane %v2714_v25, 4 }
 0x3e0   :  { %v2688_v20 = vmul.f32 %v2656_v23, %v6486_v43  ;;  %v2749_v57 = vsel %vm621_vm1, %v2689_v49, 0.0  ;;  %v2742_v3 = vrot.slane %v2741_v26, 4 }
 0x3e1   :  { %v2733_v40 = vrot.slane %v2732_v24, 4  ;;  %v2725_v13 = vadd.f32 %v2724_v56, %v2723_v42 }
 0x3e2   :  { %v2748_v35 = vsel %vm621_vm1, %v2688_v20, 0.0  ;;  %v2716_v20 = vadd.f32 %v2715_v0, %v2714_v25  ;;  %v2743_v55 = vadd.f32 %v2742_v3, %v2741_v26 }
 0x3e3   :  { %v2750_v19 = vadd.f32 %v2749_v57, %v2748_v35  ;;  %v2726_v54 = vrot.slane %v2725_v13, 2 }
 0x3e4   :  { %v2717_v42 = vrot.slane %v2716_v20, 2  ;;  %v2744_v35 = vrot.slane %v2743_v55, 2 }
 0x3e5   :  { %v2411_v60 = vpop.xlane.xlu1 %2410  ;;  %v2751_v9 = vrot.slane %v2750_v19, 4  ;;  %v2727_v25 = vadd.f32 %v2726_v54, %v2725_v13 }
 0x3e6   :  { %v2408_v33 = vpop.xlane.xlu0 %2407  ;;  %v2659_v28 = vmul.f32 %v2537_v61, %v2411_v60  ;;  %v2745_v56 = vadd.f32 %v2744_v35, %v2743_v55 }
 0x3e7   :  { %v2658_v34 = vmul.f32 %v2533_v37, %v2408_v33  ;;  %v2734_v37 = vadd.f32 %v2733_v40, %v2732_v24  ;;  %v2752_v10 = vadd.f32 %v2751_v9, %v2750_v19  ;;  %v6494_v24 = vld [vmem:[#allocation39_spill] sm:$0xff]  ;;  %v2728_v0 = vrot.slane %v2727_v25, 1 }
 0x3e8   :  { %v2691_v12 = vmul.f32 %v2659_v28, %v6490_v41 }
 0x3e9   :  { %v2690_v23 = vmul.f32 %v2658_v34, %v6491_v63  ;;  %v2417_v18 = vpop.xlane.xlu1 %2416  ;;  %v2735_v8 = vrot.slane %v2734_v37, 2  ;;  %v2753_v53 = vrot.slane %v2752_v10, 2  ;;  %v2718_v34 = vadd.f32 %v2717_v42, %v2716_v20 }
 0x3ea   :  { %v2758_v46 = vsel %vm621_vm1, %v2691_v12, 0.0  ;;  %v2661_v31 = vmul.f32 %v6235_v36, %v2417_v18 }
 0x3eb   :  { %v2757_v52 = vsel %vm621_vm1, %v2690_v23, 0.0  ;;  %v2736_v28 = vadd.f32 %v2735_v8, %v2734_v37  ;;  %v2754_v12 = vadd.f32 %v2753_v53, %v2752_v10 }
 0x3ec   :  { %v2759_v61 = vadd.f32 %v2758_v46, %v2757_v52  ;;  %v2414_v7 = vpop.xlane.xlu0 %2413  ;;  %v2693_v62 = vmul.f32 %v2661_v31, %v6492_v16  ;;  %v2719_v31 = vrot.slane %v2718_v34, 1  ;;  %v2746_v52 = vrot.slane %v2745_v56, 1 }
 0x3ed   :  { %v2660_v43 = vmul.f32 %v6233_v39, %v2414_v7  ;;  %v2737_v9 = vrot.slane %v2736_v28, 1  ;;  %v2755_v7 = vrot.slane %v2754_v12, 1  ;;  %v2729_v16 = vadd.f32 %v2728_v0, %v2727_v25 }
 0x3ee   :  { %v2760_v15 = vrot.slane %v2759_v61, 4  ;;  %v2767_v38 = vsel %vm621_vm1, %v2693_v62, 0.0  ;;  %v2720_v10 = vadd.f32 %v2719_v31, %v2718_v34 }
 0x3ef   :  { %v2423_v11 = vpop.xlane.xlu1 %2422  ;;  %v2692_v17 = vmul.f32 %v2660_v43, %v6493_v44  ;;  %v2738_v55 = vadd.f32 %v2737_v9, %v2736_v28 }
 0x3f0   :  { %v2761_v49 = vadd.f32 %v2760_v15, %v2759_v61  ;;  %v2663_v36 = vmul.f32 %v6243_v29, %v2423_v11  ;;  %v6495_v29 = vld [vmem:[#allocation38_spill] sm:$0xff]  ;;  %v2747_v11 = vadd.f32 %v2746_v52, %v2745_v56 }
 0x3f1   :  { %v2766_v21 = vsel %vm621_vm1, %v2692_v17, 0.0  ;;  %v2420_v6 = vpop.xlane.xlu0 %2419  ;;  %v2756_v17 = vadd.f32 %v2755_v7, %v2754_v12  ;;  %v6501_v52 = vld [vmem:[#allocation46_spill] sm:$0xff] }
 0x3f2   :  { %v2768_v39 = vadd.f32 %v2767_v38, %v2766_v21  ;;  %v2662_v58 = vmul.f32 %v6241_v32, %v2420_v6  ;;  %v2695_v60 = vmul.f32 %v2663_v36, %v6494_v24  ;;  %v2762_v57 = vrot.slane %v2761_v49, 2 }
 0x3f3   :  { %v2429_v33 = vpop.xlane.xlu1 %2428 }
 0x3f4   :  { %v2769_v26 = vrot.slane %v2768_v39, 4  ;;  %v2694_v19 = vmul.f32 %v2662_v58, %v6495_v29  ;;  %v2776_v40 = vsel %vm621_vm1, %v2695_v60, 0.0  ;;  %v2763_v3 = vadd.f32 %v2762_v57, %v2761_v49 }
 0x3f5   :  { %v2873_v49 = vsel %vm2872_vm2, %v2729_v16, %v2720_v10 }
 0x3f6   :  { %v2770_v41 = vadd.f32 %v2769_v26, %v2768_v39  ;;  %v2775_v63 = vsel %vm621_vm1, %v2694_v19, 0.0  ;;  %v2764_v62 = vrot.slane %v2763_v3, 1  ;;  %v2875_v21 = vsel %vm2874_vm3, %v2738_v55, %v2873_v49  ;;  %v4446_v26 = vld [vmem:[%s6438_s30] sm:$0xff]  ;;  %v6505_v55 = vld [vmem:[#allocation50_spill] sm:$0xff] }
 0x3f7   :  { %v2426_v32 = vpop.xlane.xlu0 %2425  ;;  %v2777_v46 = vadd.f32 %v2776_v40, %v2775_v63  ;;  %v2877_v42 = vsel %vm2876_vm4, %v2747_v11, %v2875_v21  ;;  %v2665_v19 = vmul.f32 %v6192_v14, %v2429_v33  ;;  %v6496_v14 = vld [vmem:[#allocation42_spill] sm:$0xff] }
 0x3f8   :  { %v2435_v23 = vpop.xlane.xlu1 %2434  ;;  %v2771_v18 = vrot.slane %v2770_v41, 2  ;;  %v2765_v36 = vadd.f32 %v2764_v62, %v2763_v3  ;;  %v2879_v39 = vsel %vm2878_vm5, %v2756_v17, %v2877_v42  ;;  %v2664_v12 = vmul.f32 %v6180_v4, %v2426_v32  ;;  %v6498_v3 = vld [vmem:[#allocation43_spill] sm:$0xff]  ;;  %v6500_v32 = vld [vmem:[#allocation40_spill] sm:$0xff]  ;;  %v6508_v42 = vld [vmem:[#allocation53_spill] sm:$0xff] }
 0x3f9   :  { %v2778_v61 = vrot.slane %v2777_v46, 4  ;;  %v2667_v34 = vmul.f32 %v6204_v22, %v2435_v23 }
 0x3fa   :  { %v2772_v13 = vadd.f32 %v2771_v18, %v2770_v41  ;;  %v2881_v53 = vsel %vm2880_vm6, %v2765_v36, %v2879_v39  ;;  %v6507_v36 = vld [vmem:[#allocation51_spill] sm:$0xff] }
 0x3fb   :  { %v2432_v37 = vpop.xlane.xlu0 %2431  ;;  %v2779_v43 = vadd.f32 %v2778_v61, %v2777_v46  ;;  %v2699_v18 = vmul.f32 %v2667_v34, %v6498_v3  ;;  %v6499_v46 = vld [vmem:[#allocation44_spill] sm:$0xff]  ;;  %v6502_v61 = vld [vmem:[#allocation45_spill] sm:$0xff] }
 0x3fc   :  { %v2773_v15 = vrot.slane %v2772_v13, 1  ;;  %v2666_v29 = vmul.f32 %v6195_v48, %v2432_v37 }
 0x3fd   :  { %v2441_v20 = vpop.xlane.xlu1 %2440  ;;  %v2780_v44 = vrot.slane %v2779_v43, 2  ;;  %v2794_v11 = vsel %vm621_vm1, %v2699_v18, 0.0 }
 0x3fe   :  { %v2774_v6 = vadd.f32 %v2773_v15, %v2772_v13  ;;  %v2669_v0 = vmul.f32 %v6213_v51, %v2441_v20  ;;  %v2698_v33 = vmul.f32 %v2666_v29, %v6496_v14 }
 0x3ff   :  { %v2438_v54 = vpop.xlane.xlu0 %2437  ;;  %v2781_v8 = vadd.f32 %v2780_v44, %v2779_v43  ;;  %v6504_v43 = vld [vmem:[#allocation47_spill] sm:$0xff] }
 0x400   :  { %v2883_v25 = vsel %vm2882_vm7, %v2774_v6, %v2881_v53  ;;  %v2668_v56 = vmul.f32 %v6208_v2, %v2438_v54  ;;  %v6497_v2 = vld [vmem:[#allocation41_spill] sm:$0xff]  ;;  %v2701_v7 = vmul.f32 %v2669_v0, %v6502_v61  ;;  %v2793_v62 = vsel %vm621_vm1, %v2698_v33, 0.0 }
 0x401   :  { %v2447_v38 = vpop.xlane.xlu1 %2446  ;;  %v2782_v35 = vrot.slane %v2781_v8, 1  ;;  %v2697_v23 = vmul.f32 %v2665_v19, %v6497_v2  ;;  %v2795_v21 = vadd.f32 %v2794_v11, %v2793_v62 }
 0x402   :  { %v2671_v22 = vmul.f32 %v6220_v50, %v2447_v38  ;;  %v2700_v9 = vmul.f32 %v2668_v56, %v6499_v46  ;;  %v6503_v50 = vld [vmem:[#allocation48_spill] sm:$0xff] }
 0x403   :  { %v2444_v58 = vpop.xlane.xlu0 %2443  ;;  %v2783_v24 = vadd.f32 %v2782_v35, %v2781_v8  ;;  %v2785_v10 = vsel %vm621_vm1, %v2697_v23, 0.0  ;;  %v2796_v19 = vrot.slane %v2795_v21, 4 }
 0x404   :  { %v2670_v40 = vmul.f32 %v6218_v27, %v2444_v58  ;;  %v2696_v27 = vmul.f32 %v2664_v12, %v6500_v32  ;;  %v2703_v20 = vmul.f32 %v2671_v22, %v6504_v43 }
 0x405   :  { %v2453_v60 = vpop.xlane.xlu1 %2452  ;;  %v2885_v57 = vsel %vm2884_vm8, %v2783_v24, %v2883_v25  ;;  %v6509_v24 = vld [vmem:[#allocation52_spill] sm:$0xff] }
 0x406   :  { %v2895_v28 = vadd.f32 %v4446_v26, %v2885_v57  ;;  %v2673_v31 = vmul.f32 %v6227_v30, %v2453_v60  ;;  %v2702_v13 = vmul.f32 %v2670_v40, %v6501_v52  ;;  %v2784_v54 = vsel %vm621_vm1, %v2696_v27, 0.0 }
 0x407   :  { %v2812_v39 = vsel %vm621_vm1, %v2703_v20, 0.0  ;;  %v2786_v25 = vadd.f32 %v2785_v10, %v2784_v54 }
 0x408   :  { %3558 = vst.msk [vmem:[%s6388_s18] sm:$0xff] %vm621_vm1, %v2895_v28  ;;  %v2811_v49 = vsel %vm621_vm1, %v2702_v13, 0.0 }
 0x409   :  { %v2450_v41 = vpop.xlane.xlu0 %2449  ;;  %v2813_v26 = vadd.f32 %v2812_v39, %v2811_v49  ;;  %v2787_v40 = vrot.slane %v2786_v25, 4 }
 0x40a   :  { %v2459_v63 = vpop.xlane.xlu1 %2458  ;;  %v2672_v48 = vmul.f32 %v6223_v1, %v2450_v41 }
 0x40b   :  { %v2675_v51 = vmul.f32 %v6231_v47, %v2459_v63  ;;  %v2802_v47 = vsel %vm621_vm1, %v2700_v9, 0.0  ;;  %v2814_v63 = vrot.slane %v2813_v26, 4  ;;  %v2788_v23 = vadd.f32 %v2787_v40, %v2786_v25 }
 0x40c   :  { %v2704_v37 = vmul.f32 %v2672_v48, %v6503_v50  ;;  %v2797_v48 = vadd.f32 %v2796_v19, %v2795_v21 }
 0x40d   :  { %v2456_v4 = vpop.xlane.xlu0 %2455  ;;  %v2707_v8 = vmul.f32 %v2675_v51, %v6507_v36  ;;  %v2815_v3 = vadd.f32 %v2814_v63, %v2813_v26  ;;  %v2789_v13 = vrot.slane %v2788_v23, 2 }
 0x40e   :  { %v2674_v1 = vmul.f32 %v6229_v5, %v2456_v4  ;;  %v6506_v5 = vld [vmem:[#allocation49_spill] sm:$0xff]  ;;  %v2820_v6 = vsel %vm621_vm1, %v2704_v37, 0.0  ;;  %v2798_v9 = vrot.slane %v2797_v48, 2 }
 0x40f   :  { %v2465_v16 = vpop.xlane.xlu1 %2464  ;;  %v2705_v44 = vmul.f32 %v2673_v31, %v6506_v5  ;;  %v2816_v51 = vrot.slane %v2815_v3, 2 }
 0x410   :  { %v2677_v30 = vmul.f32 %v6239_v45, %v2465_v16  ;;  %v2706_v15 = vmul.f32 %v2674_v1, %v6505_v55  ;;  %v2803_v45 = vsel %vm621_vm1, %v2701_v7, 0.0  ;;  %v6510_v7 = vld [vmem:[#allocation55_spill] sm:$0xff]  ;;  %v2799_v16 = vadd.f32 %v2798_v9, %v2797_v48 }
 0x411   :  { %v2462_v17 = vpop.xlane.xlu0 %2461  ;;  %v2804_v58 = vadd.f32 %v2803_v45, %v2802_v47  ;;  %v2821_v57 = vsel %vm621_vm1, %v2705_v44, 0.0  ;;  %v2817_v10 = vadd.f32 %v2816_v51, %v2815_v3 }
 0x412   :  { %v2676_v38 = vmul.f32 %v6237_v59, %v2462_v17  ;;  %v2709_v35 = vmul.f32 %v2677_v30, %v6508_v42  ;;  %v2829_v53 = vsel %vm621_vm1, %v2706_v15, 0.0  ;;  %v2830_v59 = vsel %vm621_vm1, %v2707_v8, 0.0  ;;  %v6511_v30 = vld [vmem:[#allocation54_spill] sm:$0xff] }
 0x413   :  { %v2822_v28 = vadd.f32 %v2821_v57, %v2820_v6  ;;  %v2831_v56 = vadd.f32 %v2830_v59, %v2829_v53  ;;  %v2805_v41 = vrot.slane %v2804_v58, 4  ;;  %v2790_v15 = vadd.f32 %v2789_v13, %v2788_v23  ;;  %v4448_v23 = vld [vmem:[#allocation2 + $0x8] sm:$0xff] }
 0x414   :  { %v2708_v60 = vmul.f32 %v2676_v38, %v6509_v24  ;;  %v2839_v34 = vsel %vm621_vm1, %v2709_v35, 0.0  ;;  %v2800_v44 = vrot.slane %v2799_v16, 1  ;;  %v2818_v38 = vrot.slane %v2817_v10, 1 }
 0x415   :  { %v2823_v0 = vrot.slane %v2822_v28, 4  ;;  %v2832_v14 = vrot.slane %v2831_v56, 4  ;;  %v2806_v22 = vadd.f32 %v2805_v41, %v2804_v58  ;;  %v2791_v8 = vrot.slane %v2790_v15, 1 }
 0x416   :  { %v2838_v29 = vsel %vm621_vm1, %v2708_v60, 0.0  ;;  %v2801_v6 = vadd.f32 %v2800_v44, %v2799_v16  ;;  %v2819_v24 = vadd.f32 %v2818_v38, %v2817_v10 }
 0x417   :  { %v2840_v12 = vadd.f32 %v2839_v34, %v2838_v29  ;;  %v2824_v46 = vadd.f32 %v2823_v0, %v2822_v28  ;;  %v2833_v31 = vadd.f32 %v2832_v14, %v2831_v56  ;;  %v2807_v32 = vrot.slane %v2806_v22, 2  ;;  %v4447_v0 = vld [vmem:[%s6438_s30 + $0x8] sm:$0xff]  ;;  %v3763_v14 = vld [vmem:[%s6387_s17] ss:$0 sm:$0xff] }
 0x418   :  { %v2792_v53 = vadd.f32 %v2791_v8, %v2790_v15 }
 0x419   :  { %v2841_v2 = vrot.slane %v2840_v12, 4  ;;  %v2825_v61 = vrot.slane %v2824_v46, 2  ;;  %v2834_v62 = vrot.slane %v2833_v31, 2  ;;  %v2808_v43 = vadd.f32 %v2807_v32, %v2806_v22 }
 0x41a   :  { %v2886_v57 = vsel %vm2872_vm2, %v2801_v6, %v2792_v53 }
 0x41b   :  { %v2471_v33 = vpop.xlane.xlu1 %2470  ;;  %v2842_v27 = vadd.f32 %v2841_v2, %v2840_v12  ;;  %v2826_v11 = vadd.f32 %v2825_v61, %v2824_v46  ;;  %v2835_v17 = vadd.f32 %v2834_v62, %v2833_v31  ;;  %v2809_v49 = vrot.slane %v2808_v43, 1  ;;  %v4449_v46 = vld [vmem:[#allocation2] sm:$0xff] }
 0x41d   :  { %v2468_v18 = vpop.xlane.xlu0 %2467  ;;  %v2843_v20 = vrot.slane %v2842_v27, 2  ;;  %v2827_v21 = vrot.slane %v2826_v11, 1  ;;  %v2836_v42 = vrot.slane %v2835_v17, 1  ;;  %v2810_v39 = vadd.f32 %v2809_v49, %v2808_v43 }
 0x41f   :  { %v2647_v4 = vpop.permute.xlu1 %2646  ;;  %v2844_v36 = vadd.f32 %v2843_v20, %v2842_v27  ;;  %v2828_v25 = vadd.f32 %v2827_v21, %v2826_v11  ;;  %v2837_v26 = vadd.f32 %v2836_v42, %v2835_v17  ;;  %v2887_v28 = vsel %vm2874_vm3, %v2810_v39, %v2886_v57 }
 0x420   :  { %v2679_v52 = vmul.f32 %v2647_v4, %v2471_v33  ;;  %v2888_v19 = vsel %vm2876_vm4, %v2819_v24, %v2887_v28 }
 0x421   :  { %v2643_v1 = vpop.permute.xlu0 %2642  ;;  %v2845_v58 = vrot.slane %v2844_v36, 1  ;;  %v2889_v56 = vsel %vm2878_vm5, %v2828_v25, %v2888_v19 }
 0x422   :  { %v2711_v50 = vmul.f32 %v2679_v52, %v6510_v7  ;;  %v2678_v37 = vmul.f32 %v2643_v1, %v2468_v18  ;;  %v2890_v41 = vsel %vm2880_vm6, %v2837_v26, %v2889_v56 }
 0x423   :  { %v2846_v29 = vadd.f32 %v2845_v58, %v2844_v36 }
 0x424   :  { %v2710_v55 = vmul.f32 %v2678_v37, %v6511_v30  ;;  %v2848_v47 = vsel %vm621_vm1, %v2711_v50, 0.0 }
 0x425   :  { %v2891_v40 = vsel %vm2882_vm7, %v2846_v29, %v2890_v41 }
 0x426   :  { %v2847_v5 = vsel %vm621_vm1, %v2710_v55, 0.0 }
 0x427   :  { %v2849_v54 = vadd.f32 %v2848_v47, %v2847_v5 }
 0x429   :  { %v2850_v45 = vrot.slane %v2849_v54, 4 }
 0x42b   :  { %v2851_v35 = vadd.f32 %v2850_v45, %v2849_v54 }
 0x42d   :  { %v2852_v60 = vrot.slane %v2851_v35, 2 }
 0x42f   :  { %v2853_v59 = vadd.f32 %v2852_v60, %v2851_v35 }
 0x431   :  { %v2854_v34 = vrot.slane %v2853_v59, 1 }
 0x433   :  { %v2855_v12 = vadd.f32 %v2854_v34, %v2853_v59 }
 0x435   :  { %v2892_v63 = vsel %vm2884_vm8, %v2855_v12, %v2891_v40 }
 0x436   :  { %v2896_v48 = vadd.f32 %v4447_v0, %v2892_v63 }
 0x438   :  { %3559 = vst.msk [vmem:[%s6388_s18 + $0x8] sm:$0xff] %vm621_vm1, %v2896_v48  ;;  %s4630_s18 = scalar_lea.vmem %s3570_s27, 256 }
 0x439   :  { %p4631_p3 = scmp.ne.s32.totalorder %s3570_s27, %s4630_s18  ;;  %p4636_p5 = scmp.lt.s32.totalorder %s4630_s18, %s4630_s18 }
 0x43b   :  { %p4637_p6 = por %p4636_p5, %p4635_p4 }
 0x43d   :  { %p4638_p7 = pnand %p4637_p6, %p4631_p3 }
 0x464   :  { %v4034_v33 = vpop.f32.mrf.mxu0 }
 0x465   :  { %v3553_v22 = vadd.f32 %v4034_v33, %v3763_v14 }
 0x466   :  { %v3547_v2 = vpop.f32.mrf.mxu0 }
 0x467   :  { %v3557_v3 = vadd.f32 %v4448_v23, %v3553_v22  ;;  %v3548_v18 = vadd.f32 %v3763_v14, %v3547_v2 }
 0x469   :  { %3561 = vst.msk [vmem:[#allocation17 + $0x8] sm:$0xff] %vm203_vm0, %v3557_v3  ;;  %v3556_v9 = vadd.f32 %v4449_v46, %v3548_v18 }
 0x46b   :  { %3560 = vst.msk [vmem:[#allocation17] sm:$0xff] %vm203_vm0, %v3556_v9 }
 0x46c   :  { %4641 = shalt.err (!%p4638_p7)
}
 0x46d   :  { %3575 = dma.vmem_to_hbm [thread:$0]  %s3570_s27, 256, %s6389_s19, [#allocation4], %s4664_s22, %s4664_s22, %s4665_s2  }
 0x46e   :  { %4660 = dma.done.wait [#allocation4], 256  }
 0x46f   :  { %4661 = vsyncadd [#allocation4], 4294967040 }
 0x470   :  { %3581 = vsyncpa [#allocation3], 1 }
 0x471   :  { %3582 = vsyncpa [#allocation6], 1 }
 0x472   :  { %3583 = vsyncpa [#allocation9], 1 }
 0x473   :  { %3584 = vsyncpa [#allocation12], 1 }
 0x474   :  { %3585 = vsyncpa [#allocation15], 1 }
 0x475   :  { %3586 = vsyncpa [#allocation4], 1 }

</bundles_post_ra>
